<compile_context>
chip_gen: v5e
topology: v5e:2x2
jax: 0.10.0
libtpu: 0.0.40
codegen_flags: <defaults>
</compile_context>

<pallas_src>
import functools

import jax
import jax.numpy as jnp
from jax.experimental import pallas as pl
from jax.experimental.pallas import tpu as pltpu


MXU_DTYPE = jnp.bfloat16  # MXU operand dtype (accumulation is always f32).


# ---------------------------------------------------------------------------
# Kernel 1: tiled matmul + bias (used for the fused conv_out ++ qkv_conv conv)
# ---------------------------------------------------------------------------
def _matmul_bias_kernel(a_ref, w_ref, b_ref, o_ref):
    # a_ref: (tm, K) bf16, w_ref: (K, Np) bf16, b_ref: (1, Np) f32, o_ref: (tm, Np)
    acc = jnp.dot(a_ref[...], w_ref[...], preferred_element_type=jnp.float32)
    o_ref[...] = (acc + b_ref[...]).astype(o_ref.dtype)


def matmul_bias(a, w, b, *, tm=256, operand_dtype=MXU_DTYPE, out_dtype=jnp.float32):
    """out = a @ w + b.  Rows tiled (bounded tm, M padded); N zero-padded to a
    multiple of 128 so every output store is lane-dense; bias kept in f32."""
    M, K = a.shape
    K2, Nc = w.shape
    assert K == K2
    # Lane-dense output: pad the output-channel axis up to a multiple of 128.
    Np = max(128, pl.cdiv(Nc, 128) * 128)
    # Bounded row tile (never the whole array); pad M instead of tm=M fallback.
    tm = min(tm, max(8, pl.cdiv(M, 8) * 8))
    Mp = pl.cdiv(M, tm) * tm

    a_p = a.astype(operand_dtype)
    if Mp != M:
        a_p = jnp.pad(a_p, ((0, Mp - M), (0, 0)))
    w_p = w.astype(operand_dtype)
    b_p = b.reshape(1, Nc).astype(jnp.float32)
    if Np != Nc:
        w_p = jnp.pad(w_p, ((0, 0), (0, Np - Nc)))
        b_p = jnp.pad(b_p, ((0, 0), (0, Np - Nc)))

    out = pl.pallas_call(
        _matmul_bias_kernel,
        out_shape=jax.ShapeDtypeStruct((Mp, Np), out_dtype),
        grid_spec=pltpu.PrefetchScalarGridSpec(
            num_scalar_prefetch=0,
            grid=(Mp // tm,),
            in_specs=[
                pl.BlockSpec((tm, K), lambda i: (i, 0)),
                pl.BlockSpec((K, Np), lambda i: (0, 0)),
                pl.BlockSpec((1, Np), lambda i: (0, 0)),
            ],
            out_specs=pl.BlockSpec((tm, Np), lambda i: (i, 0)),
        ),
        compiler_params=pltpu.CompilerParams(dimension_semantics=("parallel",)),
    )(a_p, w_p, b_p)
    return out[:M, :Nc]


# ---------------------------------------------------------------------------
# Kernel 2: multi-head attention, lane-dense transposed output (dvh, HW)
# ---------------------------------------------------------------------------
def _make_attn_kernel(Nh, HW, TQ, scale):
    nQ = HW // TQ

    def kernel(q_ref, k_ref, v_ref, o_ref):
        # q_ref/k_ref: (Nh, dkh, HW), v_ref: (Nh, dvh, HW), o_ref: (Nh, dvh, HW)
        for h in range(Nh):  # all heads of one batch handled per grid step
            k_h = k_ref[h]   # (dkh, HW)
            v_h = v_ref[h]   # (dvh, HW)

            def q_block(qb, carry, h=h, k_h=k_h, v_h=v_h):
                qs = pl.multiple_of(qb * TQ, TQ)
                q_blk = q_ref[h, :, pl.ds(qs, TQ)] * scale            # (dkh, TQ)
                # logits^T[kv, q] = sum_d k[d, kv] * q[d, q]          -> (HW, TQ)
                logits_t = jax.lax.dot_general(
                    k_h, q_blk, (((0,), (0,)), ((), ())),
                    preferred_element_type=jnp.float32)
                m = jnp.max(logits_t, axis=0, keepdims=True)          # (1, TQ)
                p = jnp.exp(logits_t - m)                             # (HW, TQ)
                s = jnp.sum(p, axis=0, keepdims=True)                 # (1, TQ)
                # Deferred normalisation: scale the small (dvh, TQ) result, not p.
                out_t = jnp.dot(v_h, p.astype(v_h.dtype),
                                preferred_element_type=jnp.float32)   # (dvh, TQ)
                out_t = out_t * pl.reciprocal(s, approx=True)
                o_ref[h, :, pl.ds(qs, TQ)] = out_t.astype(o_ref.dtype)
                return carry

            jax.lax.fori_loop(0, nQ, q_block, 0, unroll=True)

    return kernel


def attention_pallas(flat_q, flat_k, flat_v, *, Nh, scale, tq=128):
    """flat_q/flat_k: (N*Nh, dkh, HW), flat_v: (N*Nh, dvh, HW)
    -> transposed attention output (N*Nh, dvh, HW), f32 (lane-dense last dim)."""
    BNh, dkh, HW = flat_q.shape
    dvh = flat_v.shape[1]
    assert BNh % Nh == 0
    nb = BNh // Nh
    TQ = tq if HW % tq == 0 else HW   # query blocking (128-wide when possible)

    return pl.pallas_call(
        _make_attn_kernel(Nh, HW, TQ, scale),
        out_shape=jax.ShapeDtypeStruct((BNh, dvh, HW), jnp.float32),
        grid_spec=pltpu.PrefetchScalarGridSpec(
            num_scalar_prefetch=0,
            grid=(nb,),
            in_specs=[
                pl.BlockSpec((Nh, dkh, HW), lambda n: (n, 0, 0)),
                pl.BlockSpec((Nh, dkh, HW), lambda n: (n, 0, 0)),
                pl.BlockSpec((Nh, dvh, HW), lambda n: (n, 0, 0)),
            ],
            out_specs=pl.BlockSpec((Nh, dvh, HW), lambda n: (n, 0, 0)),
        ),
        compiler_params=pltpu.CompilerParams(dimension_semantics=("parallel",)),
    )(flat_q, flat_k, flat_v)


# ---------------------------------------------------------------------------
# Kernel 3: epilogue — 1x1 attn_out projection fused with the channel concat
# ---------------------------------------------------------------------------
def _proj_concat_kernel(c_ref, a_ref, w_ref, b_ref, o_ref):
    # c_ref: (tm, Cc) conv_out slab, a_ref: (tm, dv) attn slab,
    # w_ref: (dv, dv), b_ref: (1, dv), o_ref: (tm, Cc + dv)
    cc = c_ref.shape[-1]
    proj = jnp.dot(a_ref[...], w_ref[...], preferred_element_type=jnp.float32)
    proj = proj + b_ref[...]
    o_ref[:, :cc] = c_ref[...].astype(o_ref.dtype)
    o_ref[:, cc:] = proj.astype(o_ref.dtype)


def proj_concat(conv_slab, attn_slab, w2, b2, *, tm=256):
    M, Cc = conv_slab.shape
    dv_in, dv_out = w2.shape
    assert attn_slab.shape == (M, dv_in)
    Co = Cc + dv_out
    tm = min(tm, max(8, pl.cdiv(M, 8) * 8))
    Mp = pl.cdiv(M, tm) * tm
    if Mp != M:
        conv_slab = jnp.pad(conv_slab, ((0, Mp - M), (0, 0)))
        attn_slab = jnp.pad(attn_slab, ((0, Mp - M), (0, 0)))

    out = pl.pallas_call(
        _proj_concat_kernel,
        out_shape=jax.ShapeDtypeStruct((Mp, Co), jnp.float32),
        grid_spec=pltpu.PrefetchScalarGridSpec(
            num_scalar_prefetch=0,
            grid=(Mp // tm,),
            in_specs=[
                pl.BlockSpec((tm, Cc), lambda i: (i, 0)),
                pl.BlockSpec((tm, dv_in), lambda i: (i, 0)),
                pl.BlockSpec((dv_in, dv_out), lambda i: (0, 0)),
                pl.BlockSpec((1, dv_out), lambda i: (0, 0)),
            ],
            out_specs=pl.BlockSpec((tm, Co), lambda i: (i, 0)),
        ),
        compiler_params=pltpu.CompilerParams(dimension_semantics=("parallel",)),
    )(conv_slab, attn_slab, w2.astype(jnp.float32),
      b2.reshape(1, dv_out).astype(jnp.float32))
    return out[:M]


# ---------------------------------------------------------------------------
# Glue (NHWC im2col, reshapes, parameter handling) in plain JAX
# ---------------------------------------------------------------------------
def im2col_nhwc(x_nhwc, k, pad):
    """(N, H, W, C) -> (N*H*W, k*k*C), column order = (ki, kj, c)."""
    N, H, W, C = x_nhwc.shape
    xp = jnp.pad(x_nhwc, ((0, 0), (pad, pad), (pad, pad), (0, 0)))
    cols = [xp[:, i:i + H, j:j + W, :] for i in range(k) for j in range(k)]
    patches = jnp.concatenate(cols, axis=-1)          # (N, H, W, k*k*C)
    return patches.reshape(N * H * W, k * k * C)


def augmented_conv_forward(x, params, *, dk, dv, Nh, kernel_size):
    N, Cin, H, W = x.shape
    pad = (kernel_size - 1) // 2
    HW = H * W
    dkh = dk // Nh
    dvh = dv // Nh
    cout_conv = params["w_conv"].shape[0]

    # --- fused conv_out ++ qkv_conv: one im2col + one Pallas matmul -----------
    x_nhwc = x.transpose(0, 2, 3, 1)
    A = im2col_nhwc(x_nhwc, kernel_size, pad)                       # (M, Cin*k*k)
    w_all = jnp.concatenate([params["w_conv"], params["w_qkv"]], axis=0)
    b_all = jnp.concatenate([params["b_conv"], params["b_qkv"]], axis=0)
    Wm = w_all.transpose(2, 3, 1, 0).reshape(kernel_size * kernel_size * Cin, -1)
    fused = matmul_bias(A, Wm, b_all)                               # (M, Cc+2dk+dv) f32

    conv_slab = fused[:, :cout_conv]                                # (M, Cc)
    qkv = fused[:, cout_conv:]                                      # (M, 2dk+dv)

    # split heads exactly like torch (channel-major head split from NCHW qkv)
    def to_heads(slab, ch):
        return (slab.reshape(N, HW, Nh, ch // Nh)
                    .transpose(0, 2, 3, 1)
                    .reshape(N * Nh, ch // Nh, HW))

    flat_q = to_heads(qkv[:, :dk], dk)
    flat_k = to_heads(qkv[:, dk:2 * dk], dk)
    flat_v = to_heads(qkv[:, 2 * dk:], dv)

    scale = float(dkh) ** (-0.5)
    out_t = attention_pallas(flat_q.astype(MXU_DTYPE),
                             flat_k.astype(MXU_DTYPE),
                             flat_v.astype(MXU_DTYPE),
                             Nh=Nh, scale=scale)                    # (N*Nh, dvh, HW) f32

    # Reference semantics: attn (N, Nh, HW, dvh) is RAW-reshaped to
    # (N, Nh, dvh, H, W) (interleaving spatial and dvh, as in the PyTorch code),
    # then head-combined to (N, dv, H, W).
    attn = out_t.reshape(N, Nh, dvh, HW).transpose(0, 1, 3, 2)      # (N, Nh, HW, dvh)
    attn = attn.reshape(N, Nh, dvh, H, W).reshape(N, dv, H, W)

    # TODO(synk): the 1x1 attn_out projection cannot be fused into the attention
    # kernel without reproducing the interleaving raw reshape inside it; instead
    # it is fused with the channel concat in the epilogue kernel below.
    attn_slab = attn.transpose(0, 2, 3, 1).reshape(N * H * W, dv)   # (M, dv)
    W2 = params["w_attn"].reshape(dv, dv)                           # (out, in)
    out_slab = proj_concat(conv_slab, attn_slab, W2.T, params["b_attn"])

    out_ch = cout_conv + dv
    return out_slab.reshape(N, H, W, out_ch).transpose(0, 3, 1, 2)  # NCHW


# ---------------------------------------------------------------------------
# Main
# ---------------------------------------------------------------------------
if __name__ == "__main__":
    # Module config (mirrors AugmentedConv.__init__)
    in_channels = 4
    out_channels = 16
    kernel_size = 3
    dk, dv, Nh = 16, 8, 2
    stride = 1  # stride=2 not implemented here
    assert dk % Nh == 0 and dv % Nh == 0

    key = jax.random.PRNGKey(0)
    k0, k1, k2, k3, k4, k5, kx = jax.random.split(key, 7)

    params = {
        # conv_out: Conv2d(in_channels, out_channels - dv, k)
        "w_conv": 0.1 * jax.random.normal(
            k0, (out_channels - dv, in_channels, kernel_size, kernel_size), jnp.float32),
        "b_conv": 0.1 * jax.random.normal(k1, (out_channels - dv,), jnp.float32),
        # qkv_conv: Conv2d(in_channels, 2*dk + dv, k)
        "w_qkv": 0.1 * jax.random.normal(
            k2, (2 * dk + dv, in_channels, kernel_size, kernel_size), jnp.float32),
        "b_qkv": 0.1 * jax.random.normal(k3, (2 * dk + dv,), jnp.float32),
        # attn_out: Conv2d(dv, dv, 1)
        "w_attn": 0.1 * jax.random.normal(k4, (dv, dv, 1, 1), jnp.float32),
        "b_attn": 0.1 * jax.random.normal(k5, (dv,), jnp.float32),
    }

    # Input: NCHW
    x = jax.random.normal(kx, (2, in_channels, 16, 16), jnp.float32)

    fwd = jax.jit(functools.partial(
        augmented_conv_forward, dk=dk, dv=dv, Nh=Nh, kernel_size=kernel_size))
    out = fwd(x, params)
    out = jax.block_until_ready(out)
    assert out.shape == (2, out_channels, 16, 16), out.shape
    assert jnp.all(jnp.isfinite(out))
    print("KERNEL_OK")
</pallas_src>

<mosaic_0001>
module attributes {stable_mosaic.version = 11 : i64} {
  func.func @_matmul_bias_kernel(%arg0: i32, %arg1: memref<256x36xbf16, #tpu.memory_space<vmem>>, %arg2: memref<36x128xbf16, #tpu.memory_space<vmem>>, %arg3: memref<1x128xf32, #tpu.memory_space<vmem>>, %arg4: memref<256x128xf32, #tpu.memory_space<vmem>>) attributes {dimension_semantics = [#tpu.dimension_semantics<parallel>], iteration_bounds = array<i64: 2>, scalar_prefetch = 0 : i64, scratch_operands = 0 : i64, tpu.core_type = #tpu.core_type<tc>, window_params = [{transform_indices = @transform_0, window_bounds = array<i64: 256, 36>}, {pipeline_mode = #tpu.pipeline_mode<synchronous>, transform_indices = @transform_1, window_bounds = array<i64: 36, 128>}, {pipeline_mode = #tpu.pipeline_mode<synchronous>, transform_indices = @transform_2, window_bounds = array<i64: 1, 128>}, {transform_indices = @transform_3, window_bounds = array<i64: 256, 128>}]} {
    %c0 = arith.constant 0 : index
    %c0_0 = arith.constant 0 : index
    %0 = vector.load %arg1[%c0, %c0_0] : memref<256x36xbf16, #tpu.memory_space<vmem>>, vector<256x36xbf16>
    %c0_1 = arith.constant 0 : index
    %c0_2 = arith.constant 0 : index
    %1 = vector.load %arg2[%c0_1, %c0_2] : memref<36x128xbf16, #tpu.memory_space<vmem>>, vector<36x128xbf16>
    %cst = arith.constant dense<0.000000e+00> : vector<256x128xf32>
    %2 = tpu.matmul %0, %1, %cst {dimension_numbers = #tpu.dot_dimension_numbers<[1], [0], [0], [1], [0, 0, 1, 1], [], []>} : vector<256x36xbf16>, vector<36x128xbf16>, vector<256x128xf32> -> vector<256x128xf32>
    %c0_3 = arith.constant 0 : index
    %c0_4 = arith.constant 0 : index
    %3 = vector.load %arg3[%c0_3, %c0_4] : memref<1x128xf32, #tpu.memory_space<vmem>>, vector<1x128xf32>
    %4 = vector.broadcast %3 : vector<1x128xf32> to vector<256x128xf32>
    %5 = arith.addf %2, %4 : vector<256x128xf32>
    %c0_5 = arith.constant 0 : index
    %c0_6 = arith.constant 0 : index
    %6 = vector.load %arg4[%c0_5, %c0_6] : memref<256x128xf32, #tpu.memory_space<vmem>>, vector<256x128xf32>
    tpu.vector_store %arg4[%c0_5, %c0_6], %5 {strides = array<i32>} : memref<256x128xf32, #tpu.memory_space<vmem>>, vector<256x128xf32>,
    return
  }
  func.func @transform_0(%arg0: i32) -> (i32, i32) {
    %c0_i32 = arith.constant 0 : i32
    %c0_i32_0 = arith.constant 0 : i32
    return %arg0, %c0_i32 : i32, i32
  }
  func.func @transform_1(%arg0: i32) -> (i32, i32) {
    %c0_i32 = arith.constant 0 : i32
    %c0_i32_0 = arith.constant 0 : i32
    %c0_i32_1 = arith.constant 0 : i32
    return %c0_i32, %c0_i32_0 : i32, i32
  }
  func.func @transform_2(%arg0: i32) -> (i32, i32) {
    %c0_i32 = arith.constant 0 : i32
    %c0_i32_0 = arith.constant 0 : i32
    %c0_i32_1 = arith.constant 0 : i32
    return %c0_i32, %c0_i32_0 : i32, i32
  }
  func.func @transform_3(%arg0: i32) -> (i32, i32) {
    %c0_i32 = arith.constant 0 : i32
    %c0_i32_0 = arith.constant 0 : i32
    return %arg0, %c0_i32 : i32, i32
  }
}

module attributes {stable_mosaic.version = 11 : i64} {
  func.func @kernel(%arg0: i32, %arg1: memref<2x8x256xbf16, #tpu.memory_space<vmem>>, %arg2: memref<2x8x256xbf16, #tpu.memory_space<vmem>>, %arg3: memref<2x4x256xbf16, #tpu.memory_space<vmem>>, %arg4: memref<2x4x256xf32, #tpu.memory_space<vmem>>) attributes {dimension_semantics = [#tpu.dimension_semantics<parallel>], iteration_bounds = array<i64: 2>, scalar_prefetch = 0 : i64, scratch_operands = 0 : i64, tpu.core_type = #tpu.core_type<tc>, window_params = [{transform_indices = @transform_0, window_bounds = array<i64: 2, 8, 256>}, {transform_indices = @transform_1, window_bounds = array<i64: 2, 8, 256>}, {transform_indices = @transform_2, window_bounds = array<i64: 2, 4, 256>}, {transform_indices = @transform_3, window_bounds = array<i64: 2, 4, 256>}]} {
    %c0 = arith.constant 0 : index
    %c0_0 = arith.constant 0 : index
    %c0_1 = arith.constant 0 : index
    %0 = vector.load %arg2[%c0, %c0_0, %c0_1] : memref<2x8x256xbf16, #tpu.memory_space<vmem>>, vector<1x8x256xbf16>
    %1 = vector.shape_cast %0 : vector<1x8x256xbf16> to vector<8x256xbf16>
    %c0_2 = arith.constant 0 : index
    %c0_3 = arith.constant 0 : index
    %c0_4 = arith.constant 0 : index
    %2 = vector.load %arg3[%c0_2, %c0_3, %c0_4] : memref<2x4x256xbf16, #tpu.memory_space<vmem>>, vector<1x4x256xbf16>
    %3 = vector.shape_cast %2 : vector<1x4x256xbf16> to vector<4x256xbf16>
    %c0_i32 = arith.constant 0 : i32
    %c128_i32 = arith.constant 128 : i32
    %4 = arith.muli %c0_i32, %c128_i32 : i32
    %5 = tpu.assume_multiple %4, 128 : i32
    %c0_5 = arith.constant 0 : index
    %c0_6 = arith.constant 0 : index
    %6 = arith.index_cast %5 : i32 to index
    %7 = vector.load %arg1[%c0_5, %c0_6, %6] : memref<2x8x256xbf16, #tpu.memory_space<vmem>>, vector<1x8x128xbf16>
    %8 = vector.shape_cast %7 : vector<1x8x128xbf16> to vector<8x128xbf16>
    %cst = arith.constant 3.535160e-01 : bf16
    %9 = vector.broadcast %cst : bf16 to vector<8x128xbf16>
    %10 = arith.mulf %8, %9 : vector<8x128xbf16>
    %cst_7 = arith.constant dense<0.000000e+00> : vector<256x128xf32>
    %11 = tpu.matmul %1, %10, %cst_7 {dimension_numbers = #tpu.dot_dimension_numbers<[0], [0], [1], [1], [0, 1, 1, 1], [], []>} : vector<8x256xbf16>, vector<8x128xbf16>, vector<256x128xf32> -> vector<256x128xf32>
    %cst_8 = arith.constant dense<0xFF800000> : vector<128xf32>
    %12 = vector.multi_reduction <maximumf>, %11, %cst_8 [0] : vector<256x128xf32> to vector<128xf32>
    %13 = vector.shape_cast %12 : vector<128xf32> to vector<1x128xf32>
    %14 = vector.broadcast %13 : vector<1x128xf32> to vector<256x128xf32>
    %15 = arith.subf %11, %14 : vector<256x128xf32>
    %16 = math.exp %15 : vector<256x128xf32>
    %cst_9 = arith.constant dense<0.000000e+00> : vector<128xf32>
    %17 = vector.multi_reduction <add>, %16, %cst_9 [0] : vector<256x128xf32> to vector<128xf32>
    %18 = vector.shape_cast %17 : vector<128xf32> to vector<1x128xf32>
    %19 = arith.truncf %16 : vector<256x128xf32> to vector<256x128xbf16>
    %cst_10 = arith.constant dense<0.000000e+00> : vector<4x128xf32>
    %20 = tpu.matmul %3, %19, %cst_10 {dimension_numbers = #tpu.dot_dimension_numbers<[1], [0], [0], [1], [0, 0, 1, 1], [], []>} : vector<4x256xbf16>, vector<256x128xbf16>, vector<4x128xf32> -> vector<4x128xf32>
    %21 = tpu.reciprocal %18 {approx = true} : vector<1x128xf32> -> vector<1x128xf32>
    %22 = vector.broadcast %21 : vector<1x128xf32> to vector<4x128xf32>
    %23 = arith.mulf %20, %22 : vector<4x128xf32>
    %c0_11 = arith.constant 0 : index
    %c0_12 = arith.constant 0 : index
    %24 = arith.index_cast %5 : i32 to index
    %25 = vector.load %arg4[%c0_11, %c0_12, %24] : memref<2x4x256xf32, #tpu.memory_space<vmem>>, vector<1x4x128xf32>
    %26 = vector.shape_cast %25 : vector<1x4x128xf32> to vector<4x128xf32>
    %27 = vector.shape_cast %23 : vector<4x128xf32> to vector<1x4x128xf32>
    tpu.vector_store %arg4[%c0_11, %c0_12, %24], %27 {strides = array<i32>} : memref<2x4x256xf32, #tpu.memory_space<vmem>>, vector<1x4x128xf32>,
    %c1_i32 = arith.constant 1 : i32
    %c128_i32_13 = arith.constant 128 : i32
    %28 = arith.muli %c1_i32, %c128_i32_13 : i32
    %29 = tpu.assume_multiple %28, 128 : i32
    %c0_14 = arith.constant 0 : index
    %c0_15 = arith.constant 0 : index
    %30 = arith.index_cast %29 : i32 to index
    %31 = vector.load %arg1[%c0_14, %c0_15, %30] : memref<2x8x256xbf16, #tpu.memory_space<vmem>>, vector<1x8x128xbf16>
    %32 = vector.shape_cast %31 : vector<1x8x128xbf16> to vector<8x128xbf16>
    %cst_16 = arith.constant 3.535160e-01 : bf16
    %33 = vector.broadcast %cst_16 : bf16 to vector<8x128xbf16>
    %34 = arith.mulf %32, %33 : vector<8x128xbf16>
    %cst_17 = arith.constant dense<0.000000e+00> : vector<256x128xf32>
    %35 = tpu.matmul %1, %34, %cst_17 {dimension_numbers = #tpu.dot_dimension_numbers<[0], [0], [1], [1], [0, 1, 1, 1], [], []>} : vector<8x256xbf16>, vector<8x128xbf16>, vector<256x128xf32> -> vector<256x128xf32>
    %cst_18 = arith.constant dense<0xFF800000> : vector<128xf32>
    %36 = vector.multi_reduction <maximumf>, %35, %cst_18 [0] : vector<256x128xf32> to vector<128xf32>
    %37 = vector.shape_cast %36 : vector<128xf32> to vector<1x128xf32>
    %38 = vector.broadcast %37 : vector<1x128xf32> to vector<256x128xf32>
    %39 = arith.subf %35, %38 : vector<256x128xf32>
    %40 = math.exp %39 : vector<256x128xf32>
    %cst_19 = arith.constant dense<0.000000e+00> : vector<128xf32>
    %41 = vector.multi_reduction <add>, %40, %cst_19 [0] : vector<256x128xf32> to vector<128xf32>
    %42 = vector.shape_cast %41 : vector<128xf32> to vector<1x128xf32>
    %43 = arith.truncf %40 : vector<256x128xf32> to vector<256x128xbf16>
    %cst_20 = arith.constant dense<0.000000e+00> : vector<4x128xf32>
    %44 = tpu.matmul %3, %43, %cst_20 {dimension_numbers = #tpu.dot_dimension_numbers<[1], [0], [0], [1], [0, 0, 1, 1], [], []>} : vector<4x256xbf16>, vector<256x128xbf16>, vector<4x128xf32> -> vector<4x128xf32>
    %45 = tpu.reciprocal %42 {approx = true} : vector<1x128xf32> -> vector<1x128xf32>
    %46 = vector.broadcast %45 : vector<1x128xf32> to vector<4x128xf32>
    %47 = arith.mulf %44, %46 : vector<4x128xf32>
    %c0_21 = arith.constant 0 : index
    %c0_22 = arith.constant 0 : index
    %48 = arith.index_cast %29 : i32 to index
    %49 = vector.load %arg4[%c0_21, %c0_22, %48] : memref<2x4x256xf32, #tpu.memory_space<vmem>>, vector<1x4x128xf32>
    %50 = vector.shape_cast %49 : vector<1x4x128xf32> to vector<4x128xf32>
    %51 = vector.shape_cast %47 : vector<4x128xf32> to vector<1x4x128xf32>
    tpu.vector_store %arg4[%c0_21, %c0_22, %48], %51 {strides = array<i32>} : memref<2x4x256xf32, #tpu.memory_space<vmem>>, vector<1x4x128xf32>,
    %c2_i32 = arith.constant 2 : i32
    %c1 = arith.constant 1 : index
    %c0_23 = arith.constant 0 : index
    %c0_24 = arith.constant 0 : index
    %52 = vector.load %arg2[%c1, %c0_23, %c0_24] : memref<2x8x256xbf16, #tpu.memory_space<vmem>>, vector<1x8x256xbf16>
    %53 = vector.shape_cast %52 : vector<1x8x256xbf16> to vector<8x256xbf16>
    %c1_25 = arith.constant 1 : index
    %c0_26 = arith.constant 0 : index
    %c0_27 = arith.constant 0 : index
    %54 = vector.load %arg3[%c1_25, %c0_26, %c0_27] : memref<2x4x256xbf16, #tpu.memory_space<vmem>>, vector<1x4x256xbf16>
    %55 = vector.shape_cast %54 : vector<1x4x256xbf16> to vector<4x256xbf16>
    %c0_i32_28 = arith.constant 0 : i32
    %c128_i32_29 = arith.constant 128 : i32
    %56 = arith.muli %c0_i32_28, %c128_i32_29 : i32
    %57 = tpu.assume_multiple %56, 128 : i32
    %c1_30 = arith.constant 1 : index
    %c0_31 = arith.constant 0 : index
    %58 = arith.index_cast %57 : i32 to index
    %59 = vector.load %arg1[%c1_30, %c0_31, %58] : memref<2x8x256xbf16, #tpu.memory_space<vmem>>, vector<1x8x128xbf16>
    %60 = vector.shape_cast %59 : vector<1x8x128xbf16> to vector<8x128xbf16>
    %cst_32 = arith.constant 3.535160e-01 : bf16
    %61 = vector.broadcast %cst_32 : bf16 to vector<8x128xbf16>
    %62 = arith.mulf %60, %61 : vector<8x128xbf16>
    %cst_33 = arith.constant dense<0.000000e+00> : vector<256x128xf32>
    %63 = tpu.matmul %53, %62, %cst_33 {dimension_numbers = #tpu.dot_dimension_numbers<[0], [0], [1], [1], [0, 1, 1, 1], [], []>} : vector<8x256xbf16>, vector<8x128xbf16>, vector<256x128xf32> -> vector<256x128xf32>
    %cst_34 = arith.constant dense<0xFF800000> : vector<128xf32>
    %64 = vector.multi_reduction <maximumf>, %63, %cst_34 [0] : vector<256x128xf32> to vector<128xf32>
    %65 = vector.shape_cast %64 : vector<128xf32> to vector<1x128xf32>
    %66 = vector.broadcast %65 : vector<1x128xf32> to vector<256x128xf32>
    %67 = arith.subf %63, %66 : vector<256x128xf32>
    %68 = math.exp %67 : vector<256x128xf32>
    %cst_35 = arith.constant dense<0.000000e+00> : vector<128xf32>
    %69 = vector.multi_reduction <add>, %68, %cst_35 [0] : vector<256x128xf32> to vector<128xf32>
    %70 = vector.shape_cast %69 : vector<128xf32> to vector<1x128xf32>
    %71 = arith.truncf %68 : vector<256x128xf32> to vector<256x128xbf16>
    %cst_36 = arith.constant dense<0.000000e+00> : vector<4x128xf32>
    %72 = tpu.matmul %55, %71, %cst_36 {dimension_numbers = #tpu.dot_dimension_numbers<[1], [0], [0], [1], [0, 0, 1, 1], [], []>} : vector<4x256xbf16>, vector<256x128xbf16>, vector<4x128xf32> -> vector<4x128xf32>
    %73 = tpu.reciprocal %70 {approx = true} : vector<1x128xf32> -> vector<1x128xf32>
    %74 = vector.broadcast %73 : vector<1x128xf32> to vector<4x128xf32>
    %75 = arith.mulf %72, %74 : vector<4x128xf32>
    %c1_37 = arith.constant 1 : index
    %c0_38 = arith.constant 0 : index
    %76 = arith.index_cast %57 : i32 to index
    %77 = vector.load %arg4[%c1_37, %c0_38, %76] : memref<2x4x256xf32, #tpu.memory_space<vmem>>, vector<1x4x128xf32>
    %78 = vector.shape_cast %77 : vector<1x4x128xf32> to vector<4x128xf32>
    %79 = vector.shape_cast %75 : vector<4x128xf32> to vector<1x4x128xf32>
    tpu.vector_store %arg4[%c1_37, %c0_38, %76], %79 {strides = array<i32>} : memref<2x4x256xf32, #tpu.memory_space<vmem>>, vector<1x4x128xf32>,
    %c1_i32_39 = arith.constant 1 : i32
    %c128_i32_40 = arith.constant 128 : i32
    %80 = arith.muli %c1_i32_39, %c128_i32_40 : i32
    %81 = tpu.assume_multiple %80, 128 : i32
    %c1_41 = arith.constant 1 : index
    %c0_42 = arith.constant 0 : index
    %82 = arith.index_cast %81 : i32 to index
    %83 = vector.load %arg1[%c1_41, %c0_42, %82] : memref<2x8x256xbf16, #tpu.memory_space<vmem>>, vector<1x8x128xbf16>
    %84 = vector.shape_cast %83 : vector<1x8x128xbf16> to vector<8x128xbf16>
    %cst_43 = arith.constant 3.535160e-01 : bf16
    %85 = vector.broadcast %cst_43 : bf16 to vector<8x128xbf16>
    %86 = arith.mulf %84, %85 : vector<8x128xbf16>
    %cst_44 = arith.constant dense<0.000000e+00> : vector<256x128xf32>
    %87 = tpu.matmul %53, %86, %cst_44 {dimension_numbers = #tpu.dot_dimension_numbers<[0], [0], [1], [1], [0, 1, 1, 1], [], []>} : vector<8x256xbf16>, vector<8x128xbf16>, vector<256x128xf32> -> vector<256x128xf32>
    %cst_45 = arith.constant dense<0xFF800000> : vector<128xf32>
    %88 = vector.multi_reduction <maximumf>, %87, %cst_45 [0] : vector<256x128xf32> to vector<128xf32>
    %89 = vector.shape_cast %88 : vector<128xf32> to vector<1x128xf32>
    %90 = vector.broadcast %89 : vector<1x128xf32> to vector<256x128xf32>
    %91 = arith.subf %87, %90 : vector<256x128xf32>
    %92 = math.exp %91 : vector<256x128xf32>
    %cst_46 = arith.constant dense<0.000000e+00> : vector<128xf32>
    %93 = vector.multi_reduction <add>, %92, %cst_46 [0] : vector<256x128xf32> to vector<128xf32>
    %94 = vector.shape_cast %93 : vector<128xf32> to vector<1x128xf32>
    %95 = arith.truncf %92 : vector<256x128xf32> to vector<256x128xbf16>
    %cst_47 = arith.constant dense<0.000000e+00> : vector<4x128xf32>
    %96 = tpu.matmul %55, %95, %cst_47 {dimension_numbers = #tpu.dot_dimension_numbers<[1], [0], [0], [1], [0, 0, 1, 1], [], []>} : vector<4x256xbf16>, vector<256x128xbf16>, vector<4x128xf32> -> vector<4x128xf32>
    %97 = tpu.reciprocal %94 {approx = true} : vector<1x128xf32> -> vector<1x128xf32>
    %98 = vector.broadcast %97 : vector<1x128xf32> to vector<4x128xf32>
    %99 = arith.mulf %96, %98 : vector<4x128xf32>
    %c1_48 = arith.constant 1 : index
    %c0_49 = arith.constant 0 : index
    %100 = arith.index_cast %81 : i32 to index
    %101 = vector.load %arg4[%c1_48, %c0_49, %100] : memref<2x4x256xf32, #tpu.memory_space<vmem>>, vector<1x4x128xf32>
    %102 = vector.shape_cast %101 : vector<1x4x128xf32> to vector<4x128xf32>
    %103 = vector.shape_cast %99 : vector<4x128xf32> to vector<1x4x128xf32>
    tpu.vector_store %arg4[%c1_48, %c0_49, %100], %103 {strides = array<i32>} : memref<2x4x256xf32, #tpu.memory_space<vmem>>, vector<1x4x128xf32>,
    %c2_i32_50 = arith.constant 2 : i32
    return
  }
  func.func @transform_0(%arg0: i32) -> (i32, i32, i32) {
    %c0_i32 = arith.constant 0 : i32
    %c0_i32_0 = arith.constant 0 : i32
    %c0_i32_1 = arith.constant 0 : i32
    return %arg0, %c0_i32, %c0_i32_0 : i32, i32, i32
  }
  func.func @transform_1(%arg0: i32) -> (i32, i32, i32) {
    %c0_i32 = arith.constant 0 : i32
    %c0_i32_0 = arith.constant 0 : i32
    %c0_i32_1 = arith.constant 0 : i32
    return %arg0, %c0_i32, %c0_i32_0 : i32, i32, i32
  }
  func.func @transform_2(%arg0: i32) -> (i32, i32, i32) {
    %c0_i32 = arith.constant 0 : i32
    %c0_i32_0 = arith.constant 0 : i32
    %c0_i32_1 = arith.constant 0 : i32
    return %arg0, %c0_i32, %c0_i32_0 : i32, i32, i32
  }
  func.func @transform_3(%arg0: i32) -> (i32, i32, i32) {
    %c0_i32 = arith.constant 0 : i32
    %c0_i32_0 = arith.constant 0 : i32
    %c0_i32_1 = arith.constant 0 : i32
    return %arg0, %c0_i32, %c0_i32_0 : i32, i32, i32
  }
}

module attributes {stable_mosaic.version = 11 : i64} {
  func.func @_proj_concat_kernel(%arg0: i32, %arg1: memref<256x8xf32, #tpu.memory_space<vmem>>, %arg2: memref<256x8xf32, #tpu.memory_space<vmem>>, %arg3: memref<8x8xf32, #tpu.memory_space<vmem>>, %arg4: memref<1x8xf32, #tpu.memory_space<vmem>>, %arg5: memref<256x16xf32, #tpu.memory_space<vmem>>) attributes {dimension_semantics = [#tpu.dimension_semantics<parallel>], iteration_bounds = array<i64: 2>, scalar_prefetch = 0 : i64, scratch_operands = 0 : i64, tpu.core_type = #tpu.core_type<tc>, window_params = [{transform_indices = @transform_0, window_bounds = array<i64: 256, 8>}, {transform_indices = @transform_1, window_bounds = array<i64: 256, 8>}, {pipeline_mode = #tpu.pipeline_mode<synchronous>, transform_indices = @transform_2, window_bounds = array<i64: 8, 8>}, {pipeline_mode = #tpu.pipeline_mode<synchronous>, transform_indices = @transform_3, window_bounds = array<i64: 1, 8>}, {transform_indices = @transform_4, window_bounds = array<i64: 256, 16>}]} {
    %c0 = arith.constant 0 : index
    %c0_0 = arith.constant 0 : index
    %0 = vector.load %arg2[%c0, %c0_0] : memref<256x8xf32, #tpu.memory_space<vmem>>, vector<256x8xf32>
    %c0_1 = arith.constant 0 : index
    %c0_2 = arith.constant 0 : index
    %1 = vector.load %arg3[%c0_1, %c0_2] : memref<8x8xf32, #tpu.memory_space<vmem>>, vector<8x8xf32>
    %cst = arith.constant dense<0.000000e+00> : vector<256x8xf32>
    %2 = tpu.matmul %0, %1, %cst {dimension_numbers = #tpu.dot_dimension_numbers<[1], [0], [0], [1], [0, 0, 1, 1], [], []>} : vector<256x8xf32>, vector<8x8xf32>, vector<256x8xf32> -> vector<256x8xf32>
    %c0_3 = arith.constant 0 : index
    %c0_4 = arith.constant 0 : index
    %3 = vector.load %arg4[%c0_3, %c0_4] : memref<1x8xf32, #tpu.memory_space<vmem>>, vector<1x8xf32>
    %4 = vector.broadcast %3 : vector<1x8xf32> to vector<256x8xf32>
    %5 = arith.addf %2, %4 : vector<256x8xf32>
    %c0_5 = arith.constant 0 : index
    %c0_6 = arith.constant 0 : index
    %6 = vector.load %arg1[%c0_5, %c0_6] : memref<256x8xf32, #tpu.memory_space<vmem>>, vector<256x8xf32>
    %c0_7 = arith.constant 0 : index
    %c0_8 = arith.constant 0 : index
    %7 = vector.load %arg5[%c0_7, %c0_8] : memref<256x16xf32, #tpu.memory_space<vmem>>, vector<256x8xf32>
    tpu.vector_store %arg5[%c0_7, %c0_8], %6 {strides = array<i32>} : memref<256x16xf32, #tpu.memory_space<vmem>>, vector<256x8xf32>,
    %c0_9 = arith.constant 0 : index
    %c8 = arith.constant 8 : index
    %8 = vector.load %arg5[%c0_9, %c8] : memref<256x16xf32, #tpu.memory_space<vmem>>, vector<256x8xf32>
    tpu.vector_store %arg5[%c0_9, %c8], %5 {strides = array<i32>} : memref<256x16xf32, #tpu.memory_space<vmem>>, vector<256x8xf32>,
    return
  }
  func.func @transform_0(%arg0: i32) -> (i32, i32) {
    %c0_i32 = arith.constant 0 : i32
    %c0_i32_0 = arith.constant 0 : i32
    return %arg0, %c0_i32 : i32, i32
  }
  func.func @transform_1(%arg0: i32) -> (i32, i32) {
    %c0_i32 = arith.constant 0 : i32
    %c0_i32_0 = arith.constant 0 : i32
    return %arg0, %c0_i32 : i32, i32
  }
  func.func @transform_2(%arg0: i32) -> (i32, i32) {
    %c0_i32 = arith.constant 0 : i32
    %c0_i32_0 = arith.constant 0 : i32
    %c0_i32_1 = arith.constant 0 : i32
    return %c0_i32, %c0_i32_0 : i32, i32
  }
  func.func @transform_3(%arg0: i32) -> (i32, i32) {
    %c0_i32 = arith.constant 0 : i32
    %c0_i32_0 = arith.constant 0 : i32
    %c0_i32_1 = arith.constant 0 : i32
    return %c0_i32, %c0_i32_0 : i32, i32
  }
  func.func @transform_4(%arg0: i32) -> (i32, i32) {
    %c0_i32 = arith.constant 0 : i32
    %c0_i32_0 = arith.constant 0 : i32
    return %arg0, %c0_i32 : i32, i32
  }
}

</mosaic_0001>

<bundles_post_ra>
// kernel: augmented_conv_forward.3
= control target key start
LH: loop header
LB: loop body
LE: loop exit
PB: predicated region body
PF: predicated region fallthrough
CT: control target
= control target key end

     0   :  { %s704_s12 = smov 0   ;;  %s839_s0 = inlined_call_operand.vmem [shape: bf16[512,36], index: 0, kind: input, shape index: {}]   ;;  %s840_s1 = inlined_call_operand.vmem [shape: bf16[36,128], index: 1, kind: input, shape index: {}]   ;;  %s841_s2 = inlined_call_operand.vmem [shape: f32[1,128], index: 2, kind: input, shape index: {}]   ;;  %s842_s3 = inlined_call_operand.vmem [shape: f32[512,128], index: 3, kind: output, shape index: {}]  }
   0x1 LB: > { %s541_s13 = sadd.s32 4294967295, %s682_s12   ;;  %p545_p0 = scmp.ge.s32.totalorder %s682_s12, 1  ;;  %s682_s12 = sphi %s704_s12, %s13_s12  }
   0x2   : > { %p138_p1 = scmp.lt.s32.totalorder %s682_s12, 3 }
   0x4   : > { %p139_p2 = pnand %p545_p0, %p138_p1 }
   0x5   : > { %s546_s16 = sshll.u32 (!%p139_p2), %s541_s13, 5 }
   0x6   : > { %142 = sbr.rel (%p139_p2) target bundleno = 221 (0xdd), region = 32  ;;  %p163_p3 = scmp.lt.s32.totalorder (!%p139_p2), %s546_s16, 63 }
   0xb   : > { %v211_v0 = vld [vmem:[%s840_s1 + $0x10] sm:$0x3]  ;;  %vm360_vm0 = vcmask 1041408   ;;  %s844_s16 = smov (!%p163_p3, %s546_s16), 63  ;;  %v657_v4 = vld [vmem:[%s840_s1 + $0x8] sm:$0xff]  ;;  %v656_v5 = vld [vmem:[%s840_s1] sm:$0xff] }
   0xc   : > { %v305_v1 = vunpack.c.l.b16 %v211_v0  ;;  %s547_s19 = sshll.u32 %s844_s16, 2  ;;  %vm311_vm1 = vcmask 293888   ;;  %s549_s25 = sshll.u32 %s844_s16, 3  ;;  %v765_v22 = vld [vmem:[%s841_s2] ss:$0 sm:$0xff] }
   0xd   : > { %s727_s24 = scalar_lea.vmem %s839_s0, %s547_s19  ;;  %s770_s30 = scalar_lea.vmem %s842_s3, %s549_s25 }
   0xe   : > { %v308_v2 = vpack.c.b16 %v305_v1, %v305_v1  ;;  %v640_v6 = vld [vmem:[%s727_s24] sm:$0xff]  ;;  %v641_v10 = vld [vmem:[%s727_s24 + $0x8] sm:$0xff]  ;;  %v642_v14 = vld [vmem:[%s727_s24 + $0x10] sm:$0xff] }
   0xf   : > { %v644_v7 = vld [vmem:[%s727_s24 + $0x20] sm:$0xff]  ;;  %v645_v11 = vld [vmem:[%s727_s24 + $0x28] sm:$0xff]  ;;  %v646_v15 = vld [vmem:[%s727_s24 + $0x30] sm:$0xff] }
  0x10   : > { %v362_v3 = vsel %vm360_vm0, %v308_v2, 0  ;;  %v648_v8 = vld [vmem:[%s727_s24 + $0x40] sm:$0xff]  ;;  %v649_v12 = vld [vmem:[%s727_s24 + $0x48] sm:$0xff]  ;;  %v650_v16 = vld [vmem:[%s727_s24 + $0x50] sm:$0xff] }
  0x11   : > { %369 = vmatpush.bf16.msra.mxu0 %v362_v3  ;;  %658 = vmatpush.bf16.msra.mxu1 %v362_v3  ;;  %v652_v9 = vld [vmem:[%s727_s24 + $0x60] sm:$0xff]  ;;  %v653_v13 = vld [vmem:[%s727_s24 + $0x68] sm:$0xff]  ;;  %v654_v17 = vld [vmem:[%s727_s24 + $0x70] sm:$0xff] }
  0x12   : > { %659 = vmatpush.bf16.msra.mxu2 %v362_v3  ;;  %660 = vmatpush.bf16.msra.mxu3 %v362_v3  ;;  %v643_v18 = vld [vmem:[%s727_s24 + $0x18] sm:$0xff] }
  0x13   : > { %v647_v19 = vld [vmem:[%s727_s24 + $0x38] sm:$0xff] }
  0x14   : > { %v651_v20 = vld [vmem:[%s727_s24 + $0x58] sm:$0xff] }
  0x15   : > { %370 = vmatpush.bf16.msra.mxu0 %v657_v4  ;;  %661 = vmatpush.bf16.msra.mxu1 %v657_v4  ;;  %v655_v21 = vld [vmem:[%s727_s24 + $0x78] sm:$0xff] }
  0x16   : > { %662 = vmatpush.bf16.msra.mxu2 %v657_v4  ;;  %663 = vmatpush.bf16.msra.mxu3 %v657_v4 }
  0x19   : > { %371 = vmatpush.bf16.msra.mxu0 %v656_v5  ;;  %664 = vmatpush.bf16.msra.mxu1 %v656_v5 }
  0x1a   : > { %665 = vmatpush.bf16.msra.mxu2 %v656_v5  ;;  %666 = vmatpush.bf16.msra.mxu3 %v656_v5 }
  0x1c   : > { %622 = vmatmul.msk.bf16.vlgmr.msra.gmra.mxu0 %vm311_vm1, %v640_v6  ;;  %626 = vmatmul.msk.bf16.vlgmr.msra.gmra.mxu1 %vm311_vm1, %v644_v7 }
  0x1d   : > { %630 = vmatmul.msk.bf16.vlgmr.msra.gmra.mxu2 %vm311_vm1, %v648_v8  ;;  %634 = vmatmul.msk.bf16.vlgmr.msra.gmra.mxu3 %vm311_vm1, %v652_v9 }
  0x2c   : > { %623 = vmatmul.msk.bf16.gmra.mxu0 %vm311_vm1, %v641_v10  ;;  %627 = vmatmul.msk.bf16.gmra.mxu1 %vm311_vm1, %v645_v11 }
  0x2d   : > { %631 = vmatmul.msk.bf16.gmra.mxu2 %vm311_vm1, %v649_v12  ;;  %635 = vmatmul.msk.bf16.gmra.mxu3 %vm311_vm1, %v653_v13 }
  0x3c   : > { %624 = vmatmul.msk.bf16.gmra.mxu0 %vm311_vm1, %v642_v14  ;;  %628 = vmatmul.msk.bf16.gmra.mxu1 %vm311_vm1, %v646_v15 }
  0x3d   : > { %632 = vmatmul.msk.bf16.gmra.mxu2 %vm311_vm1, %v650_v16  ;;  %636 = vmatmul.msk.bf16.gmra.mxu3 %vm311_vm1, %v654_v17 }
  0x4c   : > { %625 = vmatmul.msk.bf16.gmra.mxu0 %vm311_vm1, %v643_v18  ;;  %629 = vmatmul.msk.bf16.gmra.mxu1 %vm311_vm1, %v647_v19 }
  0x4d   : > { %633 = vmatmul.msk.bf16.gmra.mxu2 %vm311_vm1, %v651_v20  ;;  %637 = vmatmul.msk.bf16.gmra.mxu3 %vm311_vm1, %v655_v21 }
  0x99   : > { %v373_v23 = vpop.f32.mrf.mxu0  ;;  %v393_v24 = vpop.f32.mrf.mxu1 }
  0x9a   : > { %v374_v25 = vadd.f32 %v765_v22, %v373_v23  ;;  %v394_v26 = vadd.f32 %v765_v22, %v393_v24 }
  0x9c   : > { %453 = vst [vmem:[%s770_s30] sm:$0xff] %v374_v25 }
  0x9d   : > { %461 = vst [vmem:[%s770_s30 + $0x40] sm:$0xff] %v394_v26 }
  0xa0   : > { %v413_v27 = vpop.f32.mrf.mxu2  ;;  %v433_v28 = vpop.f32.mrf.mxu3 }
  0xa1   : > { %v414_v29 = vadd.f32 %v765_v22, %v413_v27  ;;  %v434_v30 = vadd.f32 %v765_v22, %v433_v28  ;;  %v375_v31 = vpop.f32.mrf.mxu0  ;;  %v395_v32 = vpop.f32.mrf.mxu1 }
  0xa2   : > { %v376_v33 = vadd.f32 %v765_v22, %v375_v31  ;;  %v396_v34 = vadd.f32 %v765_v22, %v395_v32 }
  0xa3   : > { %469 = vst [vmem:[%s770_s30 + $0x80] sm:$0xff] %v414_v29 }
  0xa4   : > { %477 = vst [vmem:[%s770_s30 + $0xc0] sm:$0xff] %v434_v30 }
  0xa5   : > { %454 = vst [vmem:[%s770_s30 + $0x8] sm:$0xff] %v376_v33 }
  0xa6   : > { %462 = vst [vmem:[%s770_s30 + $0x48] sm:$0xff] %v396_v34 }
  0xa8   : > { %v415_v35 = vpop.f32.mrf.mxu2  ;;  %v435_v36 = vpop.f32.mrf.mxu3 }
  0xa9   : > { %v416_v37 = vadd.f32 %v765_v22, %v415_v35  ;;  %v436_v38 = vadd.f32 %v765_v22, %v435_v36  ;;  %v378_v39 = vpop.f32.mrf.mxu0  ;;  %v398_v40 = vpop.f32.mrf.mxu1 }
  0xaa   : > { %v379_v41 = vadd.f32 %v765_v22, %v378_v39  ;;  %v399_v42 = vadd.f32 %v765_v22, %v398_v40 }
  0xab   : > { %470 = vst [vmem:[%s770_s30 + $0x88] sm:$0xff] %v416_v37 }
  0xac   : > { %478 = vst [vmem:[%s770_s30 + $0xc8] sm:$0xff] %v436_v38 }
  0xad   : > { %455 = vst [vmem:[%s770_s30 + $0x10] sm:$0xff] %v379_v41 }
  0xae   : > { %463 = vst [vmem:[%s770_s30 + $0x50] sm:$0xff] %v399_v42 }
  0xb0   : > { %v418_v43 = vpop.f32.mrf.mxu2  ;;  %v438_v44 = vpop.f32.mrf.mxu3 }
  0xb1   : > { %v419_v45 = vadd.f32 %v765_v22, %v418_v43  ;;  %v439_v46 = vadd.f32 %v765_v22, %v438_v44  ;;  %v380_v47 = vpop.f32.mrf.mxu0  ;;  %v400_v48 = vpop.f32.mrf.mxu1 }
  0xb2   : > { %v381_v49 = vadd.f32 %v765_v22, %v380_v47  ;;  %v401_v50 = vadd.f32 %v765_v22, %v400_v48 }
  0xb3   : > { %471 = vst [vmem:[%s770_s30 + $0x90] sm:$0xff] %v419_v45 }
  0xb4   : > { %479 = vst [vmem:[%s770_s30 + $0xd0] sm:$0xff] %v439_v46 }
  0xb5   : > { %456 = vst [vmem:[%s770_s30 + $0x18] sm:$0xff] %v381_v49 }
  0xb6   : > { %464 = vst [vmem:[%s770_s30 + $0x58] sm:$0xff] %v401_v50 }
  0xb8   : > { %v420_v51 = vpop.f32.mrf.mxu2  ;;  %v440_v52 = vpop.f32.mrf.mxu3 }
  0xb9   : > { %v421_v53 = vadd.f32 %v765_v22, %v420_v51  ;;  %v441_v54 = vadd.f32 %v765_v22, %v440_v52  ;;  %v383_v55 = vpop.f32.mrf.mxu0  ;;  %v403_v56 = vpop.f32.mrf.mxu1 }
  0xba   : > { %v384_v57 = vadd.f32 %v765_v22, %v383_v55  ;;  %v404_v58 = vadd.f32 %v765_v22, %v403_v56 }
  0xbb   : > { %472 = vst [vmem:[%s770_s30 + $0x98] sm:$0xff] %v421_v53 }
  0xbc   : > { %480 = vst [vmem:[%s770_s30 + $0xd8] sm:$0xff] %v441_v54 }
  0xbd   : > { %457 = vst [vmem:[%s770_s30 + $0x20] sm:$0xff] %v384_v57 }
  0xbe   : > { %465 = vst [vmem:[%s770_s30 + $0x60] sm:$0xff] %v404_v58 }
  0xc0   : > { %v423_v59 = vpop.f32.mrf.mxu2  ;;  %v443_v60 = vpop.f32.mrf.mxu3 }
  0xc1   : > { %v424_v61 = vadd.f32 %v765_v22, %v423_v59  ;;  %v444_v62 = vadd.f32 %v765_v22, %v443_v60  ;;  %v385_v63 = vpop.f32.mrf.mxu0  ;;  %v405_v0 = vpop.f32.mrf.mxu1 }
  0xc2   : > { %v386_v1 = vadd.f32 %v765_v22, %v385_v63  ;;  %v406_v2 = vadd.f32 %v765_v22, %v405_v0 }
  0xc3   : > { %473 = vst [vmem:[%s770_s30 + $0xa0] sm:$0xff] %v424_v61 }
  0xc4   : > { %481 = vst [vmem:[%s770_s30 + $0xe0] sm:$0xff] %v444_v62 }
  0xc5   : > { %458 = vst [vmem:[%s770_s30 + $0x28] sm:$0xff] %v386_v1 }
  0xc6   : > { %466 = vst [vmem:[%s770_s30 + $0x68] sm:$0xff] %v406_v2 }
  0xc8   : > { %v425_v3 = vpop.f32.mrf.mxu2  ;;  %v445_v4 = vpop.f32.mrf.mxu3 }
  0xc9   : > { %v426_v5 = vadd.f32 %v765_v22, %v425_v3  ;;  %v446_v6 = vadd.f32 %v765_v22, %v445_v4  ;;  %v388_v7 = vpop.f32.mrf.mxu0  ;;  %v408_v8 = vpop.f32.mrf.mxu1 }
  0xca   : > { %v389_v9 = vadd.f32 %v765_v22, %v388_v7  ;;  %v409_v10 = vadd.f32 %v765_v22, %v408_v8 }
  0xcb   : > { %474 = vst [vmem:[%s770_s30 + $0xa8] sm:$0xff] %v426_v5 }
  0xcc   : > { %482 = vst [vmem:[%s770_s30 + $0xe8] sm:$0xff] %v446_v6 }
  0xcd   : > { %459 = vst [vmem:[%s770_s30 + $0x30] sm:$0xff] %v389_v9 }
  0xce   : > { %467 = vst [vmem:[%s770_s30 + $0x70] sm:$0xff] %v409_v10 }
  0xd0   : > { %v428_v11 = vpop.f32.mrf.mxu2  ;;  %v448_v12 = vpop.f32.mrf.mxu3 }
  0xd1   : > { %v429_v13 = vadd.f32 %v765_v22, %v428_v11  ;;  %v449_v14 = vadd.f32 %v765_v22, %v448_v12  ;;  %v390_v15 = vpop.f32.mrf.mxu0  ;;  %v410_v16 = vpop.f32.mrf.mxu1 }
  0xd2   : > { %v391_v17 = vadd.f32 %v765_v22, %v390_v15  ;;  %v411_v18 = vadd.f32 %v765_v22, %v410_v16 }
  0xd3   : > { %475 = vst [vmem:[%s770_s30 + $0xb0] sm:$0xff] %v429_v13 }
  0xd4   : > { %483 = vst [vmem:[%s770_s30 + $0xf0] sm:$0xff] %v449_v14 }
  0xd5   : > { %460 = vst [vmem:[%s770_s30 + $0x38] sm:$0xff] %v391_v17 }
  0xd6   : > { %468 = vst [vmem:[%s770_s30 + $0x78] sm:$0xff] %v411_v18 }
  0xd8   : > { %v430_v19 = vpop.f32.mrf.mxu2  ;;  %v450_v20 = vpop.f32.mrf.mxu3 }
  0xd9   : > { %v431_v21 = vadd.f32 %v765_v22, %v430_v19  ;;  %v451_v23 = vadd.f32 %v765_v22, %v450_v20 }
  0xdb   : > { %476 = vst [vmem:[%s770_s30 + $0xb8] sm:$0xff] %v431_v21 }
  0xdc   : > { %484 = vst [vmem:[%s770_s30 + $0xf8] sm:$0xff] %v451_v23 }
  0xdd PF: > { %s13_s12 = sadd.s32 1, %s682_s12  }
  0xde   : > { %p10_p4 = scmp.ge.s32.totalorder %s13_s12, 4  }
  0xe0   :  { %12 = sbr.rel (!%p10_p4) target bundleno = 1 (0x1), region = 62 }

// kernel: augmented_conv_forward.5
= control target key start
LH: loop header
LB: loop body
LE: loop exit
PB: predicated region body
PF: predicated region fallthrough
CT: control target
= control target key end

     0   :  { %s855_s15 = smov 0   ;;  %s1182_s0 = inlined_call_operand.vmem [shape: f32[512,8], index: 0, kind: input, shape index: {}]   ;;  %s1183_s1 = inlined_call_operand.vmem [shape: f32[512,8], index: 1, kind: input, shape index: {}]   ;;  %s1184_s2 = inlined_call_operand.vmem [shape: f32[8,8], index: 2, kind: input, shape index: {}]   ;;  %s1185_s3 = inlined_call_operand.vmem [shape: f32[1,8], index: 3, kind: input, shape index: {}]   ;;  %s1186_s4 = inlined_call_operand.vmem [shape: f32[512,16], index: 4, kind: output, shape index: {}]  }
   0x1 LB: > { %s763_s16 = sadd.s32 4294967295, %s827_s15   ;;  %p767_p0 = scmp.ge.s32.totalorder %s827_s15, 1  ;;  %s827_s15 = sphi %s855_s15, %s14_s15  }
   0x2   : > { %p174_p1 = scmp.lt.s32.totalorder %s827_s15, 3 }
   0x4   : > { %p175_p2 = pnand %p767_p0, %p174_p1 }
   0x5   : > { %s768_s19 = sshll.u32 (!%p175_p2), %s763_s16, 5  ;;  %s829_s26 = smov (!%p175_p2), 8  }
   0x6   : > { %178 = sbr.rel (%p175_p2) target bundleno = 347 (0x15b), region = 36  ;;  %p206_p3 = scmp.lt.s32.totalorder (!%p175_p2), %s768_s19, 63 }
   0xb   : > { %v255_v0 = vld [vmem:[%s1184_s2] sm:$0xff]  ;;  %s1188_s19 = smov (!%p206_p3, %s768_s19), 63  ;;  %vm260_vm0 = vcmask 64512   ;;  %vm662_vm1 = vcmask 130112  }
   0xc   : > { %372 = vmatpush.msra.mxu0 %v255_v0  ;;  %809 = vmatpush.msra.mxu2 %v255_v0  ;;  %s866_s20 = sshll.u32 %s1188_s19, 3  ;;  %v941_v33 = vld [vmem:[%s1185_s3] ss:$0 sm:$0xff] }
   0xd   : > { %810 = vmatpush.msra.mxu3 %v255_v0  ;;  %808 = vmatpush.msra.mxu1 %v255_v0  ;;  %s872_s23 = scalar_lea.vmem %s1183_s1, %s866_s20  ;;  %s990_s29 = scalar_lea.vmem %s1182_s0, %s866_s20 }
   0xe   : > { %v223_v1 = vld [vmem:[%s872_s23] sm:$0xff]  ;;  %v240_v5 = vld [vmem:[%s872_s23 + $0x88] sm:$0xff]  ;;  %v225_v9 = vld [vmem:[%s872_s23 + $0x10] sm:$0xff]  ;;  %s997_s6 = scalar_lea.vmem %s1186_s4, %s866_s20 }
   0xf   : > { %v239_v2 = vld [vmem:[%s872_s23 + $0x80] sm:$0xff]  ;;  %774 = vmatmul.msk.f32.vlgmr.msra.gmra.mxu0 %vm260_vm0, %v223_v1  ;;  %v224_v6 = vld [vmem:[%s872_s23 + $0x8] sm:$0xff]  ;;  %v241_v10 = vld [vmem:[%s872_s23 + $0x90] sm:$0xff] }
  0x10   : > { %v247_v3 = vld [vmem:[%s872_s23 + $0xc0] sm:$0xff]  ;;  %790 = vmatmul.msk.f32.vlgmr.msra.gmra.mxu2 %vm260_vm0, %v239_v2  ;;  %v248_v7 = vld [vmem:[%s872_s23 + $0xc8] sm:$0xff]  ;;  %v249_v11 = vld [vmem:[%s872_s23 + $0xd0] sm:$0xff] }
  0x11   : > { %v231_v4 = vld [vmem:[%s872_s23 + $0x40] sm:$0xff]  ;;  %798 = vmatmul.msk.f32.vlgmr.msra.gmra.mxu3 %vm260_vm0, %v247_v3  ;;  %v232_v8 = vld [vmem:[%s872_s23 + $0x48] sm:$0xff]  ;;  %v233_v12 = vld [vmem:[%s872_s23 + $0x50] sm:$0xff] }
  0x12   : > { %782 = vmatmul.msk.f32.vlgmr.msra.gmra.mxu1 %vm260_vm0, %v231_v4  ;;  %v226_v13 = vld [vmem:[%s872_s23 + $0x18] sm:$0xff]  ;;  %v227_v17 = vld [vmem:[%s872_s23 + $0x20] sm:$0xff]  ;;  %v244_v21 = vld [vmem:[%s872_s23 + $0xa8] sm:$0xff] }
  0x13   : > { %v242_v14 = vld [vmem:[%s872_s23 + $0x98] sm:$0xff]  ;;  %v243_v18 = vld [vmem:[%s872_s23 + $0xa0] sm:$0xff]  ;;  %v228_v22 = vld [vmem:[%s872_s23 + $0x28] sm:$0xff] }
  0x14   : > { %v234_v15 = vld [vmem:[%s872_s23 + $0x58] sm:$0xff]  ;;  %v235_v19 = vld [vmem:[%s872_s23 + $0x60] sm:$0xff]  ;;  %v236_v23 = vld [vmem:[%s872_s23 + $0x68] sm:$0xff] }
  0x15   : > { %v250_v16 = vld [vmem:[%s872_s23 + $0xd8] sm:$0xff]  ;;  %v251_v20 = vld [vmem:[%s872_s23 + $0xe0] sm:$0xff]  ;;  %v252_v24 = vld [vmem:[%s872_s23 + $0xe8] sm:$0xff] }
  0x16   : > { %v245_v25 = vld [vmem:[%s872_s23 + $0xb0] sm:$0xff]  ;;  %v246_v29 = vld [vmem:[%s872_s23 + $0xb8] sm:$0xff] }
  0x17   : > { %775 = vmatmul.msk.f32.gmra.mxu0 %vm260_vm0, %v224_v6  ;;  %v229_v26 = vld [vmem:[%s872_s23 + $0x30] sm:$0xff]  ;;  %v230_v30 = vld [vmem:[%s872_s23 + $0x38] sm:$0xff] }
  0x18   : > { %791 = vmatmul.msk.f32.gmra.mxu2 %vm260_vm0, %v240_v5  ;;  %v237_v27 = vld [vmem:[%s872_s23 + $0x70] sm:$0xff]  ;;  %v238_v31 = vld [vmem:[%s872_s23 + $0x78] sm:$0xff] }
  0x19   : > { %799 = vmatmul.msk.f32.gmra.mxu3 %vm260_vm0, %v248_v7  ;;  %v253_v28 = vld [vmem:[%s872_s23 + $0xf0] sm:$0xff]  ;;  %v254_v32 = vld [vmem:[%s872_s23 + $0xf8] sm:$0xff] }
  0x1a   : > { %783 = vmatmul.msk.f32.gmra.mxu1 %vm260_vm0, %v232_v8 }
  0x1f   : > { %776 = vmatmul.msk.f32.gmra.mxu0 %vm260_vm0, %v225_v9 }
  0x20   : > { %792 = vmatmul.msk.f32.gmra.mxu2 %vm260_vm0, %v241_v10 }
  0x21   : > { %800 = vmatmul.msk.f32.gmra.mxu3 %vm260_vm0, %v249_v11 }
  0x22   : > { %784 = vmatmul.msk.f32.gmra.mxu1 %vm260_vm0, %v233_v12 }
  0x27   : > { %777 = vmatmul.msk.f32.gmra.mxu0 %vm260_vm0, %v226_v13 }
  0x28   : > { %793 = vmatmul.msk.f32.gmra.mxu2 %vm260_vm0, %v242_v14 }
  0x29   : > { %801 = vmatmul.msk.f32.gmra.mxu3 %vm260_vm0, %v250_v16 }
  0x2a   : > { %785 = vmatmul.msk.f32.gmra.mxu1 %vm260_vm0, %v234_v15 }
  0x2f   : > { %778 = vmatmul.msk.f32.gmra.mxu0 %vm260_vm0, %v227_v17 }
  0x30   : > { %794 = vmatmul.msk.f32.gmra.mxu2 %vm260_vm0, %v243_v18 }
  0x31   : > { %802 = vmatmul.msk.f32.gmra.mxu3 %vm260_vm0, %v251_v20  ;;  %v478_v20 = vld [vmem:[%s990_s29 + $0x40] sm:$0xff] }
  0x32   : > { %786 = vmatmul.msk.f32.gmra.mxu1 %vm260_vm0, %v235_v19  ;;  %510 = vst.msk [vmem:[%s997_s6 + $0x40] sm:$0xff] %vm260_vm0, %v478_v20 }
  0x37   : > { %779 = vmatmul.msk.f32.gmra.mxu0 %vm260_vm0, %v228_v22 }
  0x38   : > { %795 = vmatmul.msk.f32.gmra.mxu2 %vm260_vm0, %v244_v21 }
  0x39   : > { %803 = vmatmul.msk.f32.gmra.mxu3 %vm260_vm0, %v252_v24 }
  0x3a   : > { %787 = vmatmul.msk.f32.gmra.mxu1 %vm260_vm0, %v236_v23 }
  0x3f   : > { %780 = vmatmul.msk.f32.gmra.mxu0 %vm260_vm0, %v229_v26 }
  0x40   : > { %796 = vmatmul.msk.f32.gmra.mxu2 %vm260_vm0, %v245_v25 }
  0x41   : > { %804 = vmatmul.msk.f32.gmra.mxu3 %vm260_vm0, %v253_v28 }
  0x42   : > { %788 = vmatmul.msk.f32.gmra.mxu1 %vm260_vm0, %v237_v27 }
  0x47   : > { %781 = vmatmul.msk.f32.gmra.mxu0 %vm260_vm0, %v230_v30  ;;  %v487_v30 = vld [vmem:[%s990_s29 + $0x88] sm:$0xff] }
  0x48   : > { %797 = vmatmul.msk.f32.gmra.mxu2 %vm260_vm0, %v246_v29  ;;  %519 = vst.msk [vmem:[%s997_s6 + $0x88] sm:$0xff] %vm260_vm0, %v487_v30 }
  0x49   : > { %805 = vmatmul.msk.f32.gmra.mxu3 %vm260_vm0, %v254_v32 }
  0x4a   : > { %789 = vmatmul.msk.f32.gmra.mxu1 %vm260_vm0, %v238_v31 }
  0x8c   : > { %v374_v34 = vpop.f32.mrf.mxu0 }
  0x8d   : > { %v375_v35 = vadd.f32 %v941_v33, %v374_v34 }
  0x8f   : > { %v398_v36 = vpop.f32.mrf.mxu1  ;;  %566 = vrot.lane.b32.xlu0 %v375_v35, %s829_s26 }
  0x90   : > { %v399_v37 = vadd.f32 %v941_v33, %v398_v36  ;;  %v496_v36 = vld [vmem:[%s990_s29 + $0xd0] sm:$0xff] }
  0x91   : > { %528 = vst.msk [vmem:[%s997_s6 + $0xd0] sm:$0xff] %vm260_vm0, %v496_v36 }
  0x92   : > { %582 = vrot.lane.b32.xlu2 %v399_v37, %s829_s26  ;;  %v470_v37 = vld [vmem:[%s990_s29] sm:$0xff] }
  0x93   : > { %v422_v38 = vpop.f32.mrf.mxu2  ;;  %502 = vst.msk [vmem:[%s997_s6] sm:$0xff] %vm260_vm0, %v470_v37 }
  0x94   : > { %v423_v39 = vadd.f32 %v941_v33, %v422_v38  ;;  %v446_v40 = vpop.f32.mrf.mxu3  ;;  %v377_v41 = vpop.f32.mrf.mxu0 }
  0x95   : > { %v447_v42 = vadd.f32 %v941_v33, %v446_v40  ;;  %v378_v49 = vadd.f32 %v941_v33, %v377_v41  ;;  %v481_v40 = vld [vmem:[%s990_s29 + $0x58] sm:$0xff]  ;;  %v494_v41 = vld [vmem:[%s990_s29 + $0xc0] sm:$0xff] }
  0x96   : > { %598 = vrot.lane.b32.xlu1 %v423_v39, %s829_s26  ;;  %v486_v39 = vld [vmem:[%s990_s29 + $0x80] sm:$0xff]  ;;  %513 = vst.msk [vmem:[%s997_s6 + $0x58] sm:$0xff] %vm260_vm0, %v481_v40 }
  0x97   : > { %v401_v43 = vpop.f32.mrf.mxu1  ;;  %614 = vrot.lane.b32.xlu0 %v447_v42, %s829_s26  ;;  %518 = vst.msk [vmem:[%s997_s6 + $0x80] sm:$0xff] %vm260_vm0, %v486_v39  ;;  %v495_v42 = vld [vmem:[%s990_s29 + $0xc8] sm:$0xff] }
  0x98   : > { %v402_v55 = vadd.f32 %v941_v33, %v401_v43  ;;  %526 = vst.msk [vmem:[%s997_s6 + $0xc0] sm:$0xff] %vm260_vm0, %v494_v41  ;;  %v474_v43 = vld [vmem:[%s990_s29 + $0x20] sm:$0xff] }
  0x99   : > { %527 = vst.msk [vmem:[%s997_s6 + $0xc8] sm:$0xff] %vm260_vm0, %v495_v42 }
  0x9a   : > { %506 = vst.msk [vmem:[%s997_s6 + $0x20] sm:$0xff] %vm260_vm0, %v474_v43 }
  0x9b   : > { %v425_v44 = vpop.f32.mrf.mxu2 }
  0x9c   : > { %v426_v45 = vadd.f32 %v941_v33, %v425_v44  ;;  %v449_v46 = vpop.f32.mrf.mxu3  ;;  %v380_v48 = vpop.f32.mrf.mxu0  ;;  %v471_v44 = vld [vmem:[%s990_s29 + $0x8] sm:$0xff] }
  0x9d   : > { %v450_v47 = vadd.f32 %v941_v33, %v449_v46  ;;  %v381_v51 = vadd.f32 %v941_v33, %v380_v48  ;;  %503 = vst.msk [vmem:[%s997_s6 + $0x8] sm:$0xff] %vm260_vm0, %v471_v44  ;;  %v472_v46 = vld [vmem:[%s990_s29 + $0x10] sm:$0xff]  ;;  %v479_v48 = vld [vmem:[%s990_s29 + $0x48] sm:$0xff] }
  0x9e   : > { %600 = vrot.lane.b32.xlu2 %v426_v45, %s829_s26  ;;  %504 = vst.msk [vmem:[%s997_s6 + $0x10] sm:$0xff] %vm260_vm0, %v472_v46 }
  0x9f   : > { %v404_v50 = vpop.f32.mrf.mxu1  ;;  %616 = vrot.lane.b32.xlu1 %v450_v47, %s829_s26  ;;  %568 = vrot.lane.b32.xlu0 %v378_v49, %s829_s26  ;;  %v490_v47 = vld [vmem:[%s990_s29 + $0xa0] sm:$0xff]  ;;  %511 = vst.msk [vmem:[%s997_s6 + $0x48] sm:$0xff] %vm260_vm0, %v479_v48 }
  0xa0   : > { %v405_v58 = vadd.f32 %v941_v33, %v404_v50  ;;  %522 = vst.msk [vmem:[%s997_s6 + $0xa0] sm:$0xff] %vm260_vm0, %v490_v47  ;;  %v475_v50 = vld [vmem:[%s990_s29 + $0x28] sm:$0xff] }
  0xa1   : > { %507 = vst.msk [vmem:[%s997_s6 + $0x28] sm:$0xff] %vm260_vm0, %v475_v50 }
  0xa3   : > { %v428_v52 = vpop.f32.mrf.mxu2 }
  0xa4   : > { %v452_v53 = vpop.f32.mrf.mxu3  ;;  %v383_v56 = vpop.f32.mrf.mxu0  ;;  %v429_v61 = vadd.f32 %v941_v33, %v428_v52  ;;  %v480_v52 = vld [vmem:[%s990_s29 + $0x50] sm:$0xff] }
  0xa5   : > { %v453_v54 = vadd.f32 %v941_v33, %v452_v53  ;;  %v384_v0 = vadd.f32 %v941_v33, %v383_v56  ;;  %v488_v53 = vld [vmem:[%s990_s29 + $0x90] sm:$0xff]  ;;  %512 = vst.msk [vmem:[%s997_s6 + $0x50] sm:$0xff] %vm260_vm0, %v480_v52 }
  0xa6   : > { %520 = vst.msk [vmem:[%s997_s6 + $0x90] sm:$0xff] %vm260_vm0, %v488_v53  ;;  %v484_v56 = vld [vmem:[%s990_s29 + $0x70] sm:$0xff] }
  0xa7   : > { %618 = vrot.lane.b32.xlu2 %v453_v54, %s829_s26  ;;  %570 = vrot.lane.b32.xlu1 %v381_v51, %s829_s26  ;;  %v407_v57 = vpop.f32.mrf.mxu1  ;;  %516 = vst.msk [vmem:[%s997_s6 + $0x70] sm:$0xff] %vm260_vm0, %v484_v56 }
  0xa8   : > { %584 = vrot.lane.b32.xlu0 %v402_v55, %s829_s26  ;;  %v408_v59 = vadd.f32 %v941_v33, %v407_v57 }
  0xab   : > { %v431_v60 = vpop.f32.mrf.mxu2 }
  0xac   : > { %v386_v62 = vpop.f32.mrf.mxu0  ;;  %v455_v63 = vpop.f32.mrf.mxu3  ;;  %v432_v5 = vadd.f32 %v941_v33, %v431_v60 }
  0xad   : > { %v387_v1 = vadd.f32 %v941_v33, %v386_v62  ;;  %v456_v3 = vadd.f32 %v941_v33, %v455_v63  ;;  %v493_v63 = vld [vmem:[%s990_s29 + $0xb8] sm:$0xff] }
  0xae   : > { %525 = vst.msk [vmem:[%s997_s6 + $0xb8] sm:$0xff] %vm260_vm0, %v493_v63 }
  0xaf   : > { %588 = vrot.lane.b32.xlu2 %v408_v59, %s829_s26  ;;  %586 = vrot.lane.b32.xlu1 %v405_v58, %s829_s26  ;;  %v410_v4 = vpop.f32.mrf.mxu1  ;;  %v473_v58 = vld [vmem:[%s990_s29 + $0x18] sm:$0xff] }
  0xb0   : > { %602 = vrot.lane.b32.xlu0 %v429_v61, %s829_s26  ;;  %v411_v7 = vadd.f32 %v941_v33, %v410_v4  ;;  %v497_v59 = vld [vmem:[%s990_s29 + $0xd8] sm:$0xff]  ;;  %505 = vst.msk [vmem:[%s997_s6 + $0x18] sm:$0xff] %vm260_vm0, %v473_v58 }
  0xb1   : > { %529 = vst.msk [vmem:[%s997_s6 + $0xd8] sm:$0xff] %vm260_vm0, %v497_v59 }
  0xb3   : > { %v434_v2 = vpop.f32.mrf.mxu2 }
  0xb4   : > { %v435_v6 = vadd.f32 %v941_v33, %v434_v2  ;;  %v389_v10 = vpop.f32.mrf.mxu0  ;;  %v458_v11 = vpop.f32.mrf.mxu3 }
  0xb5   : > { %v390_v12 = vadd.f32 %v941_v33, %v389_v10  ;;  %v459_v13 = vadd.f32 %v941_v33, %v458_v11  ;;  %v483_v11 = vld [vmem:[%s990_s29 + $0x68] sm:$0xff] }
  0xb6   : > { %515 = vst.msk [vmem:[%s997_s6 + $0x68] sm:$0xff] %vm260_vm0, %v483_v11 }
  0xb7   : > { %574 = vrot.lane.b32.xlu2 %v387_v1, %s829_s26  ;;  %572 = vrot.lane.b32.xlu1 %v384_v0, %s829_s26  ;;  %v413_v9 = vpop.f32.mrf.mxu1  ;;  %v489_v0 = vld [vmem:[%s990_s29 + $0x98] sm:$0xff]  ;;  %v482_v1 = vld [vmem:[%s990_s29 + $0x60] sm:$0xff] }
  0xb8   : > { %620 = vrot.lane.b32.xlu0 %v456_v3, %s829_s26  ;;  %v414_v18 = vadd.f32 %v941_v33, %v413_v9  ;;  %521 = vst.msk [vmem:[%s997_s6 + $0x98] sm:$0xff] %vm260_vm0, %v489_v0 }
  0xb9   : > { %514 = vst.msk [vmem:[%s997_s6 + $0x60] sm:$0xff] %vm260_vm0, %v482_v1 }
  0xbb   : > { %v437_v8 = vpop.f32.mrf.mxu2 }
  0xbc   : > { %v438_v14 = vadd.f32 %v941_v33, %v437_v8  ;;  %v392_v17 = vpop.f32.mrf.mxu0  ;;  %v461_v22 = vpop.f32.mrf.mxu3 }
  0xbd   : > { %v393_v21 = vadd.f32 %v941_v33, %v392_v17  ;;  %v462_v32 = vadd.f32 %v941_v33, %v461_v22  ;;  %v485_v17 = vld [vmem:[%s990_s29 + $0x78] sm:$0xff]  ;;  %v500_v22 = vld [vmem:[%s990_s29 + $0xf0] sm:$0xff] }
  0xbe   : > { %517 = vst.msk [vmem:[%s997_s6 + $0x78] sm:$0xff] %vm260_vm0, %v485_v17 }
  0xbf   : > { %606 = vrot.lane.b32.xlu2 %v435_v6, %s829_s26  ;;  %604 = vrot.lane.b32.xlu1 %v432_v5, %s829_s26  ;;  %v416_v16 = vpop.f32.mrf.mxu1  ;;  %v499_v5 = vld [vmem:[%s990_s29 + $0xe8] sm:$0xff]  ;;  %v498_v6 = vld [vmem:[%s990_s29 + $0xe0] sm:$0xff] }
  0xc0   : > { %590 = vrot.lane.b32.xlu0 %v411_v7, %s829_s26  ;;  %v417_v19 = vadd.f32 %v941_v33, %v416_v16  ;;  %v491_v7 = vld [vmem:[%s990_s29 + $0xa8] sm:$0xff]  ;;  %531 = vst.msk [vmem:[%s997_s6 + $0xe8] sm:$0xff] %vm260_vm0, %v499_v5  ;;  %v492_v16 = vld [vmem:[%s990_s29 + $0xb0] sm:$0xff] }
  0xc1   : > { %530 = vst.msk [vmem:[%s997_s6 + $0xe0] sm:$0xff] %vm260_vm0, %v498_v6 }
  0xc2   : > { %523 = vst.msk [vmem:[%s997_s6 + $0xa8] sm:$0xff] %vm260_vm0, %v491_v7 }
  0xc3   : > { %v440_v15 = vpop.f32.mrf.mxu2  ;;  %524 = vst.msk [vmem:[%s997_s6 + $0xb0] sm:$0xff] %vm260_vm0, %v492_v16 }
  0xc4   : > { %v441_v25 = vadd.f32 %v941_v33, %v440_v15  ;;  %v464_v28 = vpop.f32.mrf.mxu3  ;;  %v395_v29 = vpop.f32.mrf.mxu0  ;;  %532 = vst.msk [vmem:[%s997_s6 + $0xf0] sm:$0xff] %vm260_vm0, %v500_v22 }
  0xc5   : > { %v396_v31 = vadd.f32 %v941_v33, %v395_v29  ;;  %v465_v34 = vadd.f32 %v941_v33, %v464_v28 }
  0xc7   : > { %576 = vrot.lane.b32.xlu2 %v390_v12, %s829_s26  ;;  %622 = vrot.lane.b32.xlu1 %v459_v13, %s829_s26  ;;  %v419_v24 = vpop.f32.mrf.mxu1  ;;  %v476_v12 = vld [vmem:[%s990_s29 + $0x30] sm:$0xff] }
  0xc8   : > { %608 = vrot.lane.b32.xlu0 %v438_v14, %s829_s26  ;;  %v420_v27 = vadd.f32 %v941_v33, %v419_v24  ;;  %508 = vst.msk [vmem:[%s997_s6 + $0x30] sm:$0xff] %vm260_vm0, %v476_v12 }
  0xcb   : > { %v443_v23 = vpop.f32.mrf.mxu2 }
  0xcc   : > { %v444_v26 = vadd.f32 %v941_v33, %v443_v23  ;;  %v467_v35 = vpop.f32.mrf.mxu3 }
  0xcd   : > { %v468_v38 = vadd.f32 %v941_v33, %v467_v35 }
  0xcf   : > { %594 = vrot.lane.b32.xlu2 %v417_v19, %s829_s26  ;;  %592 = vrot.lane.b32.xlu1 %v414_v18, %s829_s26 }
  0xd0   : > { %578 = vrot.lane.b32.xlu0 %v393_v21, %s829_s26  ;;  %v477_v21 = vld [vmem:[%s990_s29 + $0x38] sm:$0xff] }
  0xd1   : > { %509 = vst.msk [vmem:[%s997_s6 + $0x38] sm:$0xff] %vm260_vm0, %v477_v21 }
  0xd7   : > { %612 = vrot.lane.b32.xlu2 %v444_v26, %s829_s26  ;;  %610 = vrot.lane.b32.xlu1 %v441_v25, %s829_s26  ;;  %v501_v26 = vld [vmem:[%s990_s29 + $0xf8] sm:$0xff] }
  0xd8   : > { %596 = vrot.lane.b32.xlu0 %v420_v27, %s829_s26  ;;  %533 = vst.msk [vmem:[%s997_s6 + $0xf8] sm:$0xff] %vm260_vm0, %v501_v26 }
  0xdf   : > { %624 = vrot.lane.b32.xlu2 %v462_v32, %s829_s26  ;;  %580 = vrot.lane.b32.xlu1 %v396_v31, %s829_s26 }
  0xe0   : > { %626 = vrot.lane.b32.xlu0 %v465_v34, %s829_s26 }
  0xe7   : > { %628 = vrot.lane.b32.xlu1 %v468_v38, %s829_s26 }
  0xec   : > { %v583_v33 = vpop.permute.xlu2 %582 }
  0xed   : > { %671 = vst.msk [vmem:[%s997_s6 + $0x40] sm:$0xff] %vm662_vm1, %v583_v33 }
  0xf8   : > { %v601_v45 = vpop.permute.xlu2 %600 }
  0xf9   : > { %680 = vst.msk [vmem:[%s997_s6 + $0x88] sm:$0xff] %vm662_vm1, %v601_v45 }
 0x101   : > { %v619_v49 = vpop.permute.xlu2 %618  ;;  %v567_v51 = vpop.permute.xlu0 %566 }
 0x102   : > { %689 = vst.msk [vmem:[%s997_s6 + $0xd0] sm:$0xff] %vm662_vm1, %v619_v49 }
 0x103   : > { %663 = vst.msk [vmem:[%s997_s6] sm:$0xff] %vm662_vm1, %v567_v51 }
 0x108   : > { %v599_v54 = vpop.permute.xlu1 %598 }
 0x109   : > { %679 = vst.msk [vmem:[%s997_s6 + $0x80] sm:$0xff] %vm662_vm1, %v599_v54  ;;  %v589_v55 = vpop.permute.xlu2 %588  ;;  %v615_v57 = vpop.permute.xlu0 %614 }
 0x10a   : > { %674 = vst.msk [vmem:[%s997_s6 + $0x58] sm:$0xff] %vm662_vm1, %v589_v55 }
 0x10b   : > { %687 = vst.msk [vmem:[%s997_s6 + $0xc0] sm:$0xff] %vm662_vm1, %v615_v57 }
 0x111   : > { %v617_v60 = vpop.permute.xlu1 %616  ;;  %v575_v61 = vpop.permute.xlu2 %574 }
 0x112   : > { %688 = vst.msk [vmem:[%s997_s6 + $0xc8] sm:$0xff] %vm662_vm1, %v617_v60  ;;  %v569_v62 = vpop.permute.xlu0 %568 }
 0x113   : > { %667 = vst.msk [vmem:[%s997_s6 + $0x20] sm:$0xff] %vm662_vm1, %v575_v61 }
 0x114   : > { %664 = vst.msk [vmem:[%s997_s6 + $0x8] sm:$0xff] %vm662_vm1, %v569_v62 }
 0x119   : > { %v607_v2 = vpop.permute.xlu2 %606  ;;  %v571_v3 = vpop.permute.xlu1 %570 }
 0x11a   : > { %683 = vst.msk [vmem:[%s997_s6 + $0xa0] sm:$0xff] %vm662_vm1, %v607_v2  ;;  %v585_v4 = vpop.permute.xlu0 %584 }
 0x11b   : > { %665 = vst.msk [vmem:[%s997_s6 + $0x10] sm:$0xff] %vm662_vm1, %v571_v3 }
 0x11c   : > { %672 = vst.msk [vmem:[%s997_s6 + $0x48] sm:$0xff] %vm662_vm1, %v585_v4 }
 0x121   : > { %v577_v8 = vpop.permute.xlu2 %576  ;;  %v587_v9 = vpop.permute.xlu1 %586 }
 0x122   : > { %668 = vst.msk [vmem:[%s997_s6 + $0x28] sm:$0xff] %vm662_vm1, %v577_v8  ;;  %v603_v10 = vpop.permute.xlu0 %602 }
 0x123   : > { %673 = vst.msk [vmem:[%s997_s6 + $0x50] sm:$0xff] %vm662_vm1, %v587_v9 }
 0x124   : > { %681 = vst.msk [vmem:[%s997_s6 + $0x90] sm:$0xff] %vm662_vm1, %v603_v10 }
 0x129   : > { %v595_v13 = vpop.permute.xlu2 %594  ;;  %v573_v14 = vpop.permute.xlu1 %572 }
 0x12a   : > { %677 = vst.msk [vmem:[%s997_s6 + $0x70] sm:$0xff] %vm662_vm1, %v595_v13  ;;  %v621_v15 = vpop.permute.xlu0 %620 }
 0x12b   : > { %666 = vst.msk [vmem:[%s997_s6 + $0x18] sm:$0xff] %vm662_vm1, %v573_v14 }
 0x12c   : > { %690 = vst.msk [vmem:[%s997_s6 + $0xd8] sm:$0xff] %vm662_vm1, %v621_v15 }
 0x131   : > { %v613_v18 = vpop.permute.xlu2 %612  ;;  %v605_v19 = vpop.permute.xlu1 %604 }
 0x132   : > { %686 = vst.msk [vmem:[%s997_s6 + $0xb8] sm:$0xff] %vm662_vm1, %v613_v18  ;;  %v591_v20 = vpop.permute.xlu0 %590 }
 0x133   : > { %682 = vst.msk [vmem:[%s997_s6 + $0x98] sm:$0xff] %vm662_vm1, %v605_v19 }
 0x134   : > { %675 = vst.msk [vmem:[%s997_s6 + $0x60] sm:$0xff] %vm662_vm1, %v591_v20 }
 0x139   : > { %v625_v23 = vpop.permute.xlu2 %624  ;;  %v623_v24 = vpop.permute.xlu1 %622 }
 0x13a   : > { %692 = vst.msk [vmem:[%s997_s6 + $0xe8] sm:$0xff] %vm662_vm1, %v625_v23  ;;  %v609_v25 = vpop.permute.xlu0 %608 }
 0x13b   : > { %691 = vst.msk [vmem:[%s997_s6 + $0xe0] sm:$0xff] %vm662_vm1, %v623_v24 }
 0x13c   : > { %684 = vst.msk [vmem:[%s997_s6 + $0xa8] sm:$0xff] %vm662_vm1, %v609_v25 }
 0x141   : > { %v593_v27 = vpop.permute.xlu1 %592 }
 0x142   : > { %676 = vst.msk [vmem:[%s997_s6 + $0x68] sm:$0xff] %vm662_vm1, %v593_v27  ;;  %v579_v28 = vpop.permute.xlu0 %578 }
 0x143   : > { %669 = vst.msk [vmem:[%s997_s6 + $0x30] sm:$0xff] %vm662_vm1, %v579_v28 }
 0x149   : > { %v611_v29 = vpop.permute.xlu1 %610 }
 0x14a   : > { %685 = vst.msk [vmem:[%s997_s6 + $0xb0] sm:$0xff] %vm662_vm1, %v611_v29  ;;  %v597_v30 = vpop.permute.xlu0 %596 }
 0x14b   : > { %678 = vst.msk [vmem:[%s997_s6 + $0x78] sm:$0xff] %vm662_vm1, %v597_v30 }
 0x151   : > { %v581_v31 = vpop.permute.xlu1 %580 }
 0x152   : > { %670 = vst.msk [vmem:[%s997_s6 + $0x38] sm:$0xff] %vm662_vm1, %v581_v31  ;;  %v627_v32 = vpop.permute.xlu0 %626 }
 0x153   : > { %693 = vst.msk [vmem:[%s997_s6 + $0xf0] sm:$0xff] %vm662_vm1, %v627_v32 }
 0x159   : > { %v629_v34 = vpop.permute.xlu1 %628 }
 0x15a   : > { %694 = vst.msk [vmem:[%s997_s6 + $0xf8] sm:$0xff] %vm662_vm1, %v629_v34 }
 0x15b PF: > { %s14_s15 = sadd.s32 1, %s827_s15  }
 0x15c   : > { %p11_p4 = scmp.ge.s32.totalorder %s14_s15, 4  }
 0x15e   :  { %13 = sbr.rel (!%p11_p4) target bundleno = 1 (0x1), region = 69 }

// kernel: augmented_conv_forward.4
= control target key start
LH: loop header
LB: loop body
LE: loop exit
PB: predicated region body
PF: predicated region fallthrough
CT: control target
= control target key end

     0   :  { %s2158_s12 = smov 0   ;;  %s3327_s0 = inlined_call_operand.vmem [shape: bf16[4,8,256], index: 0, kind: input, shape index: {}]   ;;  %s3328_s1 = inlined_call_operand.vmem [shape: bf16[4,8,256], index: 1, kind: input, shape index: {}]   ;;  %s3329_s2 = inlined_call_operand.vmem [shape: bf16[4,4,256], index: 2, kind: input, shape index: {}]   ;;  %s3330_s3 = inlined_call_operand.vmem [shape: f32[4,4,256], index: 3, kind: output, shape index: {}]  }
   0x1 LB: > { %s1760_s13 = sadd.s32 4294967295, %s2136_s12   ;;  %p1764_p0 = scmp.ge.s32.totalorder %s2136_s12, 1  ;;  %s2136_s12 = sphi %s2158_s12, %s13_s12  }
   0x2   : > { %p163_p1 = scmp.lt.s32.totalorder %s2136_s12, 3 }
   0x4   : > { %p164_p2 = pnand %p1764_p0, %p163_p1 }
   0x6   : > { %167 = sbr.rel (%p164_p2) target bundleno = 1705 (0x6a9), region = 32 }
   0xb   : > { %s1765_s14 = sshll.u32 %s1760_s13, 1  ;;  %vm316_vm0 = vcmask 1043456   ;;  %vm267_vm1 = vcmask 64512  }
   0xc   : > { %p202_p3 = scmp.lt.s32.totalorder %s1765_s14, 3 }
   0xe   : > { %s3440_s14 = smov (!%p202_p3, %s1765_s14), 3 }
   0xf   : > { %s2166_s15 = sshll.u32 %s3440_s14, 3  ;;  %s1853_s16 = sshll.u32 %s3440_s14, 2 }
  0x10   : > { %s2172_s19 = scalar_lea.vmem %s3328_s1, %s2166_s15  ;;  %s2177_s22 = scalar_lea.vmem %s3329_s2, %s1853_s16 }
  0x11   : > { %v230_v0 = vld [vmem:[%s2172_s19] sm:$0xff]  ;;  %s2187_s25 = scalar_lea.vmem %s3327_s0, %s2166_s15  ;;  %v1811_v33 = vld [vmem:[%s2172_s19 + $0x8] sm:$0xff]  ;;  %s2843_s28 = scalar_lea.vmem %s3330_s3, %s2166_s15 }
  0x12   : > { %v2181_v1 = vld [vmem:[%s2177_s22] sm:$0xf]  ;;  %v237_v2 = vunpack.c.l.b16 %v230_v0  ;;  %v238_v3 = vunpack.c.h.b16 %v230_v0  ;;  %v960_v36 = vunpack.c.l.b16 %v1811_v33  ;;  %v961_v37 = vunpack.c.h.b16 %v1811_v33 }
  0x13   : > { %3367 = vst [vmem:[#allocation2_spill] sm:$0xff] %v2181_v1  ;;  %v232_v4 = vld [vmem:[%s2187_s25] sm:$0xff]  }
  0x14   : > { %596 = vst [vmem:[#allocation1] ss:$4 sm:$0xff] %v2181_v1  ;;  %v233_v5 = vunpack.c.l.bf16 %v232_v4  ;;  %v632_v6 = vunpack.c.h.bf16 %v232_v4  ;;  %v239_v7 = vpack.c.b16 %v237_v2, %v237_v2  ;;  %v240_v8 = vpack.c.b16 %v238_v3, %v238_v3 }
  0x15   : > { %v962_v38 = vpack.c.b16 %v960_v36, %v960_v36  ;;  %v963_v39 = vpack.c.b16 %v961_v37, %v961_v37 }
  0x16   : > { %v234_v9 = vmul.f32 0.35351563, %v233_v5  ;;  %v633_v10 = vmul.f32 0.35351563, %v632_v6  ;;  %243 = vxpose.binary.xlu0.c.b16.start.end [1/2] (short) %v240_v8, %v239_v7, 128 }
  0x18   : > { %v235_v11 = vpack.c.bf16 %v234_v9, %v234_v9  ;;  %v634_v12 = vpack.c.bf16 %v633_v10, %v633_v10 }
  0x1a   : > { %v318_v13 = vsel %vm316_vm0, %v235_v11, 0  ;;  %v636_v14 = vsel %vm316_vm0, %v634_v12, 0 }
  0x1b   : > { %327 = vmatpush.bf16.msra.mxu0 %v318_v13  ;;  %645 = vmatpush.bf16.msra.mxu3 %v636_v14 }
  0x96   : > { %966 = vxpose.binary.xlu0.c.b16.start.end [1/2] (short) %v963_v39, %v962_v38, 128 }
  0xc2   : > { %v251_v15 = vpop.trf.xlu0 }
  0xc3   : > { %1777 = vmatmul.msk.bf16.vlgmr.msra.gmra.mxu0 %vm267_vm1, %v251_v15  ;;  %1794 = vmatmul.msk.bf16.vlgmr.msra.gmra.mxu3 %vm267_vm1, %v251_v15 }
  0xca   : > { %v252_v16 = vpop.trf.xlu0 }
  0xd2   : > { %v253_v17 = vpop.trf.xlu0 }
  0xd3   : > { %1778 = vmatmul.msk.bf16.gmra.mxu0 %vm267_vm1, %v253_v17  ;;  %1795 = vmatmul.msk.bf16.gmra.mxu3 %vm267_vm1, %v253_v17 }
  0xda   : > { %v254_v18 = vpop.trf.xlu0 }
  0xe2   : > { %v255_v19 = vpop.trf.xlu0 }
  0xe3   : > { %1779 = vmatmul.msk.bf16.gmra.mxu0 %vm267_vm1, %v255_v19  ;;  %1796 = vmatmul.msk.bf16.gmra.mxu3 %vm267_vm1, %v255_v19 }
  0xea   : > { %v256_v20 = vpop.trf.xlu0 }
  0xf2   : > { %v257_v21 = vpop.trf.xlu0 }
  0xf3   : > { %1780 = vmatmul.msk.bf16.gmra.mxu0 %vm267_vm1, %v257_v21  ;;  %1797 = vmatmul.msk.bf16.gmra.mxu3 %vm267_vm1, %v257_v21 }
  0xfa   : > { %v258_v22 = vpop.trf.xlu0 }
 0x102   : > { %v259_v23 = vpop.trf.xlu0 }
 0x103   : > { %1781 = vmatmul.msk.bf16.gmra.mxu0 %vm267_vm1, %v259_v23  ;;  %1798 = vmatmul.msk.bf16.gmra.mxu3 %vm267_vm1, %v259_v23 }
 0x10a   : > { %v260_v24 = vpop.trf.xlu0 }
 0x112   : > { %v261_v25 = vpop.trf.xlu0 }
 0x113   : > { %1782 = vmatmul.msk.bf16.gmra.mxu0 %vm267_vm1, %v261_v25  ;;  %1799 = vmatmul.msk.bf16.gmra.mxu3 %vm267_vm1, %v261_v25 }
 0x11a   : > { %v262_v26 = vpop.trf.xlu0 }
 0x122   : > { %v263_v27 = vpop.trf.xlu0 }
 0x123   : > { %1783 = vmatmul.msk.bf16.gmra.mxu0 %vm267_vm1, %v263_v27  ;;  %1800 = vmatmul.msk.bf16.gmra.mxu3 %vm267_vm1, %v263_v27 }
 0x12a   : > { %v264_v28 = vpop.trf.xlu0 }
 0x132   : > { %v265_v29 = vpop.trf.xlu0 }
 0x133   : > { %1784 = vmatmul.msk.bf16.gmra.mxu0 %vm267_vm1, %v265_v29  ;;  %1801 = vmatmul.msk.bf16.gmra.mxu3 %vm267_vm1, %v265_v29 }
 0x13a   : > { %v266_v0 = vpop.trf.xlu0 }
 0x140   : > { %v2209_v30 = vpop.f32.mrf.mxu0 }
 0x143   : > { %1785 = vmatmul.msk.bf16.gmra.mxu0 %vm267_vm1, %v252_v16  ;;  %1802 = vmatmul.msk.bf16.gmra.mxu3 %vm267_vm1, %v252_v16 }
 0x146   : > { %v2213_v31 = vpop.f32.mrf.mxu3 }
 0x148   : > { %v2215_v32 = vpop.f32.mrf.mxu0 }
 0x149   : > { %3368 = vst [vmem:[#allocation3_spill] sm:$0xff] %v2215_v32 }
 0x14e   : > { %v2218_v34 = vpop.f32.mrf.mxu3 }
 0x150   : > { %v2220_v35 = vpop.f32.mrf.mxu0 }
 0x153   : > { %1786 = vmatmul.msk.bf16.gmra.mxu0 %vm267_vm1, %v254_v18  ;;  %1803 = vmatmul.msk.bf16.gmra.mxu3 %vm267_vm1, %v254_v18 }
 0x156   : > { %v2224_v40 = vpop.f32.mrf.mxu3 }
 0x158   : > { %v2226_v41 = vpop.f32.mrf.mxu0 }
 0x15e   : > { %v2228_v42 = vpop.f32.mrf.mxu3 }
 0x160   : > { %v2230_v43 = vpop.f32.mrf.mxu0 }
 0x161   : > { %3369 = vst [vmem:[#allocation4_spill] sm:$0xff] %v2230_v43  ;;  %v409_v38 = vmax.f32 %v2209_v30, %v2230_v43 }
 0x163   : > { %1787 = vmatmul.msk.bf16.gmra.mxu0 %vm267_vm1, %v256_v20  ;;  %1804 = vmatmul.msk.bf16.gmra.mxu3 %vm267_vm1, %v256_v20 }
 0x166   : > { %v2234_v44 = vpop.f32.mrf.mxu3 }
 0x168   : > { %v2236_v45 = vpop.f32.mrf.mxu0 }
 0x169   : > { %3370 = vst [vmem:[#allocation5_spill] sm:$0xff] %v2236_v45  ;;  %v410_v37 = vmax.f32 %v2215_v32, %v2236_v45 }
 0x16e   : > { %v2238_v46 = vpop.f32.mrf.mxu3 }
 0x170   : > { %v2240_v47 = vpop.f32.mrf.mxu0 }
 0x171   : > { %3371 = vst [vmem:[#allocation6_spill] sm:$0xff] %v2240_v47  ;;  %v411_v39 = vmax.f32 %v2220_v35, %v2240_v47 }
 0x173   : > { %1788 = vmatmul.msk.bf16.gmra.mxu0 %vm267_vm1, %v258_v22  ;;  %1805 = vmatmul.msk.bf16.gmra.mxu3 %vm267_vm1, %v258_v22 }
 0x176   : > { %v2244_v48 = vpop.f32.mrf.mxu3 }
 0x177   : > { %3372 = vst [vmem:[#allocation7_spill] sm:$0xff] %v2244_v48 }
 0x178   : > { %v2246_v49 = vpop.f32.mrf.mxu0 }
 0x179   : > { %3373 = vst [vmem:[#allocation8_spill] sm:$0xff] %v2246_v49 }
 0x17e   : > { %v2248_v50 = vpop.f32.mrf.mxu3 }
 0x17f   : > { %3374 = vst [vmem:[#allocation9_spill] sm:$0xff] %v2248_v50 }
 0x180   : > { %v2250_v51 = vpop.f32.mrf.mxu0 }
 0x183   : > { %1789 = vmatmul.msk.bf16.gmra.mxu0 %vm267_vm1, %v260_v24  ;;  %1806 = vmatmul.msk.bf16.gmra.mxu3 %vm267_vm1, %v260_v24 }
 0x186   : > { %v2254_v52 = vpop.f32.mrf.mxu3 }
 0x188   : > { %v2256_v53 = vpop.f32.mrf.mxu0 }
 0x189   : > { %v414_v1 = vmax.f32 %v410_v37, %v2256_v53 }
 0x18e   : > { %v2258_v54 = vpop.f32.mrf.mxu3 }
 0x190   : > { %v2260_v55 = vpop.f32.mrf.mxu0 }
 0x193   : > { %1790 = vmatmul.msk.bf16.gmra.mxu0 %vm267_vm1, %v262_v26  ;;  %1807 = vmatmul.msk.bf16.gmra.mxu3 %vm267_vm1, %v262_v26 }
 0x196   : > { %v2264_v56 = vpop.f32.mrf.mxu3 }
 0x197   : > { %3375 = vst [vmem:[#allocation10_spill] sm:$0xff] %v2264_v56 }
 0x198   : > { %v2266_v57 = vpop.f32.mrf.mxu0 }
 0x199   : > { %3376 = vst [vmem:[#allocation11_spill] sm:$0xff] %v2266_v57 }
 0x19e   : > { %v2268_v58 = vpop.f32.mrf.mxu3 }
 0x19f   : > { %3377 = vst [vmem:[#allocation12_spill] sm:$0xff] %v2268_v58 }
 0x1a0   : > { %v2270_v59 = vpop.f32.mrf.mxu0 }
 0x1a3   : > { %1791 = vmatmul.msk.bf16.gmra.mxu0 %vm267_vm1, %v264_v28  ;;  %1808 = vmatmul.msk.bf16.gmra.mxu3 %vm267_vm1, %v264_v28 }
 0x1a6   : > { %v2274_v60 = vpop.f32.mrf.mxu3 }
 0x1a8   : > { %v2276_v61 = vpop.f32.mrf.mxu0 }
 0x1ae   : > { %v2278_v62 = vpop.f32.mrf.mxu3 }
 0x1b0   : > { %v2280_v63 = vpop.f32.mrf.mxu0 }
 0x1b3   : > { %1792 = vmatmul.msk.bf16.gmra.mxu0 %vm267_vm1, %v266_v0  ;;  %1809 = vmatmul.msk.bf16.gmra.mxu3 %vm267_vm1, %v266_v0  ;;  %v412_v0 = vmax.f32 %v2226_v41, %v2246_v49 }
 0x1b6   : > { %v2284_v2 = vpop.f32.mrf.mxu3 }
 0x1b8   : > { %v2286_v3 = vpop.f32.mrf.mxu0 }
 0x1be   : > { %v2288_v4 = vpop.f32.mrf.mxu3 }
 0x1c0   : > { %v2290_v5 = vpop.f32.mrf.mxu0 }
 0x1c6   : > { %v2292_v6 = vpop.f32.mrf.mxu3 }
 0x1c8   : > { %v2294_v7 = vpop.f32.mrf.mxu0 }
 0x1ce   : > { %v2296_v8 = vpop.f32.mrf.mxu3 }
 0x1d0   : > { %v2298_v9 = vpop.f32.mrf.mxu0 }
 0x1d6   : > { %v2300_v10 = vpop.f32.mrf.mxu3 }
 0x1d8   : > { %v2302_v11 = vpop.f32.mrf.mxu0 }
 0x1d9   : > { %3378 = vst [vmem:[#allocation13_spill] sm:$0xff] %v2302_v11 }
 0x1de   : > { %v2304_v12 = vpop.f32.mrf.mxu3 }
 0x1df   : > { %3379 = vst [vmem:[#allocation14_spill] sm:$0xff] %v2304_v12 }
 0x1e0   : > { %v2306_v13 = vpop.f32.mrf.mxu0 }
 0x1e6   : > { %v2308_v14 = vpop.f32.mrf.mxu3 }
 0x1e8   : > { %v2310_v15 = vpop.f32.mrf.mxu0 }
 0x1ee   : > { %v2312_v16 = vpop.f32.mrf.mxu3 }
 0x1ef   : > { %3380 = vst [vmem:[#allocation15_spill] sm:$0xff] %v2312_v16 }
 0x1f0   : > { %v2314_v17 = vpop.f32.mrf.mxu0 }
 0x1f1   : > { %3381 = vst [vmem:[#allocation16_spill] sm:$0xff] %v2314_v17 }
 0x1f6   : > { %v2316_v18 = vpop.f32.mrf.mxu3 }
 0x1f7   : > { %3382 = vst [vmem:[#allocation17_spill] sm:$0xff] %v2316_v18 }
 0x1f8   : > { %v2318_v19 = vpop.f32.mrf.mxu0 }
 0x1f9   : > { %3383 = vst [vmem:[#allocation18_spill] sm:$0xff] %v2318_v19 }
 0x1fe   : > { %v2320_v20 = vpop.f32.mrf.mxu3 }
 0x1ff   : > { %3384 = vst [vmem:[#allocation19_spill] sm:$0xff] %v2320_v20 }
 0x200   : > { %v2322_v21 = vpop.f32.mrf.mxu0 }
 0x206   : > { %v2324_v22 = vpop.f32.mrf.mxu3 }
 0x207   : > { %3385 = vst [vmem:[#allocation20_spill] sm:$0xff] %v2324_v22  ;;  %v413_v22 = vmax.f32 %v409_v38, %v2250_v51 }
 0x208   : > { %v2326_v23 = vpop.f32.mrf.mxu0 }
 0x209   : > { %v417_v43 = vmax.f32 %v413_v22, %v2270_v59 }
 0x20b   : > { %v421_v37 = vmax.f32 %v417_v43, %v2290_v5 }
 0x20e   : > { %v2328_v24 = vpop.f32.mrf.mxu3 }
 0x20f   : > { %3386 = vst [vmem:[#allocation21_spill] sm:$0xff] %v2328_v24  ;;  %v418_v24 = vmax.f32 %v414_v1, %v2276_v61  ;;  %v425_v1 = vmax.f32 %v421_v37, %v2306_v13 }
 0x210   : > { %v2330_v25 = vpop.f32.mrf.mxu0 }
 0x211   : > { %v422_v49 = vmax.f32 %v418_v24, %v2294_v7  ;;  %v429_v24 = vmax.f32 %v425_v1, %v2322_v21  ;;  %v730_v1 = vmax.f32 %v2228_v42, %v2248_v50 }
 0x216   : > { %v2332_v26 = vpop.f32.mrf.mxu3 }
 0x217   : > { %3387 = vst [vmem:[#allocation22_spill] sm:$0xff] %v2332_v26  ;;  %v415_v26 = vmax.f32 %v411_v39, %v2260_v55 }
 0x218   : > { %v2334_v27 = vpop.f32.mrf.mxu0 }
 0x219   : > { %v419_v32 = vmax.f32 %v415_v26, %v2280_v63 }
 0x21b   : > { %v423_v38 = vmax.f32 %v419_v32, %v2298_v9 }
 0x21d   : > { %v427_v22 = vmax.f32 %v423_v38, %v2314_v17 }
 0x21e   : > { %v2336_v28 = vpop.f32.mrf.mxu3 }
 0x21f   : > { %v431_v43 = vmax.f32 %v427_v22, %v2330_v25 }
 0x220   : > { %v2338_v29 = vpop.f32.mrf.mxu0 }
 0x226   : > { %v2342_v36 = vpop.f32.mrf.mxu3 }
 0x227   : > { %3388 = vst [vmem:[#allocation23_spill] sm:$0xff] %v2342_v36  ;;  %v416_v36 = vmax.f32 %v412_v0, %v2266_v57  ;;  %v426_v0 = vmax.f32 %v422_v49, %v2310_v15  ;;  %v433_v49 = vmax.f32 %v429_v24, %v2338_v29  ;;  %v729_v24 = vmax.f32 %v2224_v40, %v2244_v48 }
 0x228   : > { %v2340_v33 = vpop.f32.mrf.mxu0 }
 0x229   : > { %v420_v47 = vmax.f32 %v416_v36, %v2286_v3  ;;  %v430_v36 = vmax.f32 %v426_v0, %v2326_v23 }
 0x22b   : > { %v424_v39 = vmax.f32 %v420_v47, %v2302_v11  ;;  %v434_v47 = vmax.f32 %v430_v36, %v2340_v33  ;;  %v728_v36 = vmax.f32 %v2218_v34, %v2238_v46 }
 0x22d   : > { %v428_v26 = vmax.f32 %v424_v39, %v2318_v19  ;;  %v437_v17 = vmax.f32 %v433_v49, %v434_v47  ;;  %v727_v47 = vmax.f32 %v2213_v31, %v2234_v44  ;;  %v733_v49 = vmax.f32 %v729_v24, %v2264_v56 }
 0x22e   : > { %v2367_v57 = vpop.f32.mrf.mxu3 }
 0x22f   : > { %v432_v32 = vmax.f32 %v428_v26, %v2334_v27  ;;  %v2386_v26 = vpop.trf.xlu0  ;;  %v737_v50 = vmax.f32 %v733_v49, %v2284_v2 }
 0x230   : > { %v2357_v45 = vpop.f32.mrf.mxu0  ;;  %3389 = vst [vmem:[#allocation24_spill] sm:$0xff] %v2386_v26 }
 0x231   : > { %v435_v37 = vmax.f32 %v431_v43, %v2357_v45  ;;  %v734_v43 = vmax.f32 %v730_v1, %v2268_v58 }
 0x236   : > { %v2382_v19 = vpop.f32.mrf.mxu3 }
 0x237   : > { %v2408_v56 = vpop.trf.xlu0 }
 0x238   : > { %v2377_v11 = vpop.f32.mrf.mxu0  ;;  %3390 = vst [vmem:[#allocation25_spill] sm:$0xff] %v2408_v56 }
 0x239   : > { %v436_v38 = vmax.f32 %v432_v32, %v2377_v11 }
 0x23b   : > { %v438_v39 = vmax.f32 %v435_v37, %v436_v38  ;;  %v738_v37 = vmax.f32 %v734_v43, %v2288_v4 }
 0x23d   : > { %v439_v0 = vmax.f32 %v437_v17, %v438_v39  ;;  %v732_v17 = vmax.f32 %v728_v36, %v2258_v54  ;;  %v731_v39 = vmax.f32 %v727_v47, %v2254_v52  ;;  %v742_v48 = vmax.f32 %v738_v37, %v2304_v12  ;;  %v3393_v12 = vld [vmem:[#allocation20_spill] sm:$0xff] }
 0x23e   : > { %v741_v36 = vmax.f32 %v737_v50, %v2300_v10  ;;  %v2406_v43 = vpop.f32.mrf.mxu3  ;;  %v3392_v50 = vld [vmem:[#allocation22_spill] sm:$0xff] }
 0x23f   : > { %v440_v22 = vrot.slane %v439_v0, 4  ;;  %v736_v26 = vmax.f32 %v732_v17, %v2278_v62  ;;  %v746_v24 = vmax.f32 %v742_v48, %v2320_v20 }
 0x240   : > { %v745_v49 = vmax.f32 %v741_v36, %v2316_v18 }
 0x241   : > { %v441_v32 = vmax.f32 %v439_v0, %v440_v22  ;;  %v735_v0 = vmax.f32 %v731_v39, %v2274_v60  ;;  %v740_v22 = vmax.f32 %v736_v26, %v2296_v8  ;;  %v3391_v26 = vld [vmem:[#allocation21_spill] sm:$0xff] }
 0x242   : > { %v749_v39 = vmax.f32 %v745_v49, %v3392_v50  ;;  %v2428_v49 = vpop.trf.xlu0 }
 0x243   : > { %v442_v38 = vrot.slane %v441_v32, 2  ;;  %v739_v47 = vmax.f32 %v735_v0, %v2292_v6  ;;  %v744_v17 = vmax.f32 %v740_v22, %v2312_v16  ;;  %v3394_v16 = vld [vmem:[#allocation23_spill] sm:$0xff]  ;;  %3396 = vst [vmem:[#allocation22_spill] sm:$0xff] %v2428_v49 }
 0x244   : > { %v753_v22 = vmax.f32 %v749_v39, %v2382_v19 }
 0x245   : > { %v443_v1 = vmax.f32 %v441_v32, %v442_v38  ;;  %v750_v32 = vmax.f32 %v746_v24, %v2336_v28  ;;  %v743_v37 = vmax.f32 %v739_v47, %v2308_v14  ;;  %v748_v38 = vmax.f32 %v744_v17, %v3391_v26  ;;  %v3395_v47 = vld [vmem:[#allocation3_spill] sm:$0xff] }
 0x247   : > { %v444_v58 = vrot.slane %v443_v1, 1  ;;  %v754_v48 = vmax.f32 %v750_v32, %v2406_v43  ;;  %v747_v56 = vmax.f32 %v743_v37, %v3393_v12  ;;  %v752_v0 = vmax.f32 %v748_v38, %v2367_v57 }
 0x249   : > { %v2418_v20 = vmax.f32 %v443_v1, %v444_v58  ;;  %v751_v36 = vmax.f32 %v747_v56, %v3394_v16  ;;  %v756_v18 = vmax.f32 %v753_v22, %v754_v48  ;;  %v3397_v56 = vld [vmem:[#allocation4_spill] sm:$0xff] }
 0x24b   : > { %v446_v24 = vsub.f32 %v2209_v30, %v2418_v20  ;;  %v447_v17 = vsub.f32 %v3395_v47, %v2418_v20  ;;  %v755_v32 = vmax.f32 %v751_v36, %v752_v0  ;;  %v448_v58 = vsub.f32 %v2220_v35, %v2418_v20  ;;  %v3398_v30 = vld [vmem:[#allocation5_spill] sm:$0xff]  ;;  %v2438_v36 = vpop.trf.xlu0  ;;  %v3400_v35 = vld [vmem:[#allocation6_spill] sm:$0xff] }
 0x24c   : > { %v449_v1 = vsub.f32 %v2226_v41, %v2418_v20  ;;  %v450_v48 = vsub.f32 %v3397_v56, %v2418_v20  ;;  %v451_v47 = vsub.f32 %v3398_v30, %v2418_v20  ;;  %3399 = vst [vmem:[#allocation20_spill] sm:$0xff] %v2438_v36  ;;  %v452_v26 = vsub.f32 %v3400_v35, %v2418_v20 }
 0x24d   : > { %v757_v37 = vmax.f32 %v755_v32, %v756_v18  ;;  %v478_v38 = vmul.f32 1.442695, %v446_v24  ;;  %v480_v39 = vmul.f32 1.442695, %v447_v17  ;;  %v482_v22 = vmul.f32 1.442695, %v448_v58 }
 0x24e   : > { %v484_v49 = vmul.f32 1.442695, %v449_v1  ;;  %v486_v41 = vmul.f32 1.442695, %v450_v48  ;;  %v3401_v18 = vld [vmem:[#allocation8_spill] sm:$0xff]  ;;  %v454_v17 = vsub.f32 %v2250_v51, %v2418_v20  ;;  %v455_v1 = vsub.f32 %v2256_v53, %v2418_v20 }
 0x24f   : > { %1866 = vpow2.f32 %v478_v38  ;;  %v758_v0 = vrot.slane %v757_v37, 4  ;;  %v453_v24 = vsub.f32 %v3401_v18, %v2418_v20  ;;  %v488_v32 = vmul.f32 1.442695, %v451_v47 }
 0x250   : > { %1868 = vpow2.f32 %v480_v39  ;;  %v456_v56 = vsub.f32 %v2260_v55, %v2418_v20  ;;  %v490_v48 = vmul.f32 1.442695, %v452_v26  ;;  %v494_v53 = vmul.f32 1.442695, %v454_v17 }
 0x251   : > { %1870 = vpow2.f32 %v482_v22  ;;  %v759_v58 = vmax.f32 %v757_v37, %v758_v0  ;;  %v3402_v22 = vld [vmem:[#allocation11_spill] sm:$0xff]  ;;  %v492_v35 = vmul.f32 1.442695, %v453_v24  ;;  %v458_v37 = vsub.f32 %v2270_v59, %v2418_v20 }
 0x252   : > { %1872 = vpow2.f32 %v484_v49  ;;  %v457_v30 = vsub.f32 %v3402_v22, %v2418_v20  ;;  %v459_v55 = vsub.f32 %v2276_v61, %v2418_v20  ;;  %v496_v0 = vmul.f32 1.442695, %v455_v1 }
 0x253   : > { %1874 = vpow2.f32 %v486_v41  ;;  %v760_v47 = vrot.slane %v759_v58, 2  ;;  %v2465_v41 = vpop.trf.xlu0  ;;  %v460_v24 = vsub.f32 %v2280_v63, %v2418_v20  ;;  %v498_v22 = vmul.f32 1.442695, %v456_v56 }
 0x254   : > { %1876 = vpow2.f32 %v488_v32  ;;  %3403 = vst [vmem:[#allocation23_spill] sm:$0xff] %v2465_v41  ;;  %v461_v59 = vsub.f32 %v2286_v3, %v2418_v20  ;;  %v500_v17 = vmul.f32 1.442695, %v457_v30  ;;  %v462_v1 = vsub.f32 %v2290_v5, %v2418_v20 }
 0x255   : > { %v2446_v38 = vpop.eup %1866  ;;  %1878 = vpow2.f32 %v490_v48  ;;  %v761_v36 = vmax.f32 %v759_v58, %v760_v47  ;;  %v463_v63 = vsub.f32 %v2294_v7, %v2418_v20  ;;  %v504_v56 = vmul.f32 1.442695, %v459_v55 }
 0x256   : > { %v2450_v39 = vpop.eup %1868  ;;  %1880 = vpow2.f32 %v492_v35  ;;  %v464_v30 = vsub.f32 %v2298_v9, %v2418_v20  ;;  %v506_v35 = vmul.f32 1.442695, %v460_v24  ;;  %v466_v7 = vsub.f32 %v2306_v13, %v2418_v20 }
 0x257   : > { %v542_v51 = vadd.f32 %v2450_v39, %v2446_v38  ;;  %v2458_v49 = vpop.eup %1870  ;;  %1882 = vpow2.f32 %v494_v53  ;;  %v510_v47 = vmul.f32 1.442695, %v462_v1  ;;  %v762_v55 = vrot.slane %v761_v36, 1 }
 0x258   : > { %v2467_v18 = vpop.eup %1872  ;;  %1884 = vpow2.f32 %v496_v0  ;;  %v467_v9 = vsub.f32 %v2310_v15, %v2418_v20  ;;  %v512_v24 = vmul.f32 1.442695, %v463_v63  ;;  %v514_v13 = vmul.f32 1.442695, %v464_v30 }
 0x259   : > { %v543_v26 = vadd.f32 %v2458_v49, %v542_v51  ;;  %v2474_v61 = vpop.eup %1874  ;;  %v502_v51 = vmul.f32 1.442695, %v458_v37  ;;  %1886 = vpow2.f32 %v498_v22  ;;  %v508_v37 = vmul.f32 1.442695, %v461_v59 }
 0x25a   : > { %v2481_v3 = vpop.eup %1876  ;;  %1888 = vpow2.f32 %v500_v17  ;;  %v2512_v41 = vmax.f32 %v761_v36, %v762_v55  ;;  %v471_v30 = vsub.f32 %v2326_v23, %v2418_v20  ;;  %v477_v23 = vsub.f32 %v2377_v11, %v2418_v20 }
 0x25b   : > { %v544_v32 = vadd.f32 %v2467_v18, %v543_v26  ;;  %v3404_v26 = vld [vmem:[#allocation13_spill] sm:$0xff]  ;;  %v2488_v53 = vpop.eup %1878  ;;  %1890 = vpow2.f32 %v502_v51  ;;  %v2497_v59 = vpop.trf.xlu0  ;;  %v3407_v51 = vld [vmem:[#allocation18_spill] sm:$0xff]  ;;  %v472_v11 = vsub.f32 %v2330_v25, %v2418_v20 }
 0x25c   : > { %v465_v5 = vsub.f32 %v3404_v26, %v2418_v20  ;;  %v2492_v0 = vpop.eup %1880  ;;  %1892 = vpow2.f32 %v504_v56  ;;  %3405 = vst [vmem:[#allocation3_spill] sm:$0xff] %v2497_v59  ;;  %v469_v26 = vsub.f32 %v3407_v51, %v2418_v20  ;;  %v518_v59 = vmul.f32 1.442695, %v466_v7 }
 0x25d   : > { %v545_v48 = vadd.f32 %v2474_v61, %v544_v32  ;;  %v2499_v17 = vpop.eup %1882  ;;  %v3406_v32 = vld [vmem:[#allocation16_spill] sm:$0xff]  ;;  %1894 = vpow2.f32 %v506_v35 }
 0x25e   : > { %v2503_v1 = vpop.eup %1884  ;;  %1896 = vpow2.f32 %v508_v37  ;;  %v516_v15 = vmul.f32 1.442695, %v465_v5  ;;  %v524_v36 = vmul.f32 1.442695, %v469_v26 }
 0x25f   : > { %v546_v58 = vadd.f32 %v2481_v3, %v545_v48  ;;  %v468_v48 = vsub.f32 %v3406_v32, %v2418_v20  ;;  %v2508_v56 = vpop.eup %1886  ;;  %1898 = vpow2.f32 %v510_v47  ;;  %v520_v32 = vmul.f32 1.442695, %v467_v9 }
 0x260   : > { %v2514_v35 = vpop.eup %1888  ;;  %1900 = vpow2.f32 %v512_v24  ;;  %v764_v24 = vsub.f32 %v2213_v31, %v2512_v41  ;;  %v474_v31 = vsub.f32 %v2338_v29, %v2418_v20 }
 0x261   : > { %v547_v22 = vadd.f32 %v2488_v53, %v546_v58  ;;  %v470_v58 = vsub.f32 %v2322_v21, %v2418_v20  ;;  %v2519_v37 = vpop.eup %1890  ;;  %1902 = vpow2.f32 %v514_v13  ;;  %v522_v21 = vmul.f32 1.442695, %v468_v48 }
 0x262   : > { %v2523_v47 = vpop.eup %1892  ;;  %1904 = vpow2.f32 %v516_v15  ;;  %v765_v13 = vsub.f32 %v2218_v34, %v2512_v41  ;;  %v475_v34 = vsub.f32 %v2340_v33, %v2418_v20  ;;  %v796_v25 = vmul.f32 1.442695, %v764_v24 }
 0x263   : > { %v548_v63 = vadd.f32 %v2492_v0, %v547_v22  ;;  %v476_v22 = vsub.f32 %v2357_v45, %v2418_v20  ;;  %v2526_v55 = vpop.eup %1894  ;;  %1906 = vpow2.f32 %v518_v59  ;;  %v526_v9 = vmul.f32 1.442695, %v470_v58  ;;  %v2537_v26 = vpop.trf.xlu0 }
 0x264   : > { %v2532_v51 = vpop.eup %1896  ;;  %1908 = vpow2.f32 %v520_v32  ;;  %v528_v45 = vmul.f32 1.442695, %v471_v30  ;;  %3408 = vst [vmem:[#allocation4_spill] sm:$0xff] %v2537_v26  ;;  %v766_v32 = vsub.f32 %v2224_v40, %v2512_v41  ;;  %v798_v29 = vmul.f32 1.442695, %v765_v13 }
 0x265   : > { %v549_v5 = vadd.f32 %v2499_v17, %v548_v63  ;;  %v2539_v15 = vpop.eup %1898  ;;  %1910 = vpow2.f32 %v522_v21  ;;  %v538_v59 = vmul.f32 1.442695, %v476_v22  ;;  %v540_v22 = vmul.f32 1.442695, %v477_v23 }
 0x266   : > { %v2543_v63 = vpop.eup %1900  ;;  %1912 = vpow2.f32 %v524_v36  ;;  %v473_v40 = vsub.f32 %v2334_v27, %v2418_v20  ;;  %v800_v13 = vmul.f32 1.442695, %v766_v32  ;;  %v769_v20 = vsub.f32 %v2238_v46, %v2512_v41 }
 0x267   : > { %v550_v7 = vadd.f32 %v2503_v1, %v549_v5  ;;  %v2548_v30 = vpop.eup %1902  ;;  %1914 = vpow2.f32 %v526_v9  ;;  %v534_v9 = vmul.f32 1.442695, %v474_v31  ;;  %v772_v46 = vsub.f32 %v2254_v52, %v2512_v41 }
 0x268   : > { %v2554_v5 = vpop.eup %1904  ;;  %1916 = vpow2.f32 %v528_v45  ;;  %v768_v45 = vsub.f32 %v2234_v44, %v2512_v41  ;;  %v532_v32 = vmul.f32 1.442695, %v473_v40  ;;  %v778_v40 = vsub.f32 %v2284_v2, %v2512_v41 }
 0x269   : > { %v551_v48 = vadd.f32 %v2508_v56, %v550_v7  ;;  %v2557_v36 = vpop.eup %1906  ;;  %v530_v7 = vmul.f32 1.442695, %v472_v11  ;;  %1918 = vpow2.f32 %v538_v59  ;;  %v536_v59 = vmul.f32 1.442695, %v475_v34 }
 0x26a   : > { %v2561_v33 = vpop.eup %1908  ;;  %1920 = vpow2.f32 %v796_v25 }
 0x26b   : > { %v552_v58 = vadd.f32 %v2514_v35, %v551_v48  ;;  %v767_v48 = vsub.f32 %v2228_v42, %v2512_v41  ;;  %v2566_v23 = vpop.eup %1910  ;;  %1922 = vpow2.f32 %v798_v29  ;;  %v2575_v27 = vpop.trf.xlu0 }
 0x26c   : > { %v2570_v11 = vpop.eup %1912  ;;  %1924 = vpow2.f32 %v540_v22  ;;  %3409 = vst [vmem:[#allocation5_spill] sm:$0xff] %v2575_v27  ;;  %v3411_v22 = vld [vmem:[#allocation9_spill] sm:$0xff] }
 0x26d   : > { %v553_v21 = vadd.f32 %v2519_v37, %v552_v58  ;;  %v2577_v31 = vpop.eup %1914  ;;  %1926 = vpow2.f32 %v530_v7  ;;  %v3410_v58 = vld [vmem:[#allocation7_spill] sm:$0xff]  ;;  %v802_v44 = vmul.f32 1.442695, %v767_v48  ;;  %v771_v29 = vsub.f32 %v3411_v22, %v2512_v41 }
 0x26e   : > { %v770_v25 = vsub.f32 %v3410_v58, %v2512_v41  ;;  %1928 = vpow2.f32 %v534_v9  ;;  %v804_v7 = vmul.f32 1.442695, %v768_v45  ;;  %v806_v9 = vmul.f32 1.442695, %v769_v20 }
 0x26f   : > { %v554_v24 = vadd.f32 %v2523_v47, %v553_v21  ;;  %v2581_v21 = vpop.eup %1916  ;;  %1930 = vpow2.f32 %v800_v13  ;;  %v773_v58 = vsub.f32 %v2258_v54, %v2512_v41  ;;  %v779_v22 = vsub.f32 %v2288_v4, %v2512_v41 }
 0x270   : > { %1932 = vpow2.f32 %v536_v59  ;;  %v808_v52 = vmul.f32 1.442695, %v770_v25  ;;  %v776_v59 = vsub.f32 %v2274_v60, %v2512_v41  ;;  %v810_v2 = vmul.f32 1.442695, %v771_v29 }
 0x271   : > { %v555_v42 = vadd.f32 %v2526_v55, %v554_v24  ;;  %v2586_v24 = vpop.eup %1918  ;;  %1934 = vpow2.f32 %v802_v44  ;;  %v777_v54 = vsub.f32 %v2278_v62, %v2512_v41  ;;  %v812_v4 = vmul.f32 1.442695, %v772_v46 }
 0x272   : > { %v2590_v27 = vpop.eup %1920  ;;  %1936 = vpow2.f32 %v532_v32  ;;  %v824_v32 = vmul.f32 1.442695, %v778_v40  ;;  %v586_v62 = vpack.c.bf16 %v2532_v51, %v2526_v55  ;;  %v820_v40 = vmul.f32 1.442695, %v776_v59 }
 0x273   : > { %v556_v34 = vadd.f32 %v2532_v51, %v555_v42  ;;  %3412 = vst [vmem:[#allocation6_spill] sm:$0xff] %v2590_v27  ;;  %v2595_v42 = vpop.eup %1922  ;;  %1938 = vpow2.f32 %v804_v7  ;;  %v2617_v29 = vpop.trf.xlu0  ;;  %v814_v59 = vmul.f32 1.442695, %v773_v58 }
 0x274   : > { %3413 = vst [vmem:[#allocation8_spill] sm:$0xff] %v2595_v42  ;;  %v2601_v45 = vpop.eup %1924  ;;  %1940 = vpow2.f32 %v806_v9  ;;  %v860_v60 = vadd.f32 %v2595_v42, %v2590_v27  ;;  %601 = vmatpush.bf16.msrb.mxu0 %v586_v62 }
 0x275   : > { %v557_v48 = vadd.f32 %v2539_v15, %v556_v34  ;;  %v2606_v20 = vpop.eup %1926  ;;  %v3414_v34 = vld [vmem:[#allocation10_spill] sm:$0xff]  ;;  %3415 = vst [vmem:[#allocation11_spill] sm:$0xff] %v2617_v29  ;;  %1942 = vpow2.f32 %v808_v52  ;;  %v594_v46 = vpack.c.bf16 %v2601_v45, %v2586_v24  ;;  %v3416_v29 = vld [vmem:[#allocation12_spill] sm:$0xff] }
 0x276   : > { %v774_v26 = vsub.f32 %v3414_v34, %v2512_v41  ;;  %v2612_v25 = vpop.eup %1928  ;;  %v826_v34 = vmul.f32 1.442695, %v779_v22  ;;  %1944 = vpow2.f32 %v810_v2  ;;  %v775_v52 = vsub.f32 %v3416_v29, %v2512_v41 }
 0x277   : > { %v558_v13 = vadd.f32 %v2543_v63, %v557_v48  ;;  %v2619_v48 = vpop.eup %1930  ;;  %1946 = vpow2.f32 %v812_v4  ;;  %v822_v22 = vmul.f32 1.442695, %v777_v54  ;;  %614 = vmatpush.bf16.msra.mxu2 %v594_v46 }
 0x278   : > { %v2625_v7 = vpop.eup %1932  ;;  %1948 = vpow2.f32 %v824_v32  ;;  %v816_v62 = vmul.f32 1.442695, %v774_v26  ;;  %v584_v26 = vpack.c.bf16 %v2514_v35, %v2508_v56 }
 0x279   : > { %v559_v44 = vadd.f32 %v2548_v30, %v558_v13  ;;  %v861_v13 = vadd.f32 %v2619_v48, %v860_v60  ;;  %v2629_v42 = vpop.eup %1934  ;;  %1950 = vpow2.f32 %v826_v34  ;;  %v585_v60 = vpack.c.bf16 %v2523_v47, %v2519_v37 }
 0x27a   : > { %v2633_v55 = vpop.eup %1936  ;;  %v593_v4 = vpack.c.bf16 %v2625_v7, %v2612_v25  ;;  %1952 = vpow2.f32 %v820_v40 }
 0x27b   : > { %v560_v9 = vadd.f32 %v2554_v5, %v559_v44  ;;  %v862_v44 = vadd.f32 %v2629_v42, %v861_v13  ;;  %v2637_v2 = vpop.eup %1938  ;;  %1954 = vpow2.f32 %v822_v22  ;;  %602 = vmatpush.bf16.msrb.mxu0 %v585_v60  ;;  %v2653_v34 = vpop.trf.xlu0  ;;  %v592_v40 = vpack.c.bf16 %v2633_v55, %v2606_v20 }
 0x27c   : > { %v2643_v54 = vpop.eup %1940  ;;  %615 = vmatpush.bf16.msra.mxu2 %v593_v4  ;;  %3417 = vst [vmem:[#allocation13_spill] sm:$0xff] %v2653_v34  ;;  %1956 = vpow2.f32 %v814_v59  ;;  %v780_v60 = vsub.f32 %v2292_v6, %v2512_v41  ;;  %v781_v59 = vsub.f32 %v2296_v8, %v2512_v41  ;;  %v794_v4 = vsub.f32 %v2382_v19, %v2512_v41 }
 0x27d   : > { %v561_v51 = vadd.f32 %v2557_v36, %v560_v9  ;;  %v863_v32 = vadd.f32 %v2637_v2, %v862_v44  ;;  %v2647_v46 = vpop.eup %1942  ;;  %v818_v9 = vmul.f32 1.442695, %v775_v52  ;;  %1958 = vpow2.f32 %v816_v62 }
 0x27e   : > { %v2649_v58 = vpop.eup %1944  ;;  %v782_v6 = vsub.f32 %v2300_v10, %v2512_v41  ;;  %v795_v8 = vsub.f32 %v2406_v43, %v2512_v41  ;;  %v3419_v43 = vld [vmem:[#allocation15_spill] sm:$0xff] }
 0x27f   : > { %v562_v29 = vadd.f32 %v2561_v33, %v561_v51  ;;  %v864_v47 = vadd.f32 %v2643_v54, %v863_v32  ;;  %v2655_v13 = vpop.eup %1946  ;;  %1960 = vpow2.f32 %v818_v9  ;;  %603 = vmatpush.bf16.msrb.mxu0 %v584_v26  ;;  %v583_v9 = vpack.c.bf16 %v2503_v1, %v2499_v17  ;;  %v3420_v17 = vld [vmem:[#allocation17_spill] sm:$0xff] }
 0x280   : > { %v2661_v52 = vpop.eup %1948  ;;  %616 = vmatpush.bf16.msra.mxu2 %v592_v40  ;;  %v858_v27 = vmul.f32 1.442695, %v795_v8  ;;  %v582_v1 = vpack.c.bf16 %v2492_v0, %v2488_v53  ;;  %v830_v8 = vmul.f32 1.442695, %v781_v59 }
 0x281   : > { %v563_v37 = vadd.f32 %v2566_v23, %v562_v29  ;;  %v865_v51 = vadd.f32 %v2647_v46, %v864_v47  ;;  %v2665_v44 = vpop.eup %1950  ;;  %v3418_v47 = vld [vmem:[#allocation14_spill] sm:$0xff] }
 0x282   : > { %v1953_v56 = vpop.eup %1952  ;;  %v904_v62 = vpack.c.bf16 %v2665_v44, %v2661_v52  ;;  %v783_v26 = vsub.f32 %v3418_v47, %v2512_v41  ;;  %v856_v47 = vmul.f32 1.442695, %v794_v4  ;;  %v828_v4 = vmul.f32 1.442695, %v780_v60  ;;  %v3421_v60 = vld [vmem:[#allocation2_spill] sm:$0xff] }
 0x283   : > { %v564_v22 = vadd.f32 %v2570_v11, %v563_v37  ;;  %v866_v29 = vadd.f32 %v2649_v58, %v865_v51  ;;  %v1955_v32 = vpop.eup %1954  ;;  %v591_v37 = vpack.c.bf16 %v2581_v21, %v2577_v31  ;;  %604 = vmatpush.bf16.msrb.mxu0 %v583_v9  ;;  %v2701_v40 = vpop.trf.xlu0  ;;  %v793_v51 = vsub.f32 %v2367_v57, %v2512_v41 }
 0x284   : > { %918 = vmatpush.bf16.msra.mxu1 %v904_v62  ;;  %v2691_v10 = vpop.eup %1956  ;;  %v903_v62 = vpack.c.bf16 %v1955_v32, %v1953_v56  ;;  %v791_v57 = vsub.f32 %v2336_v28, %v2512_v41  ;;  %1962 = vpow2.f32 %v856_v47  ;;  %v589_v28 = vpack.c.bf16 %v2561_v33, %v2557_v36 }
 0x285   : > { %v565_v35 = vadd.f32 %v2577_v31, %v564_v22  ;;  %v867_v22 = vadd.f32 %v2655_v13, %v866_v29  ;;  %v792_v31 = vsub.f32 %v3394_v16, %v2512_v41  ;;  %617 = vmatpush.bf16.msra.mxu2 %v591_v37  ;;  %v590_v16 = vpack.c.bf16 %v2570_v11, %v2566_v23  ;;  %v2717_v11 = vld.sshfl [vmem:[#allocation1] sm:$0xff pattern:$0x73625140] }
 0x286   : > { %1964 = vpow2.f32 %v858_v27  ;;  %v901_v36 = vpack.c.bf16 %v2691_v10, %v2655_v13  ;;  %v900_v47 = vpack.c.bf16 %v2649_v58, %v2647_v46 }
 0x287   : > { %v566_v19 = vadd.f32 %v2581_v21, %v565_v35  ;;  %v1959_v21 = vpop.eup %1958  ;;  %v868_v29 = vadd.f32 %v2691_v10, %v867_v22  ;;  %v852_v22 = vmul.f32 1.442695, %v792_v31  ;;  %605 = vmatpush.bf16.msrb.mxu0 %v582_v1  ;;  %1966 = vpow2.f32 %v828_v4 }
 0x288   : > { %v1961_v34 = vpop.eup %1960  ;;  %919 = vmatpush.bf16.msra.mxu1 %v903_v62  ;;  %1968 = vpow2.f32 %v830_v8  ;;  %v3426_v4 = vsub.f32 %v3420_v17, %v2512_v41 }
 0x289   : > { %v567_v35 = vadd.f32 %v2606_v20, %v566_v19  ;;  %v788_v20 = vsub.f32 %v3393_v12, %v2512_v41  ;;  %v869_v37 = vadd.f32 %v1959_v21, %v868_v29  ;;  %v790_v19 = vsub.f32 %v3392_v50, %v2512_v41  ;;  %618 = vmatpush.bf16.msra.mxu2 %v590_v16  ;;  %v2719_v12 = vld.sshfl [vmem:[#allocation1 + $0x8] sm:$0xff pattern:$0x73625140] }
 0x28a   : > { %v902_v23 = vpack.c.bf16 %v1961_v34, %v1959_v21  ;;  %v581_v50 = vpack.c.bf16 %v2481_v3, %v2474_v61  ;;  %913 = vst [vmem:[#allocation1] ss:$4 sm:$0xff] %v3421_v60  ;;  %1970 = vpow2.f32 %v852_v22  ;;  %v1831_v29 = vld [vmem:[%s2187_s25 + $0x8] sm:$0xff]   ;;  %v587_v16 = vpack.c.bf16 %v2543_v63, %v2539_v15  ;;  %v2779_v63 = vld [vmem:[%s2177_s22 + $0x4] sm:$0xf] }
 0x28b   : > { %v568_v9 = vadd.f32 %v2633_v55, %v567_v35  ;;  %v870_v0 = vadd.f32 %v1961_v34, %v869_v37  ;;  %v854_v55 = vmul.f32 1.442695, %v793_v51  ;;  %v3422_v34 = vld [vmem:[#allocation21_spill] sm:$0xff]  ;;  %v834_v51 = vmul.f32 1.442695, %v783_v26  ;;  %v2732_v33 = vpop.trf.xlu0  ;;  %v2738_v26 = vpop.eup %1962 }
 0x28c   : > { %920 = vmatpush.bf16.msra.mxu1 %v902_v23  ;;  %v789_v31 = vsub.f32 %v3422_v34, %v2512_v41  ;;  %v848_v27 = vmul.f32 1.442695, %v790_v19  ;;  %606 = vmatpush.bf16.msrb.mxu0 %v581_v50  ;;  %v2747_v10 = vpop.eup %1964  ;;  %v899_v19 = vpack.c.bf16 %v2643_v54, %v2637_v2 }
 0x28d   : > { %v569_v53 = vadd.f32 %v2612_v25, %v568_v9  ;;  %v832_v25 = vmul.f32 1.442695, %v782_v6  ;;  %v871_v1 = vadd.f32 %v1953_v56, %v870_v0  ;;  %619 = vmatpush.bf16.msra.mxu2 %v589_v28  ;;  %1972 = vpow2.f32 %v854_v55  ;;  %v2754_v35 = vpop.eup %1966 }
 0x28e   : > { %v580_v56 = vpack.c.bf16 %v2467_v18, %v2458_v49  ;;  %v588_v6 = vpack.c.bf16 %v2554_v5, %v2548_v30  ;;  %v3424_v49 = vld [vmem:[#allocation19_spill] sm:$0xff]  ;;  %v3425_v30 = vsub.f32 %v3419_v43, %v2512_v41  ;;  %v2760_v62 = vpop.eup %1968  ;;  %v579_v43 = vpack.c.bf16 %v2450_v39, %v2446_v38 }
 0x28f   : > { %v570_v59 = vadd.f32 %v2625_v7, %v569_v53  ;;  %v872_v3 = vadd.f32 %v1955_v32, %v871_v1  ;;  %v850_v7 = vmul.f32 1.442695, %v791_v57  ;;  %1974 = vpow2.f32 %v832_v25 }
 0x290   : > { %921 = vmatpush.bf16.msra.mxu1 %v901_v36  ;;  %v787_v18 = vsub.f32 %v3424_v49, %v2512_v41  ;;  %1976 = vpow2.f32 %v834_v51  ;;  %v838_v5 = vmul.f32 1.442695, %v3425_v30  ;;  %607 = vmatpush.bf16.msrb.mxu0 %v580_v56  ;;  %v1357_v9 = vunpack.c.h.bf16 %v1831_v29 }
 0x291   : > { %v571_v61 = vadd.f32 %v2586_v24, %v570_v59  ;;  %v3423_v24 = vsub.f32 %v2308_v14, %v2512_v41  ;;  %v873_v32 = vadd.f32 %v2661_v52, %v872_v3  ;;  %620 = vmatpush.bf16.msra.mxu2 %v588_v6  ;;  %v846_v14 = vmul.f32 1.442695, %v789_v31  ;;  %v914_v23 = vld.sshfl [vmem:[#allocation1] sm:$0xff pattern:$0x73625140]  ;;  %v3428_v3 = vld [vmem:[#allocation8_spill] sm:$0xff] }
 0x292   : > { %1978 = vpow2.f32 %v848_v27  ;;  %v912_v46 = vpack.c.bf16 %v2747_v10, %v2738_v26  ;;  %v840_v38 = vmul.f32 1.442695, %v3426_v4  ;;  %v1358_v39 = vmul.f32 0.35351563, %v1357_v9  ;;  %v915_v50 = vld.sshfl [vmem:[#allocation1 + $0x8] sm:$0xff pattern:$0x73625140] }
 0x293   : > { %v2741_v21 = vadd.f32 %v2601_v45, %v571_v61  ;;  %v836_v13 = vmul.f32 1.442695, %v3423_v24  ;;  %v844_v45 = vmul.f32 1.442695, %v788_v20  ;;  %v874_v52 = vadd.f32 %v2665_v44, %v873_v32  ;;  %v2766_v20 = vpop.eup %1970  ;;  %v2784_v57 = vpop.trf.xlu0  ;;  %1317 = vst [vmem:[#allocation1] ss:$4 sm:$0xff] %v2779_v63 }
 0x294   : > { %1980 = vpow2.f32 %v850_v7  ;;  %922 = vmatpush.bf16.msra.mxu1 %v900_v47  ;;  %v2771_v58 = vpop.eup %1972  ;;  %608 = vmatpush.bf16.msrb.mxu0 %v579_v43  ;;  %v842_v22 = vmul.f32 1.442695, %v787_v18  ;;  %v1359_v41 = vpack.c.bf16 %v1358_v39, %v1358_v39  ;;  %v956_v55 = vunpack.c.l.bf16 %v1831_v29  ;;  %v3427_v61 = vld [vmem:[#allocation6_spill] sm:$0xff] }
 0x295   : > { %1982 = vpow2.f32 %v836_v13  ;;  %v875_v44 = vadd.f32 %v2754_v35, %v874_v52  ;;  %621 = vmatpush.bf16.msra.mxu2 %v587_v16  ;;  %v2776_v15 = vpop.eup %1974  ;;  %v911_v0 = vpack.c.bf16 %v2771_v58, %v2766_v20  ;;  %v897_v36 = vpack.c.bf16 %v3428_v3, %v3427_v61  ;;  %v3435_v61 = vld [vmem:[#allocation20_spill] sm:$0xff] }
 0x296   : > { %1984 = vpow2.f32 %v838_v5  ;;  %v1977_v8 = vpop.eup %1976  ;;  %v2792_v54 = vsel %vm316_vm0, %v1359_v41, 0  ;;  %v957_v59 = vmul.f32 0.35351563, %v956_v55 }
 0x297   : > { %1986 = vpow2.f32 %v844_v45  ;;  %v876_v37 = vadd.f32 %v2760_v62, %v875_v44  ;;  %609 = vmatmul.bf16.vlgmr.msrb.gmra.mxu0 %v2717_v11  ;;  %v898_v11 = vpack.c.bf16 %v2629_v42, %v2619_v48  ;;  %1856 = vmatpush.bf16.msrb.mxu3 %v2792_v54  ;;  %v3429_v45 = vld [vmem:[#allocation24_spill] sm:$0xff]  ;;  %v906_v29 = vpack.c.bf16 %v1977_v8, %v2776_v15 }
 0x298   : > { %1988 = vpow2.f32 %v846_v14  ;;  %v1979_v17 = vpop.eup %1978  ;;  %923 = vmatpush.bf16.msra.mxu1 %v899_v19  ;;  %622 = vmatmul.bf16.vlgmr.msra.gmra.mxu2 %v2719_v12  ;;  %v958_v31 = vpack.c.bf16 %v957_v59, %v957_v59  ;;  %v905_v44 = vpack.c.bf16 %v2760_v62, %v2754_v35  ;;  %v3433_v35 = vld [vmem:[#allocation11_spill] sm:$0xff]  ;;  %v3434_v59 = vld [vmem:[#allocation25_spill] sm:$0xff] }
 0x299   : > { %931 = vmatpush.bf16.msrb.mxu2 %v912_v46  ;;  %v877_v53 = vadd.f32 %v2776_v15, %v876_v37  ;;  %1990 = vpow2.f32 %v840_v38  ;;  %1370 = vmatpush.bf16.msra.mxu0 %v2792_v54 }
 0x29a   : > { %v1981_v2 = vpop.eup %1980  ;;  %1992 = vpow2.f32 %v842_v22  ;;  %v1039_v42 = vsel %vm316_vm0, %v958_v31, 0 }
 0x29b   : > { %v1983_v28 = vpop.eup %1982  ;;  %v878_v60 = vadd.f32 %v1977_v8, %v877_v53  ;;  %v910_v34 = vpack.c.bf16 %v1981_v2, %v1979_v17  ;;  %v2802_v48 = vpop.trf.xlu0 }
 0x29c   : > { %v1985_v25 = vpop.eup %1984  ;;  %924 = vmatpush.bf16.msra.mxu1 %v898_v11  ;;  %1846 = vmatmul.msk.bf16.vlgmr.msrb.gmra.mxu3 %vm267_vm1, %v2802_v48 }
 0x29d   : > { %932 = vmatpush.bf16.msrb.mxu2 %v911_v0  ;;  %v1987_v1 = vpop.eup %1986  ;;  %v879_v12 = vadd.f32 %v1983_v28, %v878_v60  ;;  %v907_v14 = vpack.c.bf16 %v1985_v25, %v1983_v28 }
 0x29e   : > { %v1989_v51 = vpop.eup %1988 }
 0x29f   : > { %v880_v27 = vadd.f32 %v1985_v25, %v879_v12  ;;  %v1991_v7 = vpop.eup %1990  ;;  %v909_v6 = vpack.c.bf16 %v1989_v51, %v1987_v1 }
 0x2a0   : > { %925 = vmatpush.bf16.msra.mxu1 %v897_v36  ;;  %v1993_v24 = vpop.eup %1992 }
 0x2a1   : > { %933 = vmatpush.bf16.msrb.mxu2 %v910_v34  ;;  %v881_v56 = vadd.f32 %v1991_v7, %v880_v27  ;;  %v908_v49 = vpack.c.bf16 %v1993_v24, %v1991_v7 }
 0x2a3   : > { %v882_v13 = vadd.f32 %v1993_v24, %v881_v56  ;;  %926 = vmatmul.bf16.vlgmr.msra.gmra.mxu1 %v914_v23  ;;  %v2806_v30 = vpop.trf.xlu0 }
 0x2a4   : > { %1048 = vmatpush.bf16.msrb.mxu1 %v1039_v42  ;;  %v3436_v42 = vld [vmem:[#allocation3_spill] sm:$0xff] }
 0x2a5   : > { %934 = vmatpush.bf16.msrb.mxu2 %v909_v6  ;;  %v883_v32 = vadd.f32 %v1987_v1, %v882_v13  ;;  %v3437_v6 = vld [vmem:[#allocation5_spill] sm:$0xff] }
 0x2a7   : > { %v884_v18 = vadd.f32 %v1989_v51, %v883_v32  ;;  %1832 = vmatmul.msk.bf16.vlgmr.msra.gmra.mxu0 %vm267_vm1, %v3429_v45  ;;  %v3438_v32 = vld [vmem:[#allocation13_spill] sm:$0xff] }
 0x2a9   : > { %935 = vmatpush.bf16.msrb.mxu2 %v908_v49  ;;  %v885_v5 = vadd.f32 %v1979_v17, %v884_v18 }
 0x2ab   : > { %v886_v52 = vadd.f32 %v1981_v2, %v885_v5  ;;  %v2813_v16 = vpop.trf.xlu0 }
 0x2ac   : > { %1847 = vmatmul.msk.bf16.gmra.mxu3 %vm267_vm1, %v2813_v16 }
 0x2ad   : > { %936 = vmatpush.bf16.msrb.mxu2 %v907_v14  ;;  %v887_v47 = vadd.f32 %v2766_v20, %v886_v52  ;;  %v3430_v20 = vld [vmem:[#allocation22_spill] sm:$0xff] }
 0x2af   : > { %v888_v43 = vadd.f32 %v2771_v58, %v887_v47  ;;  %v3431_v58 = vld [vmem:[#allocation23_spill] sm:$0xff] }
 0x2b1   : > { %937 = vmatpush.bf16.msrb.mxu2 %v906_v29  ;;  %v889_v9 = vadd.f32 %v2738_v26, %v888_v43  ;;  %v3432_v26 = vld [vmem:[#allocation4_spill] sm:$0xff] }
 0x2b3   : > { %v890_v46 = vadd.f32 %v2747_v10, %v889_v9  ;;  %1814 = vmatmul.msk.bf16.vlgmr.msrb.gmra.mxu1 %vm267_vm1, %v3429_v45  ;;  %v573_v10 = vrot.slane %v2741_v21, 4 }
 0x2b5   : > { %938 = vmatpush.bf16.msrb.mxu2 %v905_v44  ;;  %v574_v62 = vadd.f32 %v573_v10, %v2741_v21  ;;  %v891_v19 = vrot.slane %v890_v46, 4 }
 0x2b7   : > { %1833 = vmatmul.msk.bf16.gmra.mxu0 %vm267_vm1, %v3430_v20  ;;  %v575_v4 = vrot.slane %v574_v62, 2  ;;  %v892_v53 = vadd.f32 %v891_v19, %v890_v46 }
 0x2b8   : > { %939 = vmatmul.bf16.vlgmr.msrb.gmra.mxu2 %v915_v50 }
 0x2b9   : > { %v576_v38 = vadd.f32 %v575_v4, %v574_v62  ;;  %v893_v23 = vrot.slane %v892_v53, 2 }
 0x2bb   : > { %v577_v39 = vrot.slane %v576_v38, 1  ;;  %v894_v2 = vadd.f32 %v893_v23, %v892_v53 }
 0x2bd   : > { %v578_v15 = vadd.f32 %v577_v39, %v576_v38  ;;  %v895_v28 = vrot.slane %v894_v2, 1 }
 0x2bf   : > { %1994 = vrcp.f32 %v578_v15  ;;  %v896_v11 = vadd.f32 %v895_v28, %v894_v2 }
 0x2c1   : > { %1996 = vrcp.f32 %v896_v11 }
 0x2c3   : > { %1815 = vmatmul.msk.bf16.gmra.mxu1 %vm267_vm1, %v3430_v20 }
 0x2c5   : > { %v1995_v17 = vpop.eup %1994 }
 0x2c7   : > { %v1997_v34 = vpop.eup %1996 }
 0x2d3   : > { %1816 = vmatmul.msk.bf16.gmra.mxu1 %vm267_vm1, %v3431_v58 }
 0x2e3   : > { %1817 = vmatmul.msk.bf16.gmra.mxu1 %vm267_vm1, %v3432_v26 }
 0x2f3   : > { %1818 = vmatmul.msk.bf16.gmra.mxu1 %vm267_vm1, %v3433_v35 }
 0x303   : > { %1819 = vmatmul.msk.bf16.gmra.mxu1 %vm267_vm1, %v2701_v40 }
 0x313   : > { %1820 = vmatmul.msk.bf16.gmra.mxu1 %vm267_vm1, %v2784_v57 }
 0x314   : > { %v610_v37 = vpop.f32.mrf.mxu0 }
 0x31b   : > { %v623_v8 = vpop.f32.mrf.mxu2 }
 0x31c   : > { %v624_v22 = vadd.f32 %v623_v8, %v610_v37  ;;  %v612_v41 = vpop.f32.mrf.mxu0 }
 0x31e   : > { %v628_v21 = vmul.f32 %v1995_v17, %v624_v22 }
 0x320   : > { %v927_v0 = vpop.f32.mrf.mxu1  ;;  %629 = vst [vmem:[%s2843_s28] sm:$0xf] %v628_v21 }
 0x323   : > { %1821 = vmatmul.msk.bf16.gmra.mxu1 %vm267_vm1, %v2806_v30  ;;  %v625_v55 = vpop.f32.mrf.mxu2 }
 0x328   : > { %v929_v50 = vpop.f32.mrf.mxu1 }
 0x330   : > { %v2848_v60 = vpop.f32.mrf.mxu1 }
 0x333   : > { %1822 = vmatmul.msk.bf16.gmra.mxu1 %vm267_vm1, %v3434_v59 }
 0x338   : > { %v2852_v25 = vpop.f32.mrf.mxu1 }
 0x33b   : > { %v940_v1 = vpop.f32.mrf.mxu2 }
 0x33c   : > { %v941_v12 = vadd.f32 %v940_v1, %v927_v0 }
 0x33e   : > { %v945_v31 = vmul.f32 %v1997_v34, %v941_v12 }
 0x340   : > { %1810 = vst [vmem:[%s2843_s28 + $0x4] sm:$0xf] %v945_v31  ;;  %v2855_v51 = vpop.f32.mrf.mxu1 }
 0x343   : > { %v942_v27 = vpop.f32.mrf.mxu2  ;;  %1823 = vmatmul.msk.bf16.gmra.mxu1 %vm267_vm1, %v3435_v61 }
 0x348   : > { %v2859_v3 = vpop.f32.mrf.mxu1 }
 0x350   : > { %v2861_v36 = vpop.f32.mrf.mxu1 }
 0x351   : > { %v1130_v19 = vmax.f32 %v2848_v60, %v2861_v36 }
 0x353   : > { %1824 = vmatmul.msk.bf16.gmra.mxu1 %vm267_vm1, %v3436_v42 }
 0x358   : > { %v2865_v7 = vpop.f32.mrf.mxu1 }
 0x359   : > { %v1131_v37 = vmax.f32 %v2852_v25, %v2865_v7 }
 0x360   : > { %v2867_v56 = vpop.f32.mrf.mxu1 }
 0x361   : > { %v1132_v8 = vmax.f32 %v2855_v51, %v2867_v56 }
 0x363   : > { %1825 = vmatmul.msk.bf16.gmra.mxu1 %vm267_vm1, %v3437_v6 }
 0x368   : > { %v2871_v24 = vpop.f32.mrf.mxu1 }
 0x369   : > { %v1133_v22 = vmax.f32 %v2859_v3, %v2871_v24 }
 0x370   : > { %v2873_v13 = vpop.f32.mrf.mxu1 }
 0x371   : > { %v1134_v17 = vmax.f32 %v1130_v19, %v2873_v13 }
 0x373   : > { %1826 = vmatmul.msk.bf16.gmra.mxu1 %vm267_vm1, %v3438_v32 }
 0x378   : > { %v2877_v49 = vpop.f32.mrf.mxu1 }
 0x379   : > { %v1135_v41 = vmax.f32 %v1131_v37, %v2877_v49 }
 0x380   : > { %v2879_v18 = vpop.f32.mrf.mxu1 }
 0x381   : > { %v1136_v21 = vmax.f32 %v1132_v8, %v2879_v18 }
 0x383   : > { %1827 = vmatmul.msk.bf16.gmra.mxu1 %vm267_vm1, %v2732_v33 }
 0x388   : > { %v2883_v5 = vpop.f32.mrf.mxu1 }
 0x389   : > { %v1137_v53 = vmax.f32 %v1133_v22, %v2883_v5 }
 0x390   : > { %v2885_v45 = vpop.f32.mrf.mxu1 }
 0x391   : > { %v1138_v55 = vmax.f32 %v1134_v17, %v2885_v45 }
 0x393   : > { %1828 = vmatmul.msk.bf16.gmra.mxu1 %vm267_vm1, %v2802_v48 }
 0x398   : > { %v2889_v14 = vpop.f32.mrf.mxu1 }
 0x399   : > { %v1139_v0 = vmax.f32 %v1135_v41, %v2889_v14 }
 0x3a0   : > { %v2891_v52 = vpop.f32.mrf.mxu1 }
 0x3a1   : > { %v1140_v50 = vmax.f32 %v1136_v21, %v2891_v52 }
 0x3a3   : > { %1829 = vmatmul.msk.bf16.gmra.mxu1 %vm267_vm1, %v2813_v16 }
 0x3a8   : > { %v2895_v47 = vpop.f32.mrf.mxu1 }
 0x3a9   : > { %v1141_v2 = vmax.f32 %v1137_v53, %v2895_v47 }
 0x3b0   : > { %v2897_v29 = vpop.f32.mrf.mxu1 }
 0x3b1   : > { %v1142_v11 = vmax.f32 %v1138_v55, %v2897_v29 }
 0x3b8   : > { %v2899_v43 = vpop.f32.mrf.mxu1 }
 0x3b9   : > { %v1143_v28 = vmax.f32 %v1139_v0, %v2899_v43 }
 0x3c0   : > { %v2901_v9 = vpop.f32.mrf.mxu1 }
 0x3c1   : > { %v1144_v1 = vmax.f32 %v1140_v50, %v2901_v9 }
 0x3c8   : > { %v2903_v44 = vpop.f32.mrf.mxu1 }
 0x3c9   : > { %v1145_v12 = vmax.f32 %v1141_v2, %v2903_v44 }
 0x3d0   : > { %v2905_v46 = vpop.f32.mrf.mxu1 }
 0x3d1   : > { %v1146_v31 = vmax.f32 %v1142_v11, %v2905_v46 }
 0x3d8   : > { %v2907_v48 = vpop.f32.mrf.mxu1 }
 0x3d9   : > { %v1147_v34 = vmax.f32 %v1143_v28, %v2907_v48 }
 0x3e0   : > { %v2909_v20 = vpop.f32.mrf.mxu1 }
 0x3e1   : > { %v1148_v27 = vmax.f32 %v1144_v1, %v2909_v20 }
 0x3e8   : > { %v2911_v10 = vpop.f32.mrf.mxu1 }
 0x3e9   : > { %v1149_v37 = vmax.f32 %v1145_v12, %v2911_v10 }
 0x3f0   : > { %v2913_v62 = vpop.f32.mrf.mxu1 }
 0x3f1   : > { %v1150_v8 = vmax.f32 %v1146_v31, %v2913_v62 }
 0x3f8   : > { %v2915_v16 = vpop.f32.mrf.mxu1 }
 0x3f9   : > { %v1151_v19 = vmax.f32 %v1147_v34, %v2915_v16 }
 0x400   : > { %v2917_v4 = vpop.f32.mrf.mxu1 }
 0x401   : > { %v1152_v22 = vmax.f32 %v1148_v27, %v2917_v4 }
 0x408   : > { %v2919_v38 = vpop.f32.mrf.mxu1 }
 0x409   : > { %v1153_v41 = vmax.f32 %v1149_v37, %v2919_v38 }
 0x410   : > { %v2921_v39 = vpop.f32.mrf.mxu1 }
 0x411   : > { %v1154_v53 = vmax.f32 %v1150_v8, %v2921_v39 }
 0x418   : > { %v2923_v15 = vpop.f32.mrf.mxu1 }
 0x419   : > { %v1155_v17 = vmax.f32 %v1151_v19, %v2923_v15 }
 0x41b   : > { %v1158_v50 = vmax.f32 %v1154_v53, %v1155_v17 }
 0x420   : > { %v2938_v23 = vpop.f32.mrf.mxu1 }
 0x421   : > { %v1156_v0 = vmax.f32 %v1152_v22, %v2938_v23 }
 0x428   : > { %v2956_v21 = vpop.f32.mrf.mxu1 }
 0x429   : > { %v1157_v55 = vmax.f32 %v1153_v41, %v2956_v21 }
 0x42b   : > { %v1159_v2 = vmax.f32 %v1156_v0, %v1157_v55 }
 0x42d   : > { %v1160_v28 = vmax.f32 %v1158_v50, %v1159_v2 }
 0x42f   : > { %v1161_v11 = vrot.slane %v1160_v28, 4 }
 0x431   : > { %v1162_v1 = vmax.f32 %v1160_v28, %v1161_v11 }
 0x433   : > { %v1163_v12 = vrot.slane %v1162_v1, 2 }
 0x435   : > { %v1164_v34 = vmax.f32 %v1162_v1, %v1163_v12 }
 0x437   : > { %v1165_v31 = vrot.slane %v1164_v34, 1 }
 0x439   : > { %v2961_v27 = vmax.f32 %v1164_v34, %v1165_v31 }
 0x43b   : > { %v1167_v37 = vsub.f32 %v2848_v60, %v2961_v27  ;;  %v1168_v19 = vsub.f32 %v2852_v25, %v2961_v27  ;;  %v1169_v8 = vsub.f32 %v2855_v51, %v2961_v27  ;;  %v1170_v22 = vsub.f32 %v2859_v3, %v2961_v27 }
 0x43c   : > { %v1171_v53 = vsub.f32 %v2861_v36, %v2961_v27  ;;  %v1172_v55 = vsub.f32 %v2865_v7, %v2961_v27  ;;  %v1173_v25 = vsub.f32 %v2867_v56, %v2961_v27  ;;  %v1174_v51 = vsub.f32 %v2871_v24, %v2961_v27 }
 0x43d   : > { %v1199_v41 = vmul.f32 1.442695, %v1167_v37  ;;  %v1201_v17 = vmul.f32 1.442695, %v1168_v19  ;;  %v1203_v0 = vmul.f32 1.442695, %v1169_v8  ;;  %v1175_v50 = vsub.f32 %v2873_v13, %v2961_v27 }
 0x43e   : > { %v1205_v60 = vmul.f32 1.442695, %v1170_v22  ;;  %v1207_v3 = vmul.f32 1.442695, %v1171_v53  ;;  %v1176_v36 = vsub.f32 %v2877_v49, %v2961_v27  ;;  %v1209_v2 = vmul.f32 1.442695, %v1172_v55 }
 0x43f   : > { %1998 = vpow2.f32 %v1199_v41  ;;  %v1181_v7 = vsub.f32 %v2891_v52, %v2961_v27  ;;  %v1211_v11 = vmul.f32 1.442695, %v1173_v25  ;;  %v1182_v24 = vsub.f32 %v2895_v47, %v2961_v27 }
 0x440   : > { %2000 = vpow2.f32 %v1201_v17  ;;  %v1213_v1 = vmul.f32 1.442695, %v1174_v51  ;;  %v1179_v13 = vsub.f32 %v2885_v45, %v2961_v27  ;;  %v1215_v12 = vmul.f32 1.442695, %v1175_v50 }
 0x441   : > { %2002 = vpow2.f32 %v1203_v0  ;;  %v1180_v52 = vsub.f32 %v2889_v14, %v2961_v27  ;;  %v1217_v31 = vmul.f32 1.442695, %v1176_v36  ;;  %v1227_v37 = vmul.f32 1.442695, %v1181_v7 }
 0x442   : > { %2004 = vpow2.f32 %v1205_v60  ;;  %v1177_v45 = vsub.f32 %v2879_v18, %v2961_v27  ;;  %v1229_v8 = vmul.f32 1.442695, %v1182_v24  ;;  %v1223_v22 = vmul.f32 1.442695, %v1179_v13 }
 0x443   : > { %2006 = vpow2.f32 %v1207_v3  ;;  %v1178_v14 = vsub.f32 %v2883_v5, %v2961_v27  ;;  %v1225_v53 = vmul.f32 1.442695, %v1180_v52  ;;  %v1193_v5 = vsub.f32 %v2917_v4, %v2961_v27 }
 0x444   : > { %2008 = vpow2.f32 %v1209_v2  ;;  %v1219_v60 = vmul.f32 1.442695, %v1177_v45  ;;  %v1194_v7 = vsub.f32 %v2919_v38, %v2961_v27  ;;  %v1183_v24 = vsub.f32 %v2897_v29, %v2961_v27 }
 0x445   : > { %v2983_v28 = vpop.eup %1998  ;;  %2010 = vpow2.f32 %v1211_v11  ;;  %v1221_v3 = vmul.f32 1.442695, %v1178_v14  ;;  %v1251_v52 = vmul.f32 1.442695, %v1193_v5  ;;  %v1195_v45 = vsub.f32 %v2921_v39, %v2961_v27 }
 0x446   : > { %v2987_v56 = vpop.eup %2000  ;;  %2012 = vpow2.f32 %v1213_v1  ;;  %v1253_v29 = vmul.f32 1.442695, %v1194_v7  ;;  %v1186_v5 = vsub.f32 %v2903_v44, %v2961_v27 }
 0x447   : > { %v1263_v49 = vadd.f32 %v2987_v56, %v2983_v28  ;;  %v2995_v34 = vpop.eup %2002  ;;  %2014 = vpow2.f32 %v1215_v12  ;;  %v1184_v12 = vsub.f32 %v2899_v43, %v2961_v27  ;;  %v1255_v39 = vmul.f32 1.442695, %v1195_v45 }
 0x448   : > { %v3000_v19 = vpop.eup %2004  ;;  %2016 = vpow2.f32 %v1217_v31 }
 0x449   : > { %v1264_v47 = vadd.f32 %v2995_v34, %v1263_v49  ;;  %v3005_v17 = vpop.eup %2006  ;;  %2018 = vpow2.f32 %v1227_v37  ;;  %v1197_v49 = vsub.f32 %v2938_v23, %v2961_v27  ;;  %v1196_v23 = vsub.f32 %v2923_v15, %v2961_v27 }
 0x44a   : > { %v3010_v55 = vpop.eup %2008  ;;  %2020 = vpow2.f32 %v1229_v8  ;;  %v1231_v8 = vmul.f32 1.442695, %v1183_v24 }
 0x44b   : > { %v1265_v41 = vadd.f32 %v3000_v19, %v1264_v47  ;;  %v3012_v18 = vpop.eup %2010  ;;  %2022 = vpow2.f32 %v1223_v22  ;;  %v1198_v47 = vsub.f32 %v2956_v21, %v2961_v27  ;;  %v1259_v14 = vmul.f32 1.442695, %v1197_v49 }
 0x44c   : > { %v3015_v51 = vpop.eup %2012  ;;  %2024 = vpow2.f32 %v1225_v53  ;;  %v1185_v21 = vsub.f32 %v2901_v9, %v2961_v27  ;;  %v1257_v15 = vmul.f32 1.442695, %v1196_v23  ;;  %v1188_v9 = vsub.f32 %v2907_v48, %v2961_v27 }
 0x44d   : > { %v1266_v0 = vadd.f32 %v3005_v17, %v1265_v41  ;;  %v3017_v50 = vpop.eup %2014  ;;  %2026 = vpow2.f32 %v1219_v60  ;;  %v1233_v41 = vmul.f32 1.442695, %v1184_v12  ;;  %v1191_v49 = vsub.f32 %v2913_v62, %v2961_v27 }
 0x44e   : > { %v3022_v2 = vpop.eup %2016  ;;  %2028 = vpow2.f32 %v1221_v3  ;;  %v1241_v45 = vmul.f32 1.442695, %v1188_v9 }
 0x44f   : > { %v1267_v25 = vadd.f32 %v3010_v55, %v1266_v0  ;;  %v2019_v11 = vpop.eup %2018  ;;  %2030 = vpow2.f32 %v1251_v52  ;;  %v1304_v62 = vpack.c.bf16 %v3022_v2, %v3017_v50 }
 0x450   : > { %v2021_v13 = vpop.eup %2020  ;;  %2032 = vpow2.f32 %v1253_v29 }
 0x451   : > { %v1268_v36 = vadd.f32 %v3012_v18, %v1267_v25  ;;  %v2023_v4 = vpop.eup %2022  ;;  %v1307_v38 = vpack.c.bf16 %v2021_v13, %v2019_v11  ;;  %v1261_v25 = vmul.f32 1.442695, %v1198_v47  ;;  %2034 = vpow2.f32 %v1231_v8 }
 0x452   : > { %v2025_v37 = vpop.eup %2024  ;;  %2036 = vpow2.f32 %v1233_v41  ;;  %v1247_v8 = vmul.f32 1.442695, %v1191_v49  ;;  %v1303_v41 = vpack.c.bf16 %v3015_v51, %v3012_v18 }
 0x453   : > { %v1269_v1 = vadd.f32 %v3015_v51, %v1268_v36  ;;  %1322 = vmatpush.bf16.msra.mxu1 %v1307_v38  ;;  %v2027_v22 = vpop.eup %2026  ;;  %v1306_v0 = vpack.c.bf16 %v2025_v37, %v2023_v4  ;;  %v1187_v36 = vsub.f32 %v2905_v46, %v2961_v27  ;;  %2038 = vpow2.f32 %v1259_v14 }
 0x454   : > { %v2029_v60 = vpop.eup %2028  ;;  %2040 = vpow2.f32 %v1261_v25  ;;  %v1192_v46 = vsub.f32 %v2915_v16, %v2961_v27  ;;  %v1319_v25 = vld.sshfl [vmem:[#allocation1 + $0x8] sm:$0xff pattern:$0x73625140] }
 0x455   : > { %v1270_v31 = vadd.f32 %v3017_v50, %v1269_v1  ;;  %v1305_v24 = vpack.c.bf16 %v2029_v60, %v2027_v22  ;;  %v1235_v1 = vmul.f32 1.442695, %v1185_v21  ;;  %v3049_v12 = vpop.eup %2030  ;;  %2042 = vpow2.f32 %v1255_v39  ;;  %v1318_v39 = vld.sshfl [vmem:[#allocation1] sm:$0xff pattern:$0x73625140] }
 0x456   : > { %v3053_v52 = vpop.eup %2032  ;;  %2044 = vpow2.f32 %v1257_v15  ;;  %v1239_v48 = vmul.f32 1.442695, %v1187_v36  ;;  %v1249_v23 = vmul.f32 1.442695, %v1192_v46  ;;  %v1302_v21 = vpack.c.bf16 %v3010_v55, %v3005_v17  ;;  %1638 = vst [vmem:[#allocation1] ss:$4 sm:$0xff] %v2779_v63 }
 0x457   : > { %v1271_v43 = vadd.f32 %v3022_v2, %v1270_v31  ;;  %1323 = vmatpush.bf16.msra.mxu1 %v1306_v0  ;;  %v3057_v31 = vpop.eup %2034  ;;  %v1313_v47 = vpack.c.bf16 %v3053_v52, %v3049_v12  ;;  %2046 = vpow2.f32 %v1235_v1  ;;  %v1300_v63 = vpack.c.bf16 %v2987_v56, %v2983_v28 }
 0x458   : > { %v3063_v29 = vpop.eup %2036 }
 0x459   : > { %v1272_v53 = vadd.f32 %v2027_v22, %v1271_v43  ;;  %v3067_v16 = vpop.eup %2038  ;;  %v1308_v56 = vpack.c.bf16 %v3063_v29, %v3057_v31 }
 0x45a   : > { %v3069_v22 = vpop.eup %2040 }
 0x45b   : > { %v1273_v3 = vadd.f32 %v2029_v60, %v1272_v53  ;;  %1324 = vmatpush.bf16.msra.mxu1 %v1305_v24  ;;  %v2043_v50 = vpop.eup %2042 }
 0x45c   : > { %v2045_v14 = vpop.eup %2044 }
 0x45d   : > { %v1274_v7 = vadd.f32 %v2023_v4, %v1273_v3  ;;  %v1237_v4 = vmul.f32 1.442695, %v1186_v5  ;;  %v1314_v60 = vpack.c.bf16 %v2045_v14, %v2043_v50 }
 0x45f   : > { %v1275_v44 = vadd.f32 %v2025_v37, %v1274_v7  ;;  %v1189_v37 = vsub.f32 %v2909_v20, %v2961_v27  ;;  %1325 = vmatpush.bf16.msra.mxu1 %v1304_v62  ;;  %2048 = vpow2.f32 %v1237_v4  ;;  %v1315_v20 = vpack.c.bf16 %v3069_v22, %v3067_v16 }
 0x460   : > { %2050 = vpow2.f32 %v1239_v48  ;;  %v1301_v7 = vpack.c.bf16 %v3000_v19, %v2995_v34 }
 0x461   : > { %v1276_v38 = vadd.f32 %v2019_v11, %v1275_v44  ;;  %v1190_v11 = vsub.f32 %v2911_v10, %v2961_v27  ;;  %2052 = vpow2.f32 %v1241_v45  ;;  %1335 = vmatpush.bf16.msra.mxu2 %v1315_v20  ;;  %v2047_v10 = vpop.eup %2046 }
 0x462   : > { %2054 = vpow2.f32 %v1247_v8 }
 0x463   : > { %v1277_v43 = vadd.f32 %v2021_v13, %v1276_v38  ;;  %v1243_v13 = vmul.f32 1.442695, %v1189_v37  ;;  %1326 = vmatpush.bf16.msra.mxu1 %v1303_v41  ;;  %v1245_v27 = vmul.f32 1.442695, %v1190_v11  ;;  %2056 = vpow2.f32 %v1249_v23  ;;  %v1372_v41 = vpop.f32.mrf.mxu0 }
 0x465   : > { %v1278_v2 = vadd.f32 %v3057_v31, %v1277_v43  ;;  %v2049_v3 = vpop.eup %2048  ;;  %2058 = vpow2.f32 %v1243_v13  ;;  %1336 = vmatpush.bf16.msra.mxu2 %v1314_v60 }
 0x466   : > { %v2051_v18 = vpop.eup %2050  ;;  %2060 = vpow2.f32 %v1245_v27  ;;  %v1309_v62 = vpack.c.bf16 %v2049_v3, %v2047_v10 }
 0x467   : > { %v1279_v53 = vadd.f32 %v3063_v29, %v1278_v2  ;;  %1327 = vmatpush.bf16.msra.mxu1 %v1302_v21  ;;  %v2053_v5 = vpop.eup %2052 }
 0x468   : > { %v2055_v15 = vpop.eup %2054  ;;  %v1310_v19 = vpack.c.bf16 %v2053_v5, %v2051_v18 }
 0x469   : > { %v1280_v0 = vadd.f32 %v2047_v10, %v1279_v53  ;;  %v2057_v24 = vpop.eup %2056  ;;  %1337 = vmatpush.bf16.msra.mxu2 %v1313_v47  ;;  %v3144_v53 = vpop.f32.mrf.mxu3 }
 0x46a   : > { %v1312_v1 = vpack.c.bf16 %v2057_v24, %v2055_v15 }
 0x46b   : > { %v1281_v51 = vadd.f32 %v2049_v3, %v1280_v0  ;;  %1328 = vmatpush.bf16.msra.mxu1 %v1301_v7  ;;  %v2059_v17 = vpop.eup %2058  ;;  %v1374_v13 = vpop.f32.mrf.mxu0 }
 0x46c   : > { %v2061_v49 = vpop.eup %2060  ;;  %v1452_v60 = vmax.f32 %v1372_v41, %v1374_v13 }
 0x46d   : > { %v1282_v36 = vadd.f32 %v2051_v18, %v1281_v51  ;;  %1338 = vmatpush.bf16.msra.mxu2 %v1312_v1  ;;  %v1311_v4 = vpack.c.bf16 %v2061_v49, %v2059_v17 }
 0x46f   : > { %v1283_v9 = vadd.f32 %v2053_v5, %v1282_v36  ;;  %1329 = vmatpush.bf16.msra.mxu1 %v1300_v63 }
 0x471   : > { %v1284_v55 = vadd.f32 %v2059_v17, %v1283_v9  ;;  %1339 = vmatpush.bf16.msra.mxu2 %v1311_v4  ;;  %v3150_v0 = vpop.f32.mrf.mxu3 }
 0x472   : > { %1330 = vmatmul.bf16.vlgmr.msra.gmra.mxu1 %v1318_v39 }
 0x473   : > { %v1285_v44 = vadd.f32 %v2061_v49, %v1284_v55 }
 0x475   : > { %v1286_v46 = vadd.f32 %v2055_v15, %v1285_v44  ;;  %1340 = vmatpush.bf16.msra.mxu2 %v1310_v19 }
 0x477   : > { %v1287_v48 = vadd.f32 %v2057_v24, %v1286_v46 }
 0x479   : > { %v1288_v34 = vadd.f32 %v3049_v12, %v1287_v48  ;;  %1341 = vmatpush.bf16.msra.mxu2 %v1309_v62  ;;  %v3154_v18 = vpop.f32.mrf.mxu3 }
 0x47b   : > { %v1289_v38 = vadd.f32 %v3053_v52, %v1288_v34 }
 0x47d   : > { %v1290_v47 = vadd.f32 %v2043_v50, %v1289_v38  ;;  %1342 = vmatpush.bf16.msra.mxu2 %v1308_v56 }
 0x47f   : > { %v1291_v37 = vadd.f32 %v2045_v14, %v1290_v47 }
 0x480   : > { %1343 = vmatmul.bf16.vlgmr.msra.gmra.mxu2 %v1319_v25 }
 0x481   : > { %v1292_v28 = vadd.f32 %v3067_v16, %v1291_v37  ;;  %1855 = vmatpush.bf16.msrb.mxu2 %v2792_v54  ;;  %v3161_v7 = vpop.f32.mrf.mxu3 }
 0x483   : > { %v1293_v45 = vadd.f32 %v3069_v22, %v1292_v28 }
 0x485   : > { %v1294_v54 = vrot.slane %v1293_v45, 4 }
 0x487   : > { %v1295_v12 = vadd.f32 %v1294_v54, %v1293_v45 }
 0x490   : > { %1834 = vmatmul.msk.bf16.vlgmr.msrb.gmra.mxu2 %vm267_vm1, %v3431_v58  ;;  %v1296_v58 = vrot.slane %v1295_v12, 2 }
 0x4a0   : > { %1835 = vmatmul.msk.bf16.gmra.mxu2 %vm267_vm1, %v3432_v26  ;;  %v1297_v26 = vadd.f32 %v1296_v58, %v1295_v12 }
 0x4b0   : > { %1836 = vmatmul.msk.bf16.gmra.mxu2 %vm267_vm1, %v3433_v35  ;;  %v1298_v35 = vrot.slane %v1297_v26, 1 }
 0x4b2   : > { %v1299_v29 = vadd.f32 %v1298_v35, %v1297_v26 }
 0x4b4   : > { %2062 = vrcp.f32 %v1299_v29 }
 0x4ba   : > { %v2063_v16 = vpop.eup %2062 }
 0x4c0   : > { %1837 = vmatmul.msk.bf16.gmra.mxu2 %vm267_vm1, %v2701_v40 }
 0x4d0   : > { %1838 = vmatmul.msk.bf16.gmra.mxu2 %vm267_vm1, %v2784_v57 }
 0x4e0   : > { %1839 = vmatmul.msk.bf16.gmra.mxu2 %vm267_vm1, %v2806_v30 }
 0x4ef   : > { %v1331_v52 = vpop.f32.mrf.mxu1 }
 0x4f0   : > { %1840 = vmatmul.msk.bf16.gmra.mxu2 %vm267_vm1, %v3434_v59 }
 0x4f7   : > { %v1333_v31 = vpop.f32.mrf.mxu1 }
 0x500   : > { %1841 = vmatmul.msk.bf16.gmra.mxu2 %vm267_vm1, %v3435_v61 }
 0x503   : > { %v1344_v40 = vpop.f32.mrf.mxu2 }
 0x504   : > { %v1345_v57 = vadd.f32 %v1344_v40, %v1331_v52 }
 0x506   : > { %v1349_v30 = vmul.f32 %v2063_v16, %v1345_v57 }
 0x508   : > { %1830 = vst [vmem:[%s2843_s28 + $0x8] sm:$0xf] %v1349_v30 }
 0x50b   : > { %v1346_v8 = vpop.f32.mrf.mxu2 }
 0x510   : > { %1842 = vmatmul.msk.bf16.gmra.mxu2 %vm267_vm1, %v3436_v42 }
 0x513   : > { %v3112_v43 = vpop.f32.mrf.mxu2 }
 0x51b   : > { %v3114_v59 = vpop.f32.mrf.mxu2 }
 0x520   : > { %1843 = vmatmul.msk.bf16.gmra.mxu2 %vm267_vm1, %v3437_v6 }
 0x523   : > { %v3118_v22 = vpop.f32.mrf.mxu2 }
 0x52b   : > { %v3120_v11 = vpop.f32.mrf.mxu2 }
 0x530   : > { %1844 = vmatmul.msk.bf16.gmra.mxu2 %vm267_vm1, %v3438_v32 }
 0x533   : > { %v3124_v61 = vpop.f32.mrf.mxu2 }
 0x53b   : > { %v3126_v23 = vpop.f32.mrf.mxu2 }
 0x540   : > { %1845 = vmatmul.msk.bf16.gmra.mxu2 %vm267_vm1, %v2732_v33  ;;  %v1377_v33 = vpop.f32.mrf.mxu0 }
 0x541   : > { %v1453_v25 = vmax.f32 %v1377_v33, %v1452_v60 }
 0x543   : > { %v3130_v42 = vpop.f32.mrf.mxu2 }
 0x548   : > { %v1379_v21 = vpop.f32.mrf.mxu0 }
 0x549   : > { %v1454_v3 = vmax.f32 %v1379_v21, %v1453_v25 }
 0x54b   : > { %v3132_v50 = vpop.f32.mrf.mxu2  ;;  %v1455_v51 = vmax.f32 %v3144_v53, %v1454_v3 }
 0x54d   : > { %v1456_v15 = vmax.f32 %v3150_v0, %v1455_v51 }
 0x54f   : > { %v1457_v36 = vmax.f32 %v3154_v18, %v1456_v15 }
 0x551   : > { %v1458_v9 = vmax.f32 %v3161_v7, %v1457_v36 }
 0x553   : > { %v3134_v2 = vpop.f32.mrf.mxu2  ;;  %v1459_v17 = vmax.f32 %v3112_v43, %v1458_v9 }
 0x555   : > { %v1460_v55 = vmax.f32 %v3114_v59, %v1459_v17 }
 0x557   : > { %v1461_v1 = vmax.f32 %v3118_v22, %v1460_v55 }
 0x559   : > { %v1462_v49 = vmax.f32 %v3120_v11, %v1461_v1 }
 0x55b   : > { %v3136_v6 = vpop.f32.mrf.mxu2  ;;  %v1463_v44 = vmax.f32 %v3124_v61, %v1462_v49 }
 0x55d   : > { %v1464_v46 = vmax.f32 %v3126_v23, %v1463_v44 }
 0x55f   : > { %v1465_v4 = vmax.f32 %v3130_v42, %v1464_v46 }
 0x561   : > { %v1466_v34 = vmax.f32 %v3132_v50, %v1465_v4 }
 0x563   : > { %v3138_v20 = vpop.f32.mrf.mxu2  ;;  %v1467_v19 = vmax.f32 %v3134_v2, %v1466_v34 }
 0x565   : > { %v1468_v38 = vmax.f32 %v3136_v6, %v1467_v19 }
 0x567   : > { %v1469_v47 = vmax.f32 %v3138_v20, %v1468_v38 }
 0x56b   : > { %v3140_v14 = vpop.f32.mrf.mxu2 }
 0x56c   : > { %v1470_v37 = vmax.f32 %v3140_v14, %v1469_v47 }
 0x573   : > { %v3142_v32 = vpop.f32.mrf.mxu2 }
 0x574   : > { %v1471_v28 = vmax.f32 %v3142_v32, %v1470_v37 }
 0x57b   : > { %v3146_v10 = vpop.f32.mrf.mxu2 }
 0x57c   : > { %v1472_v56 = vmax.f32 %v3146_v10, %v1471_v28 }
 0x583   : > { %v3148_v27 = vpop.f32.mrf.mxu2 }
 0x584   : > { %v1476_v45 = vmax.f32 %v1472_v56, %v3148_v27 }
 0x58b   : > { %v3152_v39 = vpop.f32.mrf.mxu2 }
 0x58c   : > { %v1473_v12 = vmax.f32 %v3152_v39, %v1476_v45 }
 0x593   : > { %v3157_v5 = vpop.f32.mrf.mxu2 }
 0x594   : > { %v1477_v52 = vmax.f32 %v1473_v12, %v3157_v5 }
 0x59b   : > { %v3163_v24 = vpop.f32.mrf.mxu2 }
 0x59c   : > { %v1480_v58 = vmax.f32 %v3163_v24, %v1477_v52 }
 0x5a3   : > { %v3169_v63 = vpop.f32.mrf.mxu2 }
 0x5a4   : > { %v1474_v26 = vmax.f32 %v3169_v63, %v1480_v58 }
 0x5ab   : > { %v3175_v48 = vpop.f32.mrf.mxu2 }
 0x5ac   : > { %v1478_v35 = vmax.f32 %v1474_v26, %v3175_v48 }
 0x5b3   : > { %v3181_v62 = vpop.f32.mrf.mxu2 }
 0x5b4   : > { %v1475_v29 = vmax.f32 %v3181_v62, %v1478_v35 }
 0x5bb   : > { %v3187_v54 = vpop.f32.mrf.mxu2 }
 0x5bc   : > { %v1479_v40 = vmax.f32 %v1475_v29, %v3187_v54 }
 0x5c3   : > { %v3193_v31 = vpop.f32.mrf.mxu2 }
 0x5c4   : > { %v1481_v57 = vmax.f32 %v3193_v31, %v1479_v40 }
 0x5cb   : > { %v3199_v16 = vpop.f32.mrf.mxu2 }
 0x5cc   : > { %v1482_v30 = vmax.f32 %v3199_v16, %v1481_v57 }
 0x5ce   : > { %v1483_v8 = vrot.slane %v1482_v30, 4 }
 0x5d0   : > { %v1484_v60 = vmax.f32 %v1482_v30, %v1483_v8 }
 0x5d2   : > { %v1485_v25 = vrot.slane %v1484_v60, 2 }
 0x5d4   : > { %v1486_v3 = vmax.f32 %v1484_v60, %v1485_v25 }
 0x5d6   : > { %v1487_v51 = vrot.slane %v1486_v3, 1 }
 0x5d8   : > { %v3202_v15 = vmax.f32 %v1486_v3, %v1487_v51 }
 0x5da   : > { %v1489_v36 = vsub.f32 %v1372_v41, %v3202_v15  ;;  %v1490_v9 = vsub.f32 %v1374_v13, %v3202_v15  ;;  %v1491_v17 = vsub.f32 %v1377_v33, %v3202_v15  ;;  %v1492_v55 = vsub.f32 %v1379_v21, %v3202_v15 }
 0x5db   : > { %v1493_v44 = vsub.f32 %v3112_v43, %v3202_v15  ;;  %v1494_v4 = vsub.f32 %v3114_v59, %v3202_v15  ;;  %v1495_v41 = vsub.f32 %v3118_v22, %v3202_v15  ;;  %v1496_v13 = vsub.f32 %v3120_v11, %v3202_v15 }
 0x5dc   : > { %v1521_v1 = vmul.f32 1.442695, %v1489_v36  ;;  %v1523_v49 = vmul.f32 1.442695, %v1490_v9  ;;  %v1525_v46 = vmul.f32 1.442695, %v1491_v17  ;;  %v1497_v21 = vsub.f32 %v3124_v61, %v3202_v15 }
 0x5dd   : > { %v1527_v34 = vmul.f32 1.442695, %v1492_v55  ;;  %v1529_v33 = vmul.f32 1.442695, %v1493_v44  ;;  %v1503_v43 = vsub.f32 %v3138_v20, %v3202_v15  ;;  %v1531_v38 = vmul.f32 1.442695, %v1494_v4 }
 0x5de   : > { %2064 = vpow2.f32 %v1521_v1  ;;  %v1504_v22 = vsub.f32 %v3140_v14, %v3202_v15  ;;  %v1533_v47 = vmul.f32 1.442695, %v1495_v41  ;;  %v1501_v11 = vsub.f32 %v3134_v2, %v3202_v15 }
 0x5df   : > { %2066 = vpow2.f32 %v1523_v49  ;;  %v1535_v37 = vmul.f32 1.442695, %v1496_v13  ;;  %v1502_v61 = vsub.f32 %v3136_v6, %v3202_v15  ;;  %v1537_v28 = vmul.f32 1.442695, %v1497_v21 }
 0x5e0   : > { %2068 = vpow2.f32 %v1525_v46  ;;  %v1498_v45 = vsub.f32 %v3126_v23, %v3202_v15  ;;  %v1549_v14 = vmul.f32 1.442695, %v1503_v43  ;;  %v1551_v12 = vmul.f32 1.442695, %v1504_v22 }
 0x5e1   : > { %2070 = vpow2.f32 %v1527_v34  ;;  %v1499_v6 = vsub.f32 %v3130_v42, %v3202_v15  ;;  %v1545_v58 = vmul.f32 1.442695, %v1501_v11  ;;  %v1500_v26 = vsub.f32 %v3132_v50, %v3202_v15 }
 0x5e2   : > { %2072 = vpow2.f32 %v1529_v33  ;;  %v1547_v35 = vmul.f32 1.442695, %v1502_v61  ;;  %v1511_v40 = vsub.f32 %v3169_v63, %v3202_v15  ;;  %v1539_v57 = vmul.f32 1.442695, %v1498_v45 }
 0x5e3   : > { %2074 = vpow2.f32 %v1531_v38  ;;  %v1512_v30 = vsub.f32 %v3175_v48, %v3202_v15  ;;  %v1541_v50 = vmul.f32 1.442695, %v1499_v6  ;;  %v1543_v25 = vmul.f32 1.442695, %v1500_v26 }
 0x5e4   : > { %v3218_v19 = vpop.eup %2064  ;;  %2076 = vpow2.f32 %v1533_v47  ;;  %v1565_v63 = vmul.f32 1.442695, %v1511_v40  ;;  %v1505_v1 = vsub.f32 %v3142_v32, %v3202_v15  ;;  %v1519_v46 = vsub.f32 %v3154_v18, %v3202_v15 }
 0x5e5   : > { %v3222_v59 = vpop.eup %2066  ;;  %2078 = vpow2.f32 %v1535_v37  ;;  %v1567_v48 = vmul.f32 1.442695, %v1512_v30  ;;  %v1520_v13 = vsub.f32 %v3161_v7, %v3202_v15  ;;  %v1517_v32 = vsub.f32 %v3144_v53, %v3202_v15 }
 0x5e6   : > { %v1585_v20 = vadd.f32 %v3222_v59, %v3218_v19  ;;  %v3232_v56 = vpop.eup %2068  ;;  %2080 = vpow2.f32 %v1537_v28  ;;  %v1518_v21 = vsub.f32 %v3150_v0, %v3202_v15  ;;  %v1553_v43 = vmul.f32 1.442695, %v1505_v1 }
 0x5e7   : > { %v3237_v52 = vpop.eup %2070  ;;  %2082 = vpow2.f32 %v1549_v14  ;;  %v1506_v22 = vsub.f32 %v3146_v10, %v3202_v15  ;;  %v1581_v47 = vmul.f32 1.442695, %v1519_v46  ;;  %v1507_v7 = vsub.f32 %v3148_v27, %v3202_v15 }
 0x5e8   : > { %v1586_v2 = vadd.f32 %v3232_v56, %v1585_v20  ;;  %v3244_v29 = vpop.eup %2072  ;;  %2084 = vpow2.f32 %v1551_v12  ;;  %v1583_v28 = vmul.f32 1.442695, %v1520_v13  ;;  %v1508_v53 = vsub.f32 %v3152_v39, %v3202_v15 }
 0x5e9   : > { %v3251_v8 = vpop.eup %2074  ;;  %2086 = vpow2.f32 %v1545_v58  ;;  %v1515_v0 = vsub.f32 %v3193_v31, %v3202_v15  ;;  %v1577_v45 = vmul.f32 1.442695, %v1517_v32  ;;  %v1516_v10 = vsub.f32 %v3199_v16, %v3202_v15 }
 0x5ea   : > { %v1587_v23 = vadd.f32 %v3237_v52, %v1586_v2  ;;  %v3253_v60 = vpop.eup %2076  ;;  %2088 = vpow2.f32 %v1547_v35  ;;  %v1579_v12 = vmul.f32 1.442695, %v1518_v21  ;;  %v1555_v2 = vmul.f32 1.442695, %v1506_v22 }
 0x5eb   : > { %v3256_v51 = vpop.eup %2078  ;;  %2090 = vpow2.f32 %v1539_v57  ;;  %v1509_v39 = vsub.f32 %v3157_v5, %v3202_v15  ;;  %v1557_v31 = vmul.f32 1.442695, %v1507_v7  ;;  %v1513_v35 = vsub.f32 %v3181_v62, %v3202_v15  ;;  %v1639_v7 = vld.sshfl [vmem:[#allocation1] sm:$0xff pattern:$0x73625140] }
 0x5ec   : > { %v1588_v42 = vadd.f32 %v3244_v29, %v1587_v23  ;;  %v3258_v36 = vpop.eup %2080  ;;  %2092 = vpow2.f32 %v1541_v50  ;;  %v1573_v23 = vmul.f32 1.442695, %v1515_v0  ;;  %v1514_v16 = vsub.f32 %v3187_v54, %v3202_v15 }
 0x5ed   : > { %v2083_v17 = vpop.eup %2082  ;;  %2094 = vpow2.f32 %v1543_v25  ;;  %v1575_v40 = vmul.f32 1.442695, %v1516_v10  ;;  %v1510_v30 = vsub.f32 %v3163_v24, %v3202_v15  ;;  %v1559_v5 = vmul.f32 1.442695, %v1508_v53 }
 0x5ee   : > { %v1589_v3 = vadd.f32 %v3251_v8, %v1588_v42  ;;  %v3261_v55 = vpop.eup %2084  ;;  %2096 = vpow2.f32 %v1565_v63  ;;  %v1561_v62 = vmul.f32 1.442695, %v1509_v39  ;;  %v1569_v63 = vmul.f32 1.442695, %v1513_v35 }
 0x5ef   : > { %v2087_v44 = vpop.eup %2086  ;;  %v1629_v4 = vpack.c.bf16 %v3261_v55, %v2083_v17  ;;  %2098 = vpow2.f32 %v1567_v48  ;;  %v1571_v48 = vmul.f32 1.442695, %v1514_v16  ;;  %v1563_v15 = vmul.f32 1.442695, %v1510_v30 }
 0x5f0   : > { %v1590_v9 = vadd.f32 %v3253_v60, %v1589_v3  ;;  %v2089_v34 = vpop.eup %2088  ;;  %2100 = vpow2.f32 %v1553_v43  ;;  %v1625_v1 = vpack.c.bf16 %v3256_v51, %v3253_v60 }
 0x5f1   : > { %v2091_v33 = vpop.eup %2090  ;;  %1643 = vmatpush.bf16.msra.mxu2 %v1629_v4  ;;  %v1628_v11 = vpack.c.bf16 %v2089_v34, %v2087_v44  ;;  %2102 = vpow2.f32 %v1581_v47 }
 0x5f2   : > { %v1591_v49 = vadd.f32 %v3256_v51, %v1590_v9  ;;  %v2093_v38 = vpop.eup %2092  ;;  %2104 = vpow2.f32 %v1583_v28  ;;  %v1626_v42 = vpack.c.bf16 %v2091_v33, %v3258_v36 }
 0x5f3   : > { %v2095_v37 = vpop.eup %2094  ;;  %2106 = vpow2.f32 %v1577_v45 }
 0x5f4   : > { %v1592_v41 = vadd.f32 %v3258_v36, %v1591_v49  ;;  %v3280_v20 = vpop.eup %2096  ;;  %v1627_v6 = vpack.c.bf16 %v2095_v37, %v2093_v38  ;;  %2108 = vpow2.f32 %v1579_v12 }
 0x5f5   : > { %1644 = vmatpush.bf16.msra.mxu2 %v1628_v11  ;;  %v3286_v14 = vpop.eup %2098  ;;  %2110 = vpow2.f32 %v1555_v2 }
 0x5f6   : > { %v1593_v18 = vadd.f32 %v2091_v33, %v1592_v41  ;;  %v1633_v58 = vpack.c.bf16 %v3286_v14, %v3280_v20  ;;  %v3301_v50 = vpop.eup %2100  ;;  %2112 = vpow2.f32 %v1557_v31  ;;  %v1624_v41 = vpack.c.bf16 %v3251_v8, %v3244_v29 }
 0x5f7   : > { %v3303_v3 = vpop.eup %2102  ;;  %2114 = vpow2.f32 %v1573_v23  ;;  %v1622_v29 = vpack.c.bf16 %v3222_v59, %v3218_v19 }
 0x5f8   : > { %v1594_v61 = vadd.f32 %v2093_v38, %v1593_v18  ;;  %v2105_v54 = vpop.eup %2104  ;;  %2116 = vpow2.f32 %v1575_v40  ;;  %v1623_v18 = vpack.c.bf16 %v3237_v52, %v3232_v56 }
 0x5f9   : > { %1645 = vmatpush.bf16.msra.mxu2 %v1627_v6  ;;  %v2107_v24 = vpop.eup %2106  ;;  %2118 = vpow2.f32 %v1559_v5  ;;  %v1637_v36 = vpack.c.bf16 %v2105_v54, %v3303_v3 }
 0x5fa   : > { %v1595_v27 = vadd.f32 %v2095_v37, %v1594_v61  ;;  %v2109_v49 = vpop.eup %2108  ;;  %2120 = vpow2.f32 %v1561_v62 }
 0x5fb   : > { %2122 = vpow2.f32 %v1569_v63  ;;  %1656 = vmatpush.bf16.msra.mxu3 %v1637_v36 }
 0x5fc   : > { %v1596_v26 = vadd.f32 %v2087_v44, %v1595_v27  ;;  %v2111_v44 = vpop.eup %2110  ;;  %2124 = vpow2.f32 %v1571_v48  ;;  %v1640_v27 = vld.sshfl [vmem:[#allocation1 + $0x8] sm:$0xff pattern:$0x73625140] }
 0x5fd   : > { %1646 = vmatpush.bf16.msra.mxu2 %v1626_v42  ;;  %v2113_v46 = vpop.eup %2112  ;;  %2126 = vpow2.f32 %v1563_v15  ;;  %v1630_v10 = vpack.c.bf16 %v2111_v44, %v3301_v50 }
 0x5fe   : > { %v1597_v57 = vadd.f32 %v2089_v34, %v1596_v26  ;;  %v1636_v34 = vpack.c.bf16 %v2109_v49, %v2107_v24 }
 0x600   : > { %v1598_v25 = vadd.f32 %v2083_v17, %v1597_v57  ;;  %1657 = vmatpush.bf16.msra.mxu3 %v1636_v34 }
 0x601   : > { %1647 = vmatpush.bf16.msra.mxu2 %v1625_v1 }
 0x602   : > { %v1599_v9 = vadd.f32 %v3261_v55, %v1598_v25  ;;  %v2115_v55 = vpop.eup %2114 }
 0x603   : > { %v2117_v13 = vpop.eup %2116 }
 0x604   : > { %v1600_v17 = vadd.f32 %v3301_v50, %v1599_v9  ;;  %v2119_v60 = vpop.eup %2118  ;;  %v1635_v43 = vpack.c.bf16 %v2117_v13, %v2115_v55 }
 0x605   : > { %1648 = vmatpush.bf16.msra.mxu2 %v1624_v41  ;;  %v2121_v51 = vpop.eup %2120  ;;  %v1631_v45 = vpack.c.bf16 %v2119_v60, %v2113_v46 }
 0x606   : > { %v1601_v4 = vadd.f32 %v2111_v44, %v1600_v17  ;;  %v2123_v21 = vpop.eup %2122  ;;  %1658 = vmatpush.bf16.msra.mxu3 %v1635_v43 }
 0x607   : > { %v2125_v38 = vpop.eup %2124 }
 0x608   : > { %v1602_v33 = vadd.f32 %v2113_v46, %v1601_v4  ;;  %v2127_v47 = vpop.eup %2126  ;;  %v1634_v37 = vpack.c.bf16 %v2125_v38, %v2123_v21 }
 0x609   : > { %1649 = vmatpush.bf16.msra.mxu2 %v1623_v18  ;;  %v1632_v52 = vpack.c.bf16 %v2127_v47, %v2121_v51 }
 0x60a   : > { %v1603_v32 = vadd.f32 %v2119_v60, %v1602_v33  ;;  %1659 = vmatpush.bf16.msra.mxu3 %v1634_v37 }
 0x60c   : > { %v1604_v22 = vadd.f32 %v2121_v51, %v1603_v32 }
 0x60d   : > { %1650 = vmatpush.bf16.msra.mxu2 %v1622_v29 }
 0x60e   : > { %v1605_v11 = vadd.f32 %v2127_v47, %v1604_v22  ;;  %1660 = vmatpush.bf16.msra.mxu3 %v1633_v58 }
 0x610   : > { %v1606_v8 = vadd.f32 %v3280_v20, %v1605_v11  ;;  %1651 = vmatmul.bf16.vlgmr.msra.gmra.mxu2 %v1639_v7 }
 0x612   : > { %v1607_v61 = vadd.f32 %v3286_v14, %v1606_v8  ;;  %1661 = vmatpush.bf16.msra.mxu3 %v1632_v52 }
 0x614   : > { %v1608_v28 = vadd.f32 %v2123_v21, %v1607_v61 }
 0x616   : > { %v1609_v56 = vadd.f32 %v2125_v38, %v1608_v28  ;;  %1662 = vmatpush.bf16.msra.mxu3 %v1631_v45 }
 0x618   : > { %v1610_v53 = vadd.f32 %v2115_v55, %v1609_v56 }
 0x61a   : > { %v1611_v0 = vadd.f32 %v2117_v13, %v1610_v53  ;;  %1663 = vmatpush.bf16.msra.mxu3 %v1630_v10 }
 0x61c   : > { %v1612_v19 = vadd.f32 %v2107_v24, %v1611_v0 }
 0x61d   : > { %1664 = vmatmul.bf16.vlgmr.msra.gmra.mxu3 %v1640_v27 }
 0x61e   : > { %v1613_v59 = vadd.f32 %v2109_v49, %v1612_v19 }
 0x620   : > { %v1614_v12 = vadd.f32 %v3303_v3, %v1613_v59 }
 0x622   : > { %v1615_v2 = vadd.f32 %v2105_v54, %v1614_v12 }
 0x624   : > { %v1616_v20 = vrot.slane %v1615_v2, 4 }
 0x626   : > { %v1617_v14 = vadd.f32 %v1616_v20, %v1615_v2 }
 0x628   : > { %v1618_v6 = vrot.slane %v1617_v14, 2 }
 0x62a   : > { %v1619_v39 = vadd.f32 %v1618_v6, %v1617_v14 }
 0x62c   : > { %v1620_v31 = vrot.slane %v1619_v39, 1 }
 0x62e   : > { %v1621_v26 = vadd.f32 %v1620_v31, %v1619_v39 }
 0x630   : > { %2128 = vrcp.f32 %v1621_v26 }
 0x636   : > { %v2129_v40 = vpop.eup %2128 }
 0x693   : > { %v1652_v58 = vpop.f32.mrf.mxu2 }
 0x69b   : > { %v1654_v35 = vpop.f32.mrf.mxu2 }
 0x6a0   : > { %v1665_v23 = vpop.f32.mrf.mxu3 }
 0x6a1   : > { %v1666_v16 = vadd.f32 %v1665_v23, %v1652_v58 }
 0x6a3   : > { %v1670_v57 = vmul.f32 %v2129_v40, %v1666_v16 }
 0x6a5   : > { %1848 = vst [vmem:[%s2843_s28 + $0xc] sm:$0xf] %v1670_v57 }
 0x6a8   : > { %v1667_v30 = vpop.f32.mrf.mxu3 }
 0x6a9 PF: > { %s13_s12 = sadd.s32 1, %s2136_s12  }
 0x6aa   : > { %p10_p4 = scmp.ge.s32.totalorder %s13_s12, 4  }
 0x6ac   :  { %12 = sbr.rel (!%p10_p4) target bundleno = 1 (0x1), region = 76 }

</bundles_post_ra>
